<compile_context>
chip_gen: v7x
topology: tpu7x:2x2x1
jax: 0.10.0
libtpu: 0.0.40
codegen_flags: <defaults>
</compile_context>

<pallas_src>
import functools

import jax
import jax.numpy as jnp
from jax.experimental import pallas as pl
from jax.experimental.pallas import tpu as pltpu


_MIN_TILE = 16                      # batch-tile granularity (bf16 sublane tile)
_VMEM_LIMIT = 48 * 1024 * 1024      # > v5e 16 MiB scoped default, < v7x 64 MiB VMEM


# ----------------------------- Pallas kernels ------------------------------

def conv1_block_kernel(p_ref, w_ref, b_ref, o_ref):
    """conv1 (BN folded) + 2x2 maxpool + ReLU, batched over the whole tile.

    p_ref: (4, 25, bb*144) bf16  pool-slab-major patches, lanes = (image, pixel)
    w_ref: (10, 25)        bf16  BN-folded conv1 weights
    b_ref: (10, 1)         f32   BN-folded conv1 bias
    o_ref: (10, bb*144)    bf16  pooled activations (channel rows, lane-dense)
    """
    w = w_ref[...]
    m = None
    for s in range(p_ref.shape[0]):                 # 4 pool-window positions
        y = jnp.dot(w, p_ref[s], preferred_element_type=jnp.float32)
        m = y if m is None else jnp.maximum(m, y)   # elementwise max = 2x2 maxpool
    o_ref[...] = jnp.maximum(m + b_ref[...], 0.0).astype(o_ref.dtype)


def conv2_head_kernel(p_ref, w2_ref, b2_ref, w3_ref, b3_ref, w4_ref, b4_ref,
                      o_ref):
    """conv2 block + NCHW flatten + fc1 + ReLU + fc2 + log_softmax (fused).

    p_ref:  (4, 16, bb, 250) bf16  patches: (pool slab, pooled pixel, image, tap*cin)
    w2_ref: (250, 20) bf16 ; b2_ref: (1, 20) f32   BN-folded conv2 weights (transposed)
    w3_ref: (16, 20, 50) bf16 ; b3_ref: (1, 50) f32  fc1 (weights pre-split per pixel)
    w4_ref: (50, 10) bf16 ; b4_ref: (1, 10) f32      fc2
    o_ref:  (bb, 10) f32   log-probabilities
    """
    n_pool, n_pix, bb, k2 = p_ref.shape
    w2t = w2_ref[...]

    # conv2: one matmul per pool slab covering all images and all pooled pixels.
    m = None
    for s in range(n_pool):
        x = p_ref[s].reshape(n_pix * bb, k2)        # free leading-dim collapse
        y = jnp.dot(x, w2t, preferred_element_type=jnp.float32)   # (n_pix*bb, 20)
        m = y if m is None else jnp.maximum(m, y)
    a = jnp.maximum(m + b2_ref[...], 0.0).astype(jnp.bfloat16)     # rows = pix*bb + b

    # NCHW flatten + fc1: contract over (channel, pixel) with 16 sublane-aligned
    # row slices, one small MXU matmul each, accumulated in f32 (no concats).
    h = jnp.zeros((bb, w3_ref.shape[2]), jnp.float32)
    for pix in range(n_pix):
        h = h + jnp.dot(a[pix * bb:(pix + 1) * bb, :], w3_ref[pix],
                        preferred_element_type=jnp.float32)
    h = jnp.maximum(h + b3_ref[...], 0.0)                          # (bb, 50)

    # TODO(synk): training-mode F.dropout / Dropout2d not implemented (eval mode).
    logits = jnp.dot(h.astype(jnp.bfloat16), w4_ref[...],
                     preferred_element_type=jnp.float32) + b4_ref[...]   # (bb, 10)
    z = logits - jnp.max(logits, axis=-1, keepdims=True)
    o_ref[...] = z - jnp.log(jnp.sum(jnp.exp(z), axis=-1, keepdims=True))


# ------------------------------ Pallas wrappers ------------------------------

def _round_up(n, m):
    return (n + m - 1) // m * m


def _choose_batch_tile(batch, block_b):
    """Batch tile (multiple of 16) minimizing padding; >=2 grid steps if B>=32."""
    steps = max(1, -(-batch // block_b))
    if batch >= 2 * _MIN_TILE:
        steps = max(steps, 2)        # both v7x TensorCores get work
    bb = _round_up(-(-batch // steps), _MIN_TILE)
    return bb, bb * steps


def conv1_block(p1, w1, b1, *, pooled_pixels, block_b):
    n_pool, k1, bn = p1.shape
    cout = w1.shape[0]
    grid = (bn // (block_b * pooled_pixels),)
    return pl.pallas_call(
        conv1_block_kernel,
        out_shape=jax.ShapeDtypeStruct((cout, bn), jnp.bfloat16),
        grid=grid,
        in_specs=[
            pl.BlockSpec((n_pool, k1, block_b * pooled_pixels),
                         lambda i: (0, 0, i)),
            pl.BlockSpec((cout, k1), lambda i: (0, 0)),     # weights stay resident
            pl.BlockSpec((cout, 1), lambda i: (0, 0)),
        ],
        out_specs=pl.BlockSpec((cout, block_b * pooled_pixels), lambda i: (0, i)),
        compiler_params=pltpu.CompilerParams(
            dimension_semantics=("parallel",),
            vmem_limit_bytes=_VMEM_LIMIT),
    )(p1, w1, b1)


def conv2_head_block(p2, w2t, b2, fw1, fb1, fw2, fb2, *, block_b):
    n_pool, n_pix, bp, k2 = p2.shape
    out_dim = fw2.shape[1]
    grid = (bp // block_b,)
    return pl.pallas_call(
        conv2_head_kernel,
        out_shape=jax.ShapeDtypeStruct((bp, out_dim), jnp.float32),
        grid=grid,
        in_specs=[
            pl.BlockSpec((n_pool, n_pix, block_b, k2), lambda i: (0, 0, i, 0)),
            pl.BlockSpec(w2t.shape, lambda i: (0, 0)),
            pl.BlockSpec(b2.shape, lambda i: (0, 0)),
            pl.BlockSpec(fw1.shape, lambda i: (0, 0, 0)),
            pl.BlockSpec(fb1.shape, lambda i: (0, 0)),
            pl.BlockSpec(fw2.shape, lambda i: (0, 0)),
            pl.BlockSpec(fb2.shape, lambda i: (0, 0)),
        ],
        out_specs=pl.BlockSpec((block_b, out_dim), lambda i: (i, 0)),
        compiler_params=pltpu.CompilerParams(
            dimension_semantics=("parallel",),
            vmem_limit_bytes=_VMEM_LIMIT),
    )(p2, w2t, b2, fw1, fb1, fw2, fb2)


# ------------------------------- JAX glue -----------------------------------

def im2col_pool_conv1(x):
    """NHWC (B,28,28,1) -> (4, 25, B*144) pool-grouped patches (XLA plumbing).

    out[dy*2+dx, (i*5+j)*C+c, b*144 + hp*12 + wp] = x[b, 2*hp+dy+i, 2*wp+dx+j, c]
    """
    B, H, W, C = x.shape
    kh = kw = 5
    Ho, Wo = H - kh + 1, W - kw + 1
    Hp, Wp = Ho // 2, Wo // 2
    taps = [x[:, i:i + Ho, j:j + Wo, :] for i in range(kh) for j in range(kw)]
    p = jnp.stack(taps, axis=0)                        # (25, B, Ho, Wo, C)
    p = p.reshape(kh * kw, B, Hp, 2, Wp, 2, C)         # (t, b, hp, dy, wp, dx, c)
    p = p.transpose(3, 5, 0, 6, 1, 2, 4)               # (dy, dx, t, c, b, hp, wp)
    return p.reshape(4, kh * kw * C, B * Hp * Wp)


def im2col_pool_conv2(y1):
    """(10, B*144) conv1 activations -> (4, 16, B, 250) conv2 patches.

    out[dy*2+dx, hp*4+wp, b, (i*5+j)*10+c] = a1[c, b, 2*hp+dy+i, 2*wp+dx+j]
    """
    C, BN = y1.shape
    B = BN // 144
    a = y1.reshape(C, B, 12, 12)                       # (c, b, h, w)
    kh = kw = 5
    Ho, Wo = 8, 8
    Hp, Wp = 4, 4
    taps = [a[:, :, i:i + Ho, j:j + Wo] for i in range(kh) for j in range(kw)]
    p = jnp.stack(taps, axis=0)                        # (25, c, b, ho, wo)
    p = p.reshape(kh * kw, C, B, Hp, 2, Wp, 2)         # (t, c, b, hp, dy, wp, dx)
    p = p.transpose(4, 6, 3, 5, 2, 0, 1)               # (dy, dx, hp, wp, b, t, c)
    return p.reshape(4, Hp * Wp, B, kh * kw * C)


def classifier_forward(x_nchw, params, *, block_b=128):
    B = x_nchw.shape[0]
    bb, Bp = _choose_batch_tile(B, block_b)

    # bf16 from the start: all im2col layout plumbing moves half the bytes.
    x = jnp.transpose(x_nchw, (0, 2, 3, 1)).astype(jnp.bfloat16)   # NHWC (B,28,28,1)
    if Bp != B:
        x = jnp.pad(x, ((0, Bp - B), (0, 0), (0, 0), (0, 0)))

    # --- block 1: conv1 + bn1(folded) + maxpool2 + relu ----------------------
    p1 = im2col_pool_conv1(x)                                       # (4, 25, Bp*144)
    y1 = conv1_block(p1, params["w1"], params["b1"],
                     pooled_pixels=144, block_b=bb)                 # (10, Bp*144)

    # --- block 2 + MLP head (single fused kernel) ----------------------------
    # TODO(synk): the conv2 im2col still round-trips HBM through XLA; fusing it
    # into the kernel (building the 250-wide patch rows from VMEM-resident y1)
    # would remove roughly half the per-image HBM traffic.
    p2 = im2col_pool_conv2(y1)                                      # (4, 16, Bp, 250)
    out = conv2_head_block(p2, params["w2t"], params["b2"],
                           params["fw1"], params["fb1"],
                           params["fw2"], params["fb2"], block_b=bb)  # (Bp, 10)
    return out[:B]


# ------------------------------- parameters ----------------------------------

def init_raw_params(key, output_dim=10):
    """Raw f32 parameters in PyTorch layouts (also used by the f32 reference)."""
    ks = jax.random.split(key, 8)
    return {
        "conv1_w": jax.random.normal(ks[0], (10, 1, 5, 5), jnp.float32) * 0.1,
        "conv1_b": jax.random.normal(ks[1], (10,), jnp.float32) * 0.1,
        "conv2_w": jax.random.normal(ks[2], (20, 10, 5, 5), jnp.float32) * 0.1,
        "conv2_b": jax.random.normal(ks[3], (20,), jnp.float32) * 0.1,
        "fc1_w": jax.random.normal(ks[4], (50, 320), jnp.float32) * 0.05,
        "fc1_b": jax.random.normal(ks[5], (50,), jnp.float32) * 0.05,
        "fc2_w": jax.random.normal(ks[6], (output_dim, 50), jnp.float32) * 0.05,
        "fc2_b": jax.random.normal(ks[7], (output_dim,), jnp.float32) * 0.05,
        # BatchNorm2d eval-mode stats/affine (PyTorch default init).
        "bn1_g": jnp.ones((10,), jnp.float32), "bn1_b": jnp.zeros((10,), jnp.float32),
        "bn1_rm": jnp.zeros((10,), jnp.float32), "bn1_rv": jnp.ones((10,), jnp.float32),
        "bn2_g": jnp.ones((20,), jnp.float32), "bn2_b": jnp.zeros((20,), jnp.float32),
        "bn2_rm": jnp.zeros((20,), jnp.float32), "bn2_rv": jnp.ones((20,), jnp.float32),
    }


def prepare_params(raw, eps=1e-5):
    """Fold BN into conv weights/bias, reshape to kernel layouts, cast MXU
    operands to bf16 (accumulation stays f32 inside the kernels)."""
    def fold(w_oihw, b, g, beta, rm, rv):
        s = g / jnp.sqrt(rv + eps)                     # (Cout,)
        shift = beta - rm * s
        cout = w_oihw.shape[0]
        # cols = (i*kw + j)*Cin + cin  (tap-major, channel-minor)
        w_t = jnp.transpose(w_oihw, (0, 2, 3, 1)).reshape(cout, -1)
        w_f = (w_t * s[:, None]).astype(jnp.bfloat16)
        b_f = (b * s + shift).astype(jnp.float32)
        return w_f, b_f

    w1, b1 = fold(raw["conv1_w"], raw["conv1_b"],
                  raw["bn1_g"], raw["bn1_b"], raw["bn1_rm"], raw["bn1_rv"])
    w2, b2 = fold(raw["conv2_w"], raw["conv2_b"],
                  raw["bn2_g"], raw["bn2_b"], raw["bn2_rm"], raw["bn2_rv"])
    # fc1 weights pre-split per pooled pixel: (50, c*16+pix) -> (pix, c, 50)
    n_hid, n_feat = raw["fc1_w"].shape
    cin2 = raw["conv2_w"].shape[0]
    n_pix = n_feat // cin2
    fw1 = raw["fc1_w"].reshape(n_hid, cin2, n_pix).transpose(2, 1, 0)
    return {
        "w1": w1, "b1": b1.reshape(-1, 1),
        "w2t": w2.T, "b2": b2.reshape(1, -1),
        "fw1": fw1.astype(jnp.bfloat16),
        "fb1": raw["fc1_b"].reshape(1, -1).astype(jnp.float32),
        "fw2": raw["fc2_w"].T.astype(jnp.bfloat16),
        "fb2": raw["fc2_b"].reshape(1, -1).astype(jnp.float32),
    }


def reference_forward(x_nchw, raw, eps=1e-5):
    """Pure-JAX f32 reference of the PyTorch module in eval mode."""
    def conv(x, w, b):
        y = jax.lax.conv_general_dilated(
            x, w, window_strides=(1, 1), padding="VALID",
            dimension_numbers=("NCHW", "OIHW", "NCHW"))
        return y + b[None, :, None, None]

    def bn(y, g, beta, rm, rv):
        s = g / jnp.sqrt(rv + eps)
        return y * s[None, :, None, None] + (beta - rm * s)[None, :, None, None]

    def maxpool2(y):
        return jax.lax.reduce_window(y, -jnp.inf, jax.lax.max,
                                     (1, 1, 2, 2), (1, 1, 2, 2), "VALID")

    y = conv(x_nchw, raw["conv1_w"], raw["conv1_b"])
    y = jnp.maximum(maxpool2(bn(y, raw["bn1_g"], raw["bn1_b"],
                                raw["bn1_rm"], raw["bn1_rv"])), 0.0)
    y = conv(y, raw["conv2_w"], raw["conv2_b"])
    y = jnp.maximum(maxpool2(bn(y, raw["bn2_g"], raw["bn2_b"],
                                raw["bn2_rm"], raw["bn2_rv"])), 0.0)
    f = y.reshape(y.shape[0], -1)                      # NCHW flatten -> (B, 320)
    h = jnp.maximum(f @ raw["fc1_w"].T + raw["fc1_b"], 0.0)
    logits = h @ raw["fc2_w"].T + raw["fc2_b"]
    return jax.nn.log_softmax(logits, axis=-1)


if __name__ == "__main__":
    key = jax.random.PRNGKey(0)
    pkey, xkey = jax.random.split(key)
    raw = init_raw_params(pkey, output_dim=10)
    params = prepare_params(raw)

    # Input consistent with the module: fc1 expects 320 = 20*4*4 -> 28x28 input.
    x = jax.random.normal(xkey, (2, 1, 28, 28), jnp.float32)   # NCHW, like PyTorch

    fwd = jax.jit(functools.partial(classifier_forward, params=params))
    out = jax.block_until_ready(fwd(x))
    assert out.shape == (2, 10)
    assert bool(jnp.all(jnp.isfinite(out)))

    # f32 reference check (kernels use bf16 MXU operands -> loose tolerance).
    ref = reference_forward(x, raw)
    max_err = float(jnp.max(jnp.abs(out - ref)))
    assert max_err < 5e-2, f"mismatch vs f32 reference: {max_err}"
    print("KERNEL_OK")
</pallas_src>

<mosaic_0001>
module attributes {stable_mosaic.version = 11 : i64} {
  func.func @conv1_block_kernel(%arg0: i32, %arg1: memref<4x25x2304xbf16, #tpu.memory_space<vmem>>, %arg2: memref<10x25xbf16, #tpu.memory_space<vmem>>, %arg3: memref<10x1xf32, #tpu.memory_space<vmem>>, %arg4: memref<10x2304xbf16, #tpu.memory_space<vmem>>) attributes {dimension_semantics = [#tpu.dimension_semantics<parallel>], iteration_bounds = array<i64: 1>, scalar_prefetch = 0 : i64, scratch_operands = 0 : i64, tpu.core_type = #tpu.core_type<tc>, window_params = [{transform_indices = @transform_0, window_bounds = array<i64: 4, 25, 2304>}, {pipeline_mode = #tpu.pipeline_mode<synchronous>, transform_indices = @transform_1, window_bounds = array<i64: 10, 25>}, {pipeline_mode = #tpu.pipeline_mode<synchronous>, transform_indices = @transform_2, window_bounds = array<i64: 10, 1>}, {transform_indices = @transform_3, window_bounds = array<i64: 10, 2304>}]} {
    %c0 = arith.constant 0 : index
    %c0_0 = arith.constant 0 : index
    %0 = vector.load %arg2[%c0, %c0_0] : memref<10x25xbf16, #tpu.memory_space<vmem>>, vector<10x25xbf16>
    %c0_1 = arith.constant 0 : index
    %c0_2 = arith.constant 0 : index
    %c0_3 = arith.constant 0 : index
    %1 = vector.load %arg1[%c0_1, %c0_2, %c0_3] : memref<4x25x2304xbf16, #tpu.memory_space<vmem>>, vector<1x25x2304xbf16>
    %2 = vector.shape_cast %1 : vector<1x25x2304xbf16> to vector<25x2304xbf16>
    %cst = arith.constant dense<0.000000e+00> : vector<10x2304xf32>
    %3 = tpu.matmul %0, %2, %cst {dimension_numbers = #tpu.dot_dimension_numbers<[1], [0], [0], [1], [0, 0, 1, 1], [], []>} : vector<10x25xbf16>, vector<25x2304xbf16>, vector<10x2304xf32> -> vector<10x2304xf32>
    %c1 = arith.constant 1 : index
    %c0_4 = arith.constant 0 : index
    %c0_5 = arith.constant 0 : index
    %4 = vector.load %arg1[%c1, %c0_4, %c0_5] : memref<4x25x2304xbf16, #tpu.memory_space<vmem>>, vector<1x25x2304xbf16>
    %5 = vector.shape_cast %4 : vector<1x25x2304xbf16> to vector<25x2304xbf16>
    %cst_6 = arith.constant dense<0.000000e+00> : vector<10x2304xf32>
    %6 = tpu.matmul %0, %5, %cst_6 {dimension_numbers = #tpu.dot_dimension_numbers<[1], [0], [0], [1], [0, 0, 1, 1], [], []>} : vector<10x25xbf16>, vector<25x2304xbf16>, vector<10x2304xf32> -> vector<10x2304xf32>
    %7 = arith.maximumf %3, %6 : vector<10x2304xf32>
    %c2 = arith.constant 2 : index
    %c0_7 = arith.constant 0 : index
    %c0_8 = arith.constant 0 : index
    %8 = vector.load %arg1[%c2, %c0_7, %c0_8] : memref<4x25x2304xbf16, #tpu.memory_space<vmem>>, vector<1x25x2304xbf16>
    %9 = vector.shape_cast %8 : vector<1x25x2304xbf16> to vector<25x2304xbf16>
    %cst_9 = arith.constant dense<0.000000e+00> : vector<10x2304xf32>
    %10 = tpu.matmul %0, %9, %cst_9 {dimension_numbers = #tpu.dot_dimension_numbers<[1], [0], [0], [1], [0, 0, 1, 1], [], []>} : vector<10x25xbf16>, vector<25x2304xbf16>, vector<10x2304xf32> -> vector<10x2304xf32>
    %11 = arith.maximumf %7, %10 : vector<10x2304xf32>
    %c3 = arith.constant 3 : index
    %c0_10 = arith.constant 0 : index
    %c0_11 = arith.constant 0 : index
    %12 = vector.load %arg1[%c3, %c0_10, %c0_11] : memref<4x25x2304xbf16, #tpu.memory_space<vmem>>, vector<1x25x2304xbf16>
    %13 = vector.shape_cast %12 : vector<1x25x2304xbf16> to vector<25x2304xbf16>
    %cst_12 = arith.constant dense<0.000000e+00> : vector<10x2304xf32>
    %14 = tpu.matmul %0, %13, %cst_12 {dimension_numbers = #tpu.dot_dimension_numbers<[1], [0], [0], [1], [0, 0, 1, 1], [], []>} : vector<10x25xbf16>, vector<25x2304xbf16>, vector<10x2304xf32> -> vector<10x2304xf32>
    %15 = arith.maximumf %11, %14 : vector<10x2304xf32>
    %c0_13 = arith.constant 0 : index
    %c0_14 = arith.constant 0 : index
    %16 = vector.load %arg3[%c0_13, %c0_14] : memref<10x1xf32, #tpu.memory_space<vmem>>, vector<10x1xf32>
    %17 = vector.broadcast %16 : vector<10x1xf32> to vector<10x2304xf32>
    %18 = arith.addf %15, %17 : vector<10x2304xf32>
    %cst_15 = arith.constant 0.000000e+00 : f32
    %19 = vector.broadcast %cst_15 : f32 to vector<10x2304xf32>
    %20 = arith.maximumf %18, %19 : vector<10x2304xf32>
    %21 = arith.truncf %20 : vector<10x2304xf32> to vector<10x2304xbf16>
    %c0_16 = arith.constant 0 : index
    %c0_17 = arith.constant 0 : index
    %22 = vector.load %arg4[%c0_16, %c0_17] : memref<10x2304xbf16, #tpu.memory_space<vmem>>, vector<10x2304xbf16>
    tpu.vector_store %arg4[%c0_16, %c0_17], %21 {strides = array<i32>} : memref<10x2304xbf16, #tpu.memory_space<vmem>>, vector<10x2304xbf16>,
    return
  }
  func.func @transform_0(%arg0: i32) -> (i32, i32, i32) {
    %c0_i32 = arith.constant 0 : i32
    %c0_i32_0 = arith.constant 0 : i32
    %c0_i32_1 = arith.constant 0 : i32
    return %c0_i32, %c0_i32_0, %arg0 : i32, i32, i32
  }
  func.func @transform_1(%arg0: i32) -> (i32, i32) {
    %c0_i32 = arith.constant 0 : i32
    %c0_i32_0 = arith.constant 0 : i32
    %c0_i32_1 = arith.constant 0 : i32
    return %c0_i32, %c0_i32_0 : i32, i32
  }
  func.func @transform_2(%arg0: i32) -> (i32, i32) {
    %c0_i32 = arith.constant 0 : i32
    %c0_i32_0 = arith.constant 0 : i32
    %c0_i32_1 = arith.constant 0 : i32
    return %c0_i32, %c0_i32_0 : i32, i32
  }
  func.func @transform_3(%arg0: i32) -> (i32, i32) {
    %c0_i32 = arith.constant 0 : i32
    %c0_i32_0 = arith.constant 0 : i32
    return %c0_i32, %arg0 : i32, i32
  }
}

module attributes {stable_mosaic.version = 11 : i64} {
  func.func @conv2_head_kernel(%arg0: i32, %arg1: memref<4x16x16x250xbf16, #tpu.memory_space<vmem>>, %arg2: memref<250x20xbf16, #tpu.memory_space<vmem>>, %arg3: memref<1x20xf32, #tpu.memory_space<vmem>>, %arg4: memref<16x20x50xbf16, #tpu.memory_space<vmem>>, %arg5: memref<1x50xf32, #tpu.memory_space<vmem>>, %arg6: memref<50x10xbf16, #tpu.memory_space<vmem>>, %arg7: memref<1x10xf32, #tpu.memory_space<vmem>>, %arg8: memref<16x10xf32, #tpu.memory_space<vmem>>) attributes {dimension_semantics = [#tpu.dimension_semantics<parallel>], iteration_bounds = array<i64: 1>, scalar_prefetch = 0 : i64, scratch_operands = 0 : i64, tpu.core_type = #tpu.core_type<tc>, window_params = [{transform_indices = @transform_0, window_bounds = array<i64: 4, 16, 16, 250>}, {pipeline_mode = #tpu.pipeline_mode<synchronous>, transform_indices = @transform_1, window_bounds = array<i64: 250, 20>}, {pipeline_mode = #tpu.pipeline_mode<synchronous>, transform_indices = @transform_2, window_bounds = array<i64: 1, 20>}, {pipeline_mode = #tpu.pipeline_mode<synchronous>, transform_indices = @transform_3, window_bounds = array<i64: 16, 20, 50>}, {pipeline_mode = #tpu.pipeline_mode<synchronous>, transform_indices = @transform_4, window_bounds = array<i64: 1, 50>}, {pipeline_mode = #tpu.pipeline_mode<synchronous>, transform_indices = @transform_5, window_bounds = array<i64: 50, 10>}, {pipeline_mode = #tpu.pipeline_mode<synchronous>, transform_indices = @transform_6, window_bounds = array<i64: 1, 10>}, {transform_indices = @transform_7, window_bounds = array<i64: 16, 10>}]} {
    %c0 = arith.constant 0 : index
    %c0_0 = arith.constant 0 : index
    %0 = vector.load %arg2[%c0, %c0_0] : memref<250x20xbf16, #tpu.memory_space<vmem>>, vector<250x20xbf16>
    %c0_1 = arith.constant 0 : index
    %c0_2 = arith.constant 0 : index
    %c0_3 = arith.constant 0 : index
    %c0_4 = arith.constant 0 : index
    %1 = vector.load %arg1[%c0_1, %c0_2, %c0_3, %c0_4] : memref<4x16x16x250xbf16, #tpu.memory_space<vmem>>, vector<1x16x16x250xbf16>
    %2 = vector.shape_cast %1 : vector<1x16x16x250xbf16> to vector<16x16x250xbf16>
    %3 = vector.shape_cast %2 : vector<16x16x250xbf16> to vector<256x250xbf16>
    %cst = arith.constant dense<0.000000e+00> : vector<256x20xf32>
    %4 = tpu.matmul %3, %0, %cst {dimension_numbers = #tpu.dot_dimension_numbers<[1], [0], [0], [1], [0, 0, 1, 1], [], []>} : vector<256x250xbf16>, vector<250x20xbf16>, vector<256x20xf32> -> vector<256x20xf32>
    %c1 = arith.constant 1 : index
    %c0_5 = arith.constant 0 : index
    %c0_6 = arith.constant 0 : index
    %c0_7 = arith.constant 0 : index
    %5 = vector.load %arg1[%c1, %c0_5, %c0_6, %c0_7] : memref<4x16x16x250xbf16, #tpu.memory_space<vmem>>, vector<1x16x16x250xbf16>
    %6 = vector.shape_cast %5 : vector<1x16x16x250xbf16> to vector<16x16x250xbf16>
    %7 = vector.shape_cast %6 : vector<16x16x250xbf16> to vector<256x250xbf16>
    %cst_8 = arith.constant dense<0.000000e+00> : vector<256x20xf32>
    %8 = tpu.matmul %7, %0, %cst_8 {dimension_numbers = #tpu.dot_dimension_numbers<[1], [0], [0], [1], [0, 0, 1, 1], [], []>} : vector<256x250xbf16>, vector<250x20xbf16>, vector<256x20xf32> -> vector<256x20xf32>
    %9 = arith.maximumf %4, %8 : vector<256x20xf32>
    %c2 = arith.constant 2 : index
    %c0_9 = arith.constant 0 : index
    %c0_10 = arith.constant 0 : index
    %c0_11 = arith.constant 0 : index
    %10 = vector.load %arg1[%c2, %c0_9, %c0_10, %c0_11] : memref<4x16x16x250xbf16, #tpu.memory_space<vmem>>, vector<1x16x16x250xbf16>
    %11 = vector.shape_cast %10 : vector<1x16x16x250xbf16> to vector<16x16x250xbf16>
    %12 = vector.shape_cast %11 : vector<16x16x250xbf16> to vector<256x250xbf16>
    %cst_12 = arith.constant dense<0.000000e+00> : vector<256x20xf32>
    %13 = tpu.matmul %12, %0, %cst_12 {dimension_numbers = #tpu.dot_dimension_numbers<[1], [0], [0], [1], [0, 0, 1, 1], [], []>} : vector<256x250xbf16>, vector<250x20xbf16>, vector<256x20xf32> -> vector<256x20xf32>
    %14 = arith.maximumf %9, %13 : vector<256x20xf32>
    %c3 = arith.constant 3 : index
    %c0_13 = arith.constant 0 : index
    %c0_14 = arith.constant 0 : index
    %c0_15 = arith.constant 0 : index
    %15 = vector.load %arg1[%c3, %c0_13, %c0_14, %c0_15] : memref<4x16x16x250xbf16, #tpu.memory_space<vmem>>, vector<1x16x16x250xbf16>
    %16 = vector.shape_cast %15 : vector<1x16x16x250xbf16> to vector<16x16x250xbf16>
    %17 = vector.shape_cast %16 : vector<16x16x250xbf16> to vector<256x250xbf16>
    %cst_16 = arith.constant dense<0.000000e+00> : vector<256x20xf32>
    %18 = tpu.matmul %17, %0, %cst_16 {dimension_numbers = #tpu.dot_dimension_numbers<[1], [0], [0], [1], [0, 0, 1, 1], [], []>} : vector<256x250xbf16>, vector<250x20xbf16>, vector<256x20xf32> -> vector<256x20xf32>
    %19 = arith.maximumf %14, %18 : vector<256x20xf32>
    %c0_17 = arith.constant 0 : index
    %c0_18 = arith.constant 0 : index
    %20 = vector.load %arg3[%c0_17, %c0_18] : memref<1x20xf32, #tpu.memory_space<vmem>>, vector<1x20xf32>
    %21 = vector.broadcast %20 : vector<1x20xf32> to vector<256x20xf32>
    %22 = arith.addf %19, %21 : vector<256x20xf32>
    %cst_19 = arith.constant 0.000000e+00 : f32
    %23 = vector.broadcast %cst_19 : f32 to vector<256x20xf32>
    %24 = arith.maximumf %22, %23 : vector<256x20xf32>
    %25 = arith.truncf %24 : vector<256x20xf32> to vector<256x20xbf16>
    %cst_20 = arith.constant 0.000000e+00 : f32
    %26 = vector.broadcast %cst_20 : f32 to vector<16x50xf32>
    %27 = vector.extract_strided_slice %25 {offsets = [0, 0], sizes = [16, 20], strides = [1, 1]} : vector<256x20xbf16> to vector<16x20xbf16>
    %c0_21 = arith.constant 0 : index
    %c0_22 = arith.constant 0 : index
    %c0_23 = arith.constant 0 : index
    %28 = vector.load %arg4[%c0_21, %c0_22, %c0_23] : memref<16x20x50xbf16, #tpu.memory_space<vmem>>, vector<1x20x50xbf16>
    %29 = vector.shape_cast %28 : vector<1x20x50xbf16> to vector<20x50xbf16>
    %cst_24 = arith.constant dense<0.000000e+00> : vector<16x50xf32>
    %30 = tpu.matmul %27, %29, %cst_24 {dimension_numbers = #tpu.dot_dimension_numbers<[1], [0], [0], [1], [0, 0, 1, 1], [], []>} : vector<16x20xbf16>, vector<20x50xbf16>, vector<16x50xf32> -> vector<16x50xf32>
    %31 = arith.addf %26, %30 : vector<16x50xf32>
    %32 = vector.extract_strided_slice %25 {offsets = [16, 0], sizes = [16, 20], strides = [1, 1]} : vector<256x20xbf16> to vector<16x20xbf16>
    %c1_25 = arith.constant 1 : index
    %c0_26 = arith.constant 0 : index
    %c0_27 = arith.constant 0 : index
    %33 = vector.load %arg4[%c1_25, %c0_26, %c0_27] : memref<16x20x50xbf16, #tpu.memory_space<vmem>>, vector<1x20x50xbf16>
    %34 = vector.shape_cast %33 : vector<1x20x50xbf16> to vector<20x50xbf16>
    %cst_28 = arith.constant dense<0.000000e+00> : vector<16x50xf32>
    %35 = tpu.matmul %32, %34, %cst_28 {dimension_numbers = #tpu.dot_dimension_numbers<[1], [0], [0], [1], [0, 0, 1, 1], [], []>} : vector<16x20xbf16>, vector<20x50xbf16>, vector<16x50xf32> -> vector<16x50xf32>
    %36 = arith.addf %31, %35 : vector<16x50xf32>
    %37 = vector.extract_strided_slice %25 {offsets = [32, 0], sizes = [16, 20], strides = [1, 1]} : vector<256x20xbf16> to vector<16x20xbf16>
    %c2_29 = arith.constant 2 : index
    %c0_30 = arith.constant 0 : index
    %c0_31 = arith.constant 0 : index
    %38 = vector.load %arg4[%c2_29, %c0_30, %c0_31] : memref<16x20x50xbf16, #tpu.memory_space<vmem>>, vector<1x20x50xbf16>
    %39 = vector.shape_cast %38 : vector<1x20x50xbf16> to vector<20x50xbf16>
    %cst_32 = arith.constant dense<0.000000e+00> : vector<16x50xf32>
    %40 = tpu.matmul %37, %39, %cst_32 {dimension_numbers = #tpu.dot_dimension_numbers<[1], [0], [0], [1], [0, 0, 1, 1], [], []>} : vector<16x20xbf16>, vector<20x50xbf16>, vector<16x50xf32> -> vector<16x50xf32>
    %41 = arith.addf %36, %40 : vector<16x50xf32>
    %42 = vector.extract_strided_slice %25 {offsets = [48, 0], sizes = [16, 20], strides = [1, 1]} : vector<256x20xbf16> to vector<16x20xbf16>
    %c3_33 = arith.constant 3 : index
    %c0_34 = arith.constant 0 : index
    %c0_35 = arith.constant 0 : index
    %43 = vector.load %arg4[%c3_33, %c0_34, %c0_35] : memref<16x20x50xbf16, #tpu.memory_space<vmem>>, vector<1x20x50xbf16>
    %44 = vector.shape_cast %43 : vector<1x20x50xbf16> to vector<20x50xbf16>
    %cst_36 = arith.constant dense<0.000000e+00> : vector<16x50xf32>
    %45 = tpu.matmul %42, %44, %cst_36 {dimension_numbers = #tpu.dot_dimension_numbers<[1], [0], [0], [1], [0, 0, 1, 1], [], []>} : vector<16x20xbf16>, vector<20x50xbf16>, vector<16x50xf32> -> vector<16x50xf32>
    %46 = arith.addf %41, %45 : vector<16x50xf32>
    %47 = vector.extract_strided_slice %25 {offsets = [64, 0], sizes = [16, 20], strides = [1, 1]} : vector<256x20xbf16> to vector<16x20xbf16>
    %c4 = arith.constant 4 : index
    %c0_37 = arith.constant 0 : index
    %c0_38 = arith.constant 0 : index
    %48 = vector.load %arg4[%c4, %c0_37, %c0_38] : memref<16x20x50xbf16, #tpu.memory_space<vmem>>, vector<1x20x50xbf16>
    %49 = vector.shape_cast %48 : vector<1x20x50xbf16> to vector<20x50xbf16>
    %cst_39 = arith.constant dense<0.000000e+00> : vector<16x50xf32>
    %50 = tpu.matmul %47, %49, %cst_39 {dimension_numbers = #tpu.dot_dimension_numbers<[1], [0], [0], [1], [0, 0, 1, 1], [], []>} : vector<16x20xbf16>, vector<20x50xbf16>, vector<16x50xf32> -> vector<16x50xf32>
    %51 = arith.addf %46, %50 : vector<16x50xf32>
    %52 = vector.extract_strided_slice %25 {offsets = [80, 0], sizes = [16, 20], strides = [1, 1]} : vector<256x20xbf16> to vector<16x20xbf16>
    %c5 = arith.constant 5 : index
    %c0_40 = arith.constant 0 : index
    %c0_41 = arith.constant 0 : index
    %53 = vector.load %arg4[%c5, %c0_40, %c0_41] : memref<16x20x50xbf16, #tpu.memory_space<vmem>>, vector<1x20x50xbf16>
    %54 = vector.shape_cast %53 : vector<1x20x50xbf16> to vector<20x50xbf16>
    %cst_42 = arith.constant dense<0.000000e+00> : vector<16x50xf32>
    %55 = tpu.matmul %52, %54, %cst_42 {dimension_numbers = #tpu.dot_dimension_numbers<[1], [0], [0], [1], [0, 0, 1, 1], [], []>} : vector<16x20xbf16>, vector<20x50xbf16>, vector<16x50xf32> -> vector<16x50xf32>
    %56 = arith.addf %51, %55 : vector<16x50xf32>
    %57 = vector.extract_strided_slice %25 {offsets = [96, 0], sizes = [16, 20], strides = [1, 1]} : vector<256x20xbf16> to vector<16x20xbf16>
    %c6 = arith.constant 6 : index
    %c0_43 = arith.constant 0 : index
    %c0_44 = arith.constant 0 : index
    %58 = vector.load %arg4[%c6, %c0_43, %c0_44] : memref<16x20x50xbf16, #tpu.memory_space<vmem>>, vector<1x20x50xbf16>
    %59 = vector.shape_cast %58 : vector<1x20x50xbf16> to vector<20x50xbf16>
    %cst_45 = arith.constant dense<0.000000e+00> : vector<16x50xf32>
    %60 = tpu.matmul %57, %59, %cst_45 {dimension_numbers = #tpu.dot_dimension_numbers<[1], [0], [0], [1], [0, 0, 1, 1], [], []>} : vector<16x20xbf16>, vector<20x50xbf16>, vector<16x50xf32> -> vector<16x50xf32>
    %61 = arith.addf %56, %60 : vector<16x50xf32>
    %62 = vector.extract_strided_slice %25 {offsets = [112, 0], sizes = [16, 20], strides = [1, 1]} : vector<256x20xbf16> to vector<16x20xbf16>
    %c7 = arith.constant 7 : index
    %c0_46 = arith.constant 0 : index
    %c0_47 = arith.constant 0 : index
    %63 = vector.load %arg4[%c7, %c0_46, %c0_47] : memref<16x20x50xbf16, #tpu.memory_space<vmem>>, vector<1x20x50xbf16>
    %64 = vector.shape_cast %63 : vector<1x20x50xbf16> to vector<20x50xbf16>
    %cst_48 = arith.constant dense<0.000000e+00> : vector<16x50xf32>
    %65 = tpu.matmul %62, %64, %cst_48 {dimension_numbers = #tpu.dot_dimension_numbers<[1], [0], [0], [1], [0, 0, 1, 1], [], []>} : vector<16x20xbf16>, vector<20x50xbf16>, vector<16x50xf32> -> vector<16x50xf32>
    %66 = arith.addf %61, %65 : vector<16x50xf32>
    %67 = vector.extract_strided_slice %25 {offsets = [128, 0], sizes = [16, 20], strides = [1, 1]} : vector<256x20xbf16> to vector<16x20xbf16>
    %c8 = arith.constant 8 : index
    %c0_49 = arith.constant 0 : index
    %c0_50 = arith.constant 0 : index
    %68 = vector.load %arg4[%c8, %c0_49, %c0_50] : memref<16x20x50xbf16, #tpu.memory_space<vmem>>, vector<1x20x50xbf16>
    %69 = vector.shape_cast %68 : vector<1x20x50xbf16> to vector<20x50xbf16>
    %cst_51 = arith.constant dense<0.000000e+00> : vector<16x50xf32>
    %70 = tpu.matmul %67, %69, %cst_51 {dimension_numbers = #tpu.dot_dimension_numbers<[1], [0], [0], [1], [0, 0, 1, 1], [], []>} : vector<16x20xbf16>, vector<20x50xbf16>, vector<16x50xf32> -> vector<16x50xf32>
    %71 = arith.addf %66, %70 : vector<16x50xf32>
    %72 = vector.extract_strided_slice %25 {offsets = [144, 0], sizes = [16, 20], strides = [1, 1]} : vector<256x20xbf16> to vector<16x20xbf16>
    %c9 = arith.constant 9 : index
    %c0_52 = arith.constant 0 : index
    %c0_53 = arith.constant 0 : index
    %73 = vector.load %arg4[%c9, %c0_52, %c0_53] : memref<16x20x50xbf16, #tpu.memory_space<vmem>>, vector<1x20x50xbf16>
    %74 = vector.shape_cast %73 : vector<1x20x50xbf16> to vector<20x50xbf16>
    %cst_54 = arith.constant dense<0.000000e+00> : vector<16x50xf32>
    %75 = tpu.matmul %72, %74, %cst_54 {dimension_numbers = #tpu.dot_dimension_numbers<[1], [0], [0], [1], [0, 0, 1, 1], [], []>} : vector<16x20xbf16>, vector<20x50xbf16>, vector<16x50xf32> -> vector<16x50xf32>
    %76 = arith.addf %71, %75 : vector<16x50xf32>
    %77 = vector.extract_strided_slice %25 {offsets = [160, 0], sizes = [16, 20], strides = [1, 1]} : vector<256x20xbf16> to vector<16x20xbf16>
    %c10 = arith.constant 10 : index
    %c0_55 = arith.constant 0 : index
    %c0_56 = arith.constant 0 : index
    %78 = vector.load %arg4[%c10, %c0_55, %c0_56] : memref<16x20x50xbf16, #tpu.memory_space<vmem>>, vector<1x20x50xbf16>
    %79 = vector.shape_cast %78 : vector<1x20x50xbf16> to vector<20x50xbf16>
    %cst_57 = arith.constant dense<0.000000e+00> : vector<16x50xf32>
    %80 = tpu.matmul %77, %79, %cst_57 {dimension_numbers = #tpu.dot_dimension_numbers<[1], [0], [0], [1], [0, 0, 1, 1], [], []>} : vector<16x20xbf16>, vector<20x50xbf16>, vector<16x50xf32> -> vector<16x50xf32>
    %81 = arith.addf %76, %80 : vector<16x50xf32>
    %82 = vector.extract_strided_slice %25 {offsets = [176, 0], sizes = [16, 20], strides = [1, 1]} : vector<256x20xbf16> to vector<16x20xbf16>
    %c11 = arith.constant 11 : index
    %c0_58 = arith.constant 0 : index
    %c0_59 = arith.constant 0 : index
    %83 = vector.load %arg4[%c11, %c0_58, %c0_59] : memref<16x20x50xbf16, #tpu.memory_space<vmem>>, vector<1x20x50xbf16>
    %84 = vector.shape_cast %83 : vector<1x20x50xbf16> to vector<20x50xbf16>
    %cst_60 = arith.constant dense<0.000000e+00> : vector<16x50xf32>
    %85 = tpu.matmul %82, %84, %cst_60 {dimension_numbers = #tpu.dot_dimension_numbers<[1], [0], [0], [1], [0, 0, 1, 1], [], []>} : vector<16x20xbf16>, vector<20x50xbf16>, vector<16x50xf32> -> vector<16x50xf32>
    %86 = arith.addf %81, %85 : vector<16x50xf32>
    %87 = vector.extract_strided_slice %25 {offsets = [192, 0], sizes = [16, 20], strides = [1, 1]} : vector<256x20xbf16> to vector<16x20xbf16>
    %c12 = arith.constant 12 : index
    %c0_61 = arith.constant 0 : index
    %c0_62 = arith.constant 0 : index
    %88 = vector.load %arg4[%c12, %c0_61, %c0_62] : memref<16x20x50xbf16, #tpu.memory_space<vmem>>, vector<1x20x50xbf16>
    %89 = vector.shape_cast %88 : vector<1x20x50xbf16> to vector<20x50xbf16>
    %cst_63 = arith.constant dense<0.000000e+00> : vector<16x50xf32>
    %90 = tpu.matmul %87, %89, %cst_63 {dimension_numbers = #tpu.dot_dimension_numbers<[1], [0], [0], [1], [0, 0, 1, 1], [], []>} : vector<16x20xbf16>, vector<20x50xbf16>, vector<16x50xf32> -> vector<16x50xf32>
    %91 = arith.addf %86, %90 : vector<16x50xf32>
    %92 = vector.extract_strided_slice %25 {offsets = [208, 0], sizes = [16, 20], strides = [1, 1]} : vector<256x20xbf16> to vector<16x20xbf16>
    %c13 = arith.constant 13 : index
    %c0_64 = arith.constant 0 : index
    %c0_65 = arith.constant 0 : index
    %93 = vector.load %arg4[%c13, %c0_64, %c0_65] : memref<16x20x50xbf16, #tpu.memory_space<vmem>>, vector<1x20x50xbf16>
    %94 = vector.shape_cast %93 : vector<1x20x50xbf16> to vector<20x50xbf16>
    %cst_66 = arith.constant dense<0.000000e+00> : vector<16x50xf32>
    %95 = tpu.matmul %92, %94, %cst_66 {dimension_numbers = #tpu.dot_dimension_numbers<[1], [0], [0], [1], [0, 0, 1, 1], [], []>} : vector<16x20xbf16>, vector<20x50xbf16>, vector<16x50xf32> -> vector<16x50xf32>
    %96 = arith.addf %91, %95 : vector<16x50xf32>
    %97 = vector.extract_strided_slice %25 {offsets = [224, 0], sizes = [16, 20], strides = [1, 1]} : vector<256x20xbf16> to vector<16x20xbf16>
    %c14 = arith.constant 14 : index
    %c0_67 = arith.constant 0 : index
    %c0_68 = arith.constant 0 : index
    %98 = vector.load %arg4[%c14, %c0_67, %c0_68] : memref<16x20x50xbf16, #tpu.memory_space<vmem>>, vector<1x20x50xbf16>
    %99 = vector.shape_cast %98 : vector<1x20x50xbf16> to vector<20x50xbf16>
    %cst_69 = arith.constant dense<0.000000e+00> : vector<16x50xf32>
    %100 = tpu.matmul %97, %99, %cst_69 {dimension_numbers = #tpu.dot_dimension_numbers<[1], [0], [0], [1], [0, 0, 1, 1], [], []>} : vector<16x20xbf16>, vector<20x50xbf16>, vector<16x50xf32> -> vector<16x50xf32>
    %101 = arith.addf %96, %100 : vector<16x50xf32>
    %102 = vector.extract_strided_slice %25 {offsets = [240, 0], sizes = [16, 20], strides = [1, 1]} : vector<256x20xbf16> to vector<16x20xbf16>
    %c15 = arith.constant 15 : index
    %c0_70 = arith.constant 0 : index
    %c0_71 = arith.constant 0 : index
    %103 = vector.load %arg4[%c15, %c0_70, %c0_71] : memref<16x20x50xbf16, #tpu.memory_space<vmem>>, vector<1x20x50xbf16>
    %104 = vector.shape_cast %103 : vector<1x20x50xbf16> to vector<20x50xbf16>
    %cst_72 = arith.constant dense<0.000000e+00> : vector<16x50xf32>
    %105 = tpu.matmul %102, %104, %cst_72 {dimension_numbers = #tpu.dot_dimension_numbers<[1], [0], [0], [1], [0, 0, 1, 1], [], []>} : vector<16x20xbf16>, vector<20x50xbf16>, vector<16x50xf32> -> vector<16x50xf32>
    %106 = arith.addf %101, %105 : vector<16x50xf32>
    %c0_73 = arith.constant 0 : index
    %c0_74 = arith.constant 0 : index
    %107 = vector.load %arg5[%c0_73, %c0_74] : memref<1x50xf32, #tpu.memory_space<vmem>>, vector<1x50xf32>
    %108 = vector.broadcast %107 : vector<1x50xf32> to vector<16x50xf32>
    %109 = arith.addf %106, %108 : vector<16x50xf32>
    %cst_75 = arith.constant 0.000000e+00 : f32
    %110 = vector.broadcast %cst_75 : f32 to vector<16x50xf32>
    %111 = arith.maximumf %109, %110 : vector<16x50xf32>
    %112 = arith.truncf %111 : vector<16x50xf32> to vector<16x50xbf16>
    %c0_76 = arith.constant 0 : index
    %c0_77 = arith.constant 0 : index
    %113 = vector.load %arg6[%c0_76, %c0_77] : memref<50x10xbf16, #tpu.memory_space<vmem>>, vector<50x10xbf16>
    %cst_78 = arith.constant dense<0.000000e+00> : vector<16x10xf32>
    %114 = tpu.matmul %112, %113, %cst_78 {dimension_numbers = #tpu.dot_dimension_numbers<[1], [0], [0], [1], [0, 0, 1, 1], [], []>} : vector<16x50xbf16>, vector<50x10xbf16>, vector<16x10xf32> -> vector<16x10xf32>
    %c0_79 = arith.constant 0 : index
    %c0_80 = arith.constant 0 : index
    %115 = vector.load %arg7[%c0_79, %c0_80] : memref<1x10xf32, #tpu.memory_space<vmem>>, vector<1x10xf32>
    %116 = vector.broadcast %115 : vector<1x10xf32> to vector<16x10xf32>
    %117 = arith.addf %114, %116 : vector<16x10xf32>
    %cst_81 = arith.constant dense<0xFF800000> : vector<16xf32>
    %118 = vector.multi_reduction <maximumf>, %117, %cst_81 [1] : vector<16x10xf32> to vector<16xf32>
    %119 = vector.shape_cast %118 : vector<16xf32> to vector<16x1xf32>
    %120 = vector.broadcast %119 : vector<16x1xf32> to vector<16x10xf32>
    %121 = arith.subf %117, %120 : vector<16x10xf32>
    %122 = math.exp %121 : vector<16x10xf32>
    %cst_82 = arith.constant dense<0.000000e+00> : vector<16xf32>
    %123 = vector.multi_reduction <add>, %122, %cst_82 [1] : vector<16x10xf32> to vector<16xf32>
    %124 = vector.shape_cast %123 : vector<16xf32> to vector<16x1xf32>
    %125 = math.log %124 : vector<16x1xf32>
    %126 = vector.broadcast %125 : vector<16x1xf32> to vector<16x10xf32>
    %127 = arith.subf %121, %126 : vector<16x10xf32>
    %c0_83 = arith.constant 0 : index
    %c0_84 = arith.constant 0 : index
    %128 = vector.load %arg8[%c0_83, %c0_84] : memref<16x10xf32, #tpu.memory_space<vmem>>, vector<16x10xf32>
    tpu.vector_store %arg8[%c0_83, %c0_84], %127 {strides = array<i32>} : memref<16x10xf32, #tpu.memory_space<vmem>>, vector<16x10xf32>,
    return
  }
  func.func @transform_0(%arg0: i32) -> (i32, i32, i32, i32) {
    %c0_i32 = arith.constant 0 : i32
    %c0_i32_0 = arith.constant 0 : i32
    %c0_i32_1 = arith.constant 0 : i32
    %c0_i32_2 = arith.constant 0 : i32
    return %c0_i32, %c0_i32_0, %arg0, %c0_i32_1 : i32, i32, i32, i32
  }
  func.func @transform_1(%arg0: i32) -> (i32, i32) {
    %c0_i32 = arith.constant 0 : i32
    %c0_i32_0 = arith.constant 0 : i32
    %c0_i32_1 = arith.constant 0 : i32
    return %c0_i32, %c0_i32_0 : i32, i32
  }
  func.func @transform_2(%arg0: i32) -> (i32, i32) {
    %c0_i32 = arith.constant 0 : i32
    %c0_i32_0 = arith.constant 0 : i32
    %c0_i32_1 = arith.constant 0 : i32
    return %c0_i32, %c0_i32_0 : i32, i32
  }
  func.func @transform_3(%arg0: i32) -> (i32, i32, i32) {
    %c0_i32 = arith.constant 0 : i32
    %c0_i32_0 = arith.constant 0 : i32
    %c0_i32_1 = arith.constant 0 : i32
    %c0_i32_2 = arith.constant 0 : i32
    return %c0_i32, %c0_i32_0, %c0_i32_1 : i32, i32, i32
  }
  func.func @transform_4(%arg0: i32) -> (i32, i32) {
    %c0_i32 = arith.constant 0 : i32
    %c0_i32_0 = arith.constant 0 : i32
    %c0_i32_1 = arith.constant 0 : i32
    return %c0_i32, %c0_i32_0 : i32, i32
  }
  func.func @transform_5(%arg0: i32) -> (i32, i32) {
    %c0_i32 = arith.constant 0 : i32
    %c0_i32_0 = arith.constant 0 : i32
    %c0_i32_1 = arith.constant 0 : i32
    return %c0_i32, %c0_i32_0 : i32, i32
  }
  func.func @transform_6(%arg0: i32) -> (i32, i32) {
    %c0_i32 = arith.constant 0 : i32
    %c0_i32_0 = arith.constant 0 : i32
    %c0_i32_1 = arith.constant 0 : i32
    return %c0_i32, %c0_i32_0 : i32, i32
  }
  func.func @transform_7(%arg0: i32) -> (i32, i32) {
    %c0_i32 = arith.constant 0 : i32
    %c0_i32_0 = arith.constant 0 : i32
    return %arg0, %c0_i32 : i32, i32
  }
}

</mosaic_0001>

<bundles_post_ra>
// kernel: classifier_forward.2
= control target key start
LH: loop header
LB: loop body
LE: loop exit
PB: predicated region body
PF: predicated region fallthrough
CT: control target
= control target key end

     0   :  { %vm224_vm0 = vcmask 1043456   ;;  %vm225_vm1 = vcmask 1044480   ;;  %v3457_v1 = vmov 65535   ;;  %v3458_v3 = vmov 0   ;;  %s4628_s0 = inlined_call_operand.vmem [shape: bf16[4,25,2304], index: 0, kind: input, shape index: {}]   ;;  %s4629_s1 = inlined_call_operand.vmem [shape: bf16[10,25], index: 1, kind: input, shape index: {}]   ;;  %s4630_s2 = inlined_call_operand.vmem [shape: f32[10,1], index: 2, kind: input, shape index: {}]   ;;  %s4631_s3 = inlined_call_operand.vmem [shape: bf16[10,2304], index: 3, kind: output, shape index: {}]  }
   0x1   :  { %v3239_v0 = vld [vmem:[%s4628_s0 + $0x4] ss:$72 sps:$4 sm:$0xff]   ;;  %v226_v2 = vsel %vm224_vm0, 4294967295, %v3457_v1  ;;  %314 = vmatprep.mubr.bf16.mxu0 %v3458_v3  ;;  %357 = vmatprep.mubr.bf16.mxu1 %v3458_v3  ;;  %v3243_v5 = vld [vmem:[%s4628_s0] ss:$72 sps:$4 sm:$0xff]   ;;  %vm220_vm2 = vcmask 203776  }
   0x2   :  { %v3241_v4 = vld [vmem:[%s4628_s0 + $0xc] ss:$72 sps:$4 sm:$0xff]   ;;  %3238 = vset.pattern.permute.xlu0 %v3458_v3  ;;  %282 = vmatprep.subr.bf16.mxu0 %v3239_v0  ;;  %v3244_v6 = vld [vmem:[%s4628_s0 + $0x8] ss:$72 sps:$4 sm:$0xff]   ;;  %v3494_v7 = vsel %vm225_vm1, %v226_v2, 0 }
   0x3   :  { %325 = vmatprep.subr.bf16.mxu1 %v3241_v4  ;;  %v3245_v8 = vld [vmem:[%s4628_s0 + $0x94] ss:$72 sps:$4 sm:$0x1f]   ;;  %283 = vmatpush1.bf16.msra.mxu0 %v3243_v5  ;;  %v3249_v11 = vld [vmem:[%s4628_s0 + $0x90] ss:$72 sps:$4 sm:$0x1f]  }
   0x4   :  { %326 = vmatpush1.bf16.msra.mxu1 %v3244_v6  ;;  %v3247_v9 = vld [vmem:[%s4628_s0 + $0x9c] ss:$72 sps:$4 sm:$0x1f]   ;;  %v232_v10 = vand.u32 %v3245_v8, %v3494_v7  ;;  %v3250_v12 = vld [vmem:[%s4628_s0 + $0x98] ss:$72 sps:$4 sm:$0x1f]   ;;  %v229_v15 = vand.u32 %v3249_v11, %v3494_v7 }
   0x5   :  { %v238_v13 = vand.u32 %v3247_v9, %v3494_v7  ;;  %v3513_v14 = vld [vmem:[%s4629_s1] sm:$0x1f]   ;;  %v235_v16 = vand.u32 %v3250_v12, %v3494_v7  ;;  %v3252_v17 = vld [vmem:[%s4628_s0 + $0x10] ss:$72 sps:$4 sm:$0xff]   ;;  %v3254_v18 = vld [vmem:[%s4628_s0 + $0x14] ss:$72 sps:$4 sm:$0xff]  }
   0x6   :  { %284 = vmatprep.subr.bf16.mxu0 %v232_v10  ;;  %v3255_v19 = vld [vmem:[%s4628_s0 + $0x18] ss:$72 sps:$4 sm:$0xff]   ;;  %v3257_v20 = vld [vmem:[%s4628_s0 + $0x1c] ss:$72 sps:$4 sm:$0xff]   ;;  %v3269_v30 = vld [vmem:[%s4628_s0 + $0x2c] ss:$72 sps:$4 sm:$0xff]  }
   0x7   :  { %327 = vmatprep.subr.bf16.mxu1 %v238_v13  ;;  %285 = vmatpush1.bf16.msra.mxu0 %v229_v15  ;;  %v3258_v21 = vld [vmem:[%s4628_s0 + $0xa0] ss:$72 sps:$4 sm:$0x1f]   ;;  %v3260_v22 = vld [vmem:[%s4628_s0 + $0xa4] ss:$72 sps:$4 sm:$0x1f]  }
   0x8   :  { %328 = vmatpush1.bf16.msra.mxu1 %v235_v16  ;;  %368 = vmatprep.subr.bf16.mxu0 %v3254_v18  ;;  %v3261_v23 = vld [vmem:[%s4628_s0 + $0xa8] ss:$72 sps:$4 sm:$0x1f]   ;;  %v244_v24 = vand.u32 %v3260_v22, %v3494_v7  ;;  %v3263_v25 = vld [vmem:[%s4628_s0 + $0xac] ss:$72 sps:$4 sm:$0x1f]   ;;  %v241_v26 = vand.u32 %v3258_v21, %v3494_v7 }
   0x9   :  { %411 = vmatprep.subr.bf16.mxu1 %v3257_v20  ;;  %v247_v27 = vand.u32 %v3261_v23, %v3494_v7  ;;  %v250_v28 = vand.u32 %v3263_v25, %v3494_v7  ;;  %v3266_v29 = vld [vmem:[%s4628_s0 + $0x24] ss:$72 sps:$4 sm:$0xff]   ;;  %v3264_v31 = vld [vmem:[%s4628_s0 + $0x20] ss:$72 sps:$4 sm:$0xff]   ;;  %v3278_v39 = vld [vmem:[%s4628_s0 + $0x34] ss:$72 sps:$4 sm:$0xff]  }
   0xa   :  { %2948 = vmatmul.mubr.msk.bf16.vlgmr.msra.gmra.mrb[0].mxu0 %vm220_vm2, %v3513_v14  ;;  %v3267_v32 = vld [vmem:[%s4628_s0 + $0x28] ss:$72 sps:$4 sm:$0xff]   ;;  %v3272_v34 = vld [vmem:[%s4628_s0 + $0xb4] ss:$72 sps:$4 sm:$0x1f]  }
   0xb   :  { %2949 = vmatmul.mubr.msk.bf16.vlgmr.msra.gmra.mrb[0].mxu1 %vm220_vm2, %v3513_v14  ;;  %369 = vmatpush1.bf16.msra.mxu0 %v3252_v17  ;;  %v3270_v33 = vld [vmem:[%s4628_s0 + $0xb0] ss:$72 sps:$4 sm:$0x1f]   ;;  %v3275_v36 = vld [vmem:[%s4628_s0 + $0xbc] ss:$72 sps:$4 sm:$0x1f]   ;;  %v256_v37 = vand.u32 %v3272_v34, %v3494_v7 }
   0xc   :  { %412 = vmatpush1.bf16.msra.mxu1 %v3255_v19  ;;  %370 = vmatprep.subr.bf16.mxu0 %v244_v24  ;;  %v3273_v35 = vld [vmem:[%s4628_s0 + $0xb8] ss:$72 sps:$4 sm:$0x1f]   ;;  %v262_v38 = vand.u32 %v3275_v36, %v3494_v7  ;;  %v253_v40 = vand.u32 %v3270_v33, %v3494_v7  ;;  %v3281_v42 = vld [vmem:[%s4628_s0 + $0x3c] ss:$72 sps:$4 sm:$0xff]  }
   0xd   :  { %400 = vmatprep.mubr.bf16.mxu0 %v3458_v3  ;;  %443 = vmatprep.mubr.bf16.mxu1 %v3458_v3  ;;  %v259_v41 = vand.u32 %v3273_v35, %v3494_v7  ;;  %v3284_v43 = vld [vmem:[%s4628_s0 + $0xc4] ss:$72 sps:$4 sm:$0x1f]   ;;  %v3276_v44 = vld [vmem:[%s4628_s0 + $0x30] ss:$72 sps:$4 sm:$0xff]  }
   0xe   :  { %413 = vmatprep.subr.bf16.mxu1 %v250_v28  ;;  %v3287_v45 = vld [vmem:[%s4628_s0 + $0xcc] ss:$72 sps:$4 sm:$0x1f]   ;;  %v3279_v46 = vld [vmem:[%s4628_s0 + $0x38] ss:$72 sps:$4 sm:$0xff]   ;;  %v268_v49 = vand.u32 %v3284_v43, %v3494_v7 }
   0xf   :  { %371 = vmatpush1.bf16.msra.mxu0 %v241_v26  ;;  %v3282_v47 = vld [vmem:[%s4628_s0 + $0xc0] ss:$72 sps:$4 sm:$0x1f]   ;;  %v274_v50 = vand.u32 %v3287_v45, %v3494_v7  ;;  %v3290_v51 = vld [vmem:[%s4628_s0 + $0x44] ss:$72 sps:$4 sm:$0xff]  }
  0x10   :  { %414 = vmatpush1.bf16.msra.mxu1 %v247_v27  ;;  %454 = vmatprep.subr.bf16.mxu0 %v3266_v29  ;;  %v3285_v48 = vld [vmem:[%s4628_s0 + $0xc8] ss:$72 sps:$4 sm:$0x1f]   ;;  %v265_v52 = vand.u32 %v3282_v47, %v3494_v7  ;;  %v3296_v54 = vld [vmem:[%s4628_s0 + $0xd4] ss:$72 sps:$4 sm:$0x1f]  }
  0x11   :  { %497 = vmatprep.subr.bf16.mxu1 %v3269_v30  ;;  %v271_v53 = vand.u32 %v3285_v48, %v3494_v7  ;;  %v3293_v55 = vld [vmem:[%s4628_s0 + $0x124] ss:$72 sps:$4 sm:$0xff]   ;;  %v3299_v56 = vld [vmem:[%s4628_s0 + $0x1b4] ss:$72 sps:$4 sm:$0x1f]   ;;  %v280_v61 = vand.u32 %v3296_v54, %v3494_v7 }
  0x12   :  { %2950 = vmatmul.mubr.msk.bf16.vlgmr.msra.gmra.mrb[4].mxu0 %vm220_vm2, %v3513_v14  ;;  %v3288_v57 = vld [vmem:[%s4628_s0 + $0x40] ss:$72 sps:$4 sm:$0xff]   ;;  %v3294_v59 = vld [vmem:[%s4628_s0 + $0xd0] ss:$72 sps:$4 sm:$0x1f]   ;;  %v872_v62 = vand.u32 %v3299_v56, %v3494_v7 }
  0x13   :  { %2951 = vmatmul.mubr.msk.bf16.vlgmr.msra.gmra.mrb[4].mxu1 %vm220_vm2, %v3513_v14  ;;  %455 = vmatpush1.bf16.msra.mxu0 %v3264_v31  ;;  %v3291_v58 = vld [vmem:[%s4628_s0 + $0x120] ss:$72 sps:$4 sm:$0xff]   ;;  %v3297_v60 = vld [vmem:[%s4628_s0 + $0x1b0] ss:$72 sps:$4 sm:$0x1f]   ;;  %v277_v0 = vand.u32 %v3294_v59, %v3494_v7 }
  0x14   :  { %498 = vmatpush1.bf16.msra.mxu1 %v3267_v32  ;;  %456 = vmatprep.subr.bf16.mxu0 %v256_v37  ;;  %v3302_v63 = vld [vmem:[%s4628_s0 + $0x12c] ss:$72 sps:$4 sm:$0xff]   ;;  %v869_v1 = vand.u32 %v3297_v60, %v3494_v7  ;;  %v3308_v4 = vld [vmem:[%s4628_s0 + $0x1bc] ss:$72 sps:$4 sm:$0x1f]  }
  0x15   :  { %499 = vmatprep.subr.bf16.mxu1 %v262_v38  ;;  %486 = vmatprep.mubr.bf16.mxu0 %v3458_v3  ;;  %v3305_v2 = vld [vmem:[%s4628_s0 + $0x134] ss:$72 sps:$4 sm:$0xff]   ;;  %v3311_v5 = vld [vmem:[%s4628_s0 + $0x1c4] ss:$72 sps:$4 sm:$0x1f]   ;;  %v878_v11 = vand.u32 %v3308_v4, %v3494_v7 }
  0x16   :  { %529 = vmatprep.mubr.bf16.mxu1 %v3458_v3  ;;  %v3300_v6 = vld [vmem:[%s4628_s0 + $0x128] ss:$72 sps:$4 sm:$0xff]   ;;  %v3306_v8 = vld [vmem:[%s4628_s0 + $0x1b8] ss:$72 sps:$4 sm:$0x1f]   ;;  %v884_v12 = vand.u32 %v3311_v5, %v3494_v7 }
  0x17   :  { %457 = vmatpush1.bf16.msra.mxu0 %v253_v40  ;;  %v3303_v9 = vld [vmem:[%s4628_s0 + $0x130] ss:$72 sps:$4 sm:$0xff]   ;;  %v3309_v10 = vld [vmem:[%s4628_s0 + $0x1c0] ss:$72 sps:$4 sm:$0x1f]   ;;  %v875_v16 = vand.u32 %v3306_v8, %v3494_v7 }
  0x18   :  { %500 = vmatpush1.bf16.msra.mxu1 %v259_v41  ;;  %540 = vmatprep.subr.bf16.mxu0 %v3278_v39  ;;  %v3314_v13 = vld [vmem:[%s4628_s0 + $0x13c] ss:$72 sps:$4 sm:$0xff]   ;;  %v881_v17 = vand.u32 %v3309_v10, %v3494_v7  ;;  %v3320_v18 = vld [vmem:[%s4628_s0 + $0x1cc] ss:$72 sps:$4 sm:$0x1f]  }
  0x19   :  { %583 = vmatprep.subr.bf16.mxu1 %v3281_v42  ;;  %v3317_v15 = vld [vmem:[%s4628_s0 + $0x144] ss:$72 sps:$4 sm:$0xff]   ;;  %v3323_v19 = vld [vmem:[%s4628_s0 + $0x1d4] ss:$72 sps:$4 sm:$0x1f]   ;;  %v890_v24 = vand.u32 %v3320_v18, %v3494_v7 }
  0x1a   :  { %2952 = vmatmul.mubr.msk.bf16.vlgmr.msra.gmra.mrb[8].mxu0 %vm220_vm2, %v3513_v14  ;;  %v3312_v20 = vld [vmem:[%s4628_s0 + $0x138] ss:$72 sps:$4 sm:$0xff]   ;;  %v3318_v22 = vld [vmem:[%s4628_s0 + $0x1c8] ss:$72 sps:$4 sm:$0x1f]   ;;  %v896_v25 = vand.u32 %v3323_v19, %v3494_v7 }
  0x1b   :  { %2953 = vmatmul.mubr.msk.bf16.vlgmr.msra.gmra.mrb[8].mxu1 %vm220_vm2, %v3513_v14  ;;  %541 = vmatpush1.bf16.msra.mxu0 %v3276_v44  ;;  %v3315_v21 = vld [vmem:[%s4628_s0 + $0x140] ss:$72 sps:$4 sm:$0xff]   ;;  %v3321_v23 = vld [vmem:[%s4628_s0 + $0x1d0] ss:$72 sps:$4 sm:$0x1f]   ;;  %v887_v27 = vand.u32 %v3318_v22, %v3494_v7 }
  0x1c   :  { %584 = vmatpush1.bf16.msra.mxu1 %v3279_v46  ;;  %542 = vmatprep.subr.bf16.mxu0 %v268_v49  ;;  %v3326_v26 = vld [vmem:[%s4628_s0 + $0x14c] ss:$72 sps:$4 sm:$0xff]   ;;  %v893_v28 = vand.u32 %v3321_v23, %v3494_v7  ;;  %v3332_v29 = vld [vmem:[%s4628_s0 + $0x1dc] ss:$72 sps:$4 sm:$0x1f]  }
  0x1d   :  { %585 = vmatprep.subr.bf16.mxu1 %v274_v50  ;;  %572 = vmatprep.mubr.bf16.mxu0 %v3458_v3  ;;  %v3329_v30 = vld [vmem:[%s4628_s0 + $0x154] ss:$72 sps:$4 sm:$0xff]   ;;  %v3335_v31 = vld [vmem:[%s4628_s0 + $0x1e4] ss:$72 sps:$4 sm:$0x1f]   ;;  %v902_v36 = vand.u32 %v3332_v29, %v3494_v7 }
  0x1e   :  { %615 = vmatprep.mubr.bf16.mxu1 %v3458_v3  ;;  %v3324_v32 = vld [vmem:[%s4628_s0 + $0x148] ss:$72 sps:$4 sm:$0xff]   ;;  %v3330_v34 = vld [vmem:[%s4628_s0 + $0x1d8] ss:$72 sps:$4 sm:$0x1f]   ;;  %v908_v37 = vand.u32 %v3335_v31, %v3494_v7 }
  0x1f   :  { %543 = vmatpush1.bf16.msra.mxu0 %v265_v52  ;;  %v3327_v33 = vld [vmem:[%s4628_s0 + $0x150] ss:$72 sps:$4 sm:$0xff]   ;;  %v3333_v35 = vld [vmem:[%s4628_s0 + $0x1e0] ss:$72 sps:$4 sm:$0x1f]   ;;  %v899_v39 = vand.u32 %v3330_v34, %v3494_v7 }
  0x20   :  { %586 = vmatpush1.bf16.msra.mxu1 %v271_v53  ;;  %626 = vmatprep.subr.bf16.mxu0 %v3290_v51  ;;  %v3338_v38 = vld [vmem:[%s4628_s0 + $0x15c] ss:$72 sps:$4 sm:$0xff]   ;;  %v905_v40 = vand.u32 %v3333_v35, %v3494_v7  ;;  %v3344_v42 = vld [vmem:[%s4628_s0 + $0x1ec] ss:$72 sps:$4 sm:$0x1f]  }
  0x21   :  { %922 = vmatprep.subr.bf16.mxu1 %v3293_v55  ;;  %v3341_v41 = vld [vmem:[%s4628_s0 + $0x164] ss:$72 sps:$4 sm:$0xff]   ;;  %v3347_v43 = vld [vmem:[%s4628_s0 + $0x1f4] ss:$72 sps:$4 sm:$0x1f]   ;;  %v914_v48 = vand.u32 %v3344_v42, %v3494_v7 }
  0x22   :  { %2954 = vmatmul.mubr.msk.bf16.vlgmr.msra.gmra.mrb[12].mxu0 %vm220_vm2, %v3513_v14  ;;  %v3336_v44 = vld [vmem:[%s4628_s0 + $0x158] ss:$72 sps:$4 sm:$0xff]   ;;  %v3342_v45 = vld [vmem:[%s4628_s0 + $0x1e8] ss:$72 sps:$4 sm:$0x1f]   ;;  %v920_v49 = vand.u32 %v3347_v43, %v3494_v7 }
  0x23   :  { %2955 = vmatmul.mubr.msk.bf16.vlgmr.msra.gmra.mrb[12].mxu1 %vm220_vm2, %v3513_v14  ;;  %627 = vmatpush1.bf16.msra.mxu0 %v3288_v57  ;;  %v3339_v46 = vld [vmem:[%s4628_s0 + $0x160] ss:$72 sps:$4 sm:$0xff]   ;;  %v3345_v47 = vld [vmem:[%s4628_s0 + $0x1f0] ss:$72 sps:$4 sm:$0x1f]   ;;  %v911_v52 = vand.u32 %v3342_v45, %v3494_v7 }
  0x24   :  { %923 = vmatpush1.bf16.msra.mxu1 %v3291_v58  ;;  %628 = vmatprep.subr.bf16.mxu0 %v280_v61  ;;  %v3350_v50 = vld [vmem:[%s4628_s0 + $0x244] ss:$72 sps:$4 sm:$0xff]   ;;  %v917_v53 = vand.u32 %v3345_v47, %v3494_v7  ;;  %v3356_v54 = vld [vmem:[%s4628_s0 + $0x2d4] ss:$72 sps:$4 sm:$0x1f]  }
  0x25   :  { %924 = vmatprep.subr.bf16.mxu1 %v872_v62  ;;  %658 = vmatprep.mubr.bf16.mxu0 %v3458_v3  ;;  %v3353_v51 = vld [vmem:[%s4628_s0 + $0x24c] ss:$72 sps:$4 sm:$0xff]   ;;  %v3359_v55 = vld [vmem:[%s4628_s0 + $0x2dc] ss:$72 sps:$4 sm:$0x1f]   ;;  %v1548_v60 = vand.u32 %v3356_v54, %v3494_v7 }
  0x26   :  { %954 = vmatprep.mubr.bf16.mxu1 %v3458_v3  ;;  %v3348_v56 = vld [vmem:[%s4628_s0 + $0x240] ss:$72 sps:$4 sm:$0xff]   ;;  %v3354_v58 = vld [vmem:[%s4628_s0 + $0x2d0] ss:$72 sps:$4 sm:$0x1f]   ;;  %v1554_v61 = vand.u32 %v3359_v55, %v3494_v7 }
  0x27   :  { %629 = vmatpush1.bf16.msra.mxu0 %v277_v0  ;;  %v3351_v57 = vld [vmem:[%s4628_s0 + $0x248] ss:$72 sps:$4 sm:$0xff]   ;;  %v3357_v59 = vld [vmem:[%s4628_s0 + $0x2d8] ss:$72 sps:$4 sm:$0x1f]  }
  0x28   :  { %925 = vmatpush1.bf16.msra.mxu1 %v869_v1  ;;  %965 = vmatprep.subr.bf16.mxu0 %v3302_v63  ;;  %v3362_v62 = vld [vmem:[%s4628_s0 + $0x254] ss:$72 sps:$4 sm:$0xff]   ;;  %v1545_v63 = vand.u32 %v3354_v58, %v3494_v7  ;;  %v1551_v0 = vand.u32 %v3357_v59, %v3494_v7  ;;  %v3360_v5 = vld [vmem:[%s4628_s0 + $0x250] ss:$72 sps:$4 sm:$0xff]   ;;  %v3372_v19 = vld [vmem:[%s4628_s0 + $0x260] ss:$72 sps:$4 sm:$0xff]  }
  0x29   :  { %1008 = vmatprep.subr.bf16.mxu1 %v3305_v2  ;;  %v3365_v1 = vld [vmem:[%s4628_s0 + $0x25c] ss:$72 sps:$4 sm:$0xff]   ;;  %v3371_v4 = vld [vmem:[%s4628_s0 + $0x2ec] ss:$72 sps:$4 sm:$0x1f]  }
  0x2a   :  { %2956 = vmatmul.mubr.msk.bf16.vlgmr.msra.gmra.mrb[16].mxu0 %vm220_vm2, %v3513_v14  ;;  %v3368_v2 = vld [vmem:[%s4628_s0 + $0x2e4] ss:$72 sps:$4 sm:$0x1f]   ;;  %v3363_v8 = vld [vmem:[%s4628_s0 + $0x258] ss:$72 sps:$4 sm:$0xff]  }
  0x2b   :  { %3029 = vmatmul.mubr.msk.bf16.vlgmr.msra.gmra.mrb[16].mxu1 %vm220_vm2, %v3513_v14  ;;  %966 = vmatpush1.bf16.msra.mxu0 %v3300_v6  ;;  %v3366_v6 = vld [vmem:[%s4628_s0 + $0x2e0] ss:$72 sps:$4 sm:$0x1f]   ;;  %v1560_v10 = vand.u32 %v3368_v2, %v3494_v7  ;;  %v3383_v18 = vld [vmem:[%s4628_s0 + $0x2fc] ss:$72 sps:$4 sm:$0x1f]  }
  0x2c   :  { %1009 = vmatpush1.bf16.msra.mxu1 %v3303_v9  ;;  %967 = vmatprep.subr.bf16.mxu0 %v878_v11  ;;  %v3369_v9 = vld [vmem:[%s4628_s0 + $0x2e8] ss:$72 sps:$4 sm:$0x1f]   ;;  %v1566_v11 = vand.u32 %v3371_v4, %v3494_v7  ;;  %v3381_v22 = vld [vmem:[%s4628_s0 + $0x2f8] ss:$72 sps:$4 sm:$0x1f]  }
  0x2d   :  { %1010 = vmatprep.subr.bf16.mxu1 %v884_v12  ;;  %997 = vmatprep.mubr.bf16.mxu0 %v3458_v3  ;;  %v3374_v12 = vld [vmem:[%s4628_s0 + $0x264] ss:$72 sps:$4 sm:$0xff]   ;;  %v3384_v31 = vld [vmem:[%s4628_s0 + $0x270] ss:$72 sps:$4 sm:$0xff]   ;;  %v3399_v45 = vld [vmem:[%s4628_s0 + $0x360] ss:$72 sps:$4 sm:$0xff]  }
  0x2e   :  { %1040 = vmatprep.mubr.bf16.mxu1 %v3458_v3  ;;  %v3392_v29 = vld [vmem:[%s4628_s0 + $0x304] ss:$72 sps:$4 sm:$0x1f]   ;;  %v3393_v34 = vld [vmem:[%s4628_s0 + $0x308] ss:$72 sps:$4 sm:$0x1f]  }
  0x2f   :  { %968 = vmatpush1.bf16.msra.mxu0 %v875_v16  ;;  %v3377_v16 = vld [vmem:[%s4628_s0 + $0x26c] ss:$72 sps:$4 sm:$0xff]   ;;  %v1584_v35 = vand.u32 %v3392_v29, %v3494_v7  ;;  %v2697_v43 = vld [vmem:[%s4630_s2] sm:$0xff]  ;;  %v3405_v47 = vld [vmem:[%s4628_s0 + $0x3f0] ss:$72 sps:$4 sm:$0x1f]  }
  0x30   :  { %1011 = vmatpush1.bf16.msra.mxu1 %v881_v17  ;;  %1051 = vmatprep.subr.bf16.mxu0 %v3314_v13  ;;  %v1557_v13 = vand.u32 %v3366_v6, %v3494_v7  ;;  %v3380_v17 = vld [vmem:[%s4628_s0 + $0x2f4] ss:$72 sps:$4 sm:$0x1f]   ;;  %v2698_v54 = vld [vmem:[%s4630_s2 + $0x8] sm:$0x3] }
  0x31   :  { %1094 = vmatprep.subr.bf16.mxu1 %v3317_v15  ;;  %v1563_v15 = vand.u32 %v3369_v9, %v3494_v7  ;;  %v1572_v23 = vand.u32 %v3380_v17, %v3494_v7  ;;  %v3407_v42 = vld [vmem:[%s4628_s0 + $0x3f4] ss:$72 sps:$4 sm:$0x1f]   ;;  %2701 = vperm.xlu0 %3238, %v2697_v43   ;;  %v3411_v58 = vld [vmem:[%s4628_s0 + $0x370] ss:$72 sps:$4 sm:$0xff]  }
  0x32   :  { %3030 = vmatmul.mubr.msk.bf16.vlgmr.msra.gmra.mrb[20].mxu0 %vm220_vm2, %v3513_v14  ;;  %v3416_v55 = vld [vmem:[%s4628_s0 + $0x3fc] ss:$72 sps:$4 sm:$0x1f]   ;;  %v3414_v59 = vld [vmem:[%s4628_s0 + $0x3f8] ss:$72 sps:$4 sm:$0x1f]  }
  0x33   :  { %3031 = vmatmul.mubr.msk.bf16.vlgmr.msra.gmra.mrb[20].mxu1 %vm220_vm2, %v3513_v14  ;;  %1052 = vmatpush1.bf16.msra.mxu0 %v3312_v20  ;;  %v3375_v20 = vld [vmem:[%s4628_s0 + $0x268] ss:$72 sps:$4 sm:$0xff]   ;;  %v3425_v2 = vld [vmem:[%s4628_s0 + $0x384] ss:$72 sps:$4 sm:$0xff]   ;;  %v3420_v6 = vld [vmem:[%s4628_s0 + $0x378] ss:$72 sps:$4 sm:$0xff]  }
  0x34   :  { %1095 = vmatpush1.bf16.msra.mxu1 %v3315_v21  ;;  %1053 = vmatprep.subr.bf16.mxu0 %v890_v24  ;;  %v3378_v21 = vld [vmem:[%s4628_s0 + $0x2f0] ss:$72 sps:$4 sm:$0x1f]   ;;  %v1578_v24 = vand.u32 %v3383_v18, %v3494_v7  ;;  %v3428_v4 = vld [vmem:[%s4628_s0 + $0x40c] ss:$72 sps:$4 sm:$0x1f]  }
  0x35   :  { %1096 = vmatprep.subr.bf16.mxu1 %v896_v25  ;;  %1083 = vmatprep.mubr.bf16.mxu0 %v3458_v3  ;;  %v3386_v25 = vld [vmem:[%s4628_s0 + $0x274] ss:$72 sps:$4 sm:$0xff]   ;;  %v3426_v9 = vld [vmem:[%s4628_s0 + $0x408] ss:$72 sps:$4 sm:$0x1f]  }
  0x36   :  { %1126 = vmatprep.mubr.bf16.mxu1 %v3458_v3  ;;  %2706 = vperm.xlu0 %3238, %v2698_v54   ;;  %v3437_v17 = vld [vmem:[%s4628_s0 + $0x394] ss:$72 sps:$4 sm:$0xff]   ;;  %v3443_v18 = vld [vmem:[%s4628_s0 + $0x424] ss:$72 sps:$4 sm:$0x1f]  }
  0x37   :  { %1054 = vmatpush1.bf16.msra.mxu0 %v887_v27  ;;  %v1569_v27 = vand.u32 %v3378_v21, %v3494_v7  ;;  %v3438_v21 = vld [vmem:[%s4628_s0 + $0x418] ss:$72 sps:$4 sm:$0x1f]   ;;  %v3449_v29 = vld [vmem:[%s4628_s0 + $0x3a4] ss:$72 sps:$4 sm:$0xff]  }
  0x38   :  { %1097 = vmatpush1.bf16.msra.mxu1 %v893_v28  ;;  %1137 = vmatprep.subr.bf16.mxu0 %v3326_v26  ;;  %v3389_v26 = vld [vmem:[%s4628_s0 + $0x27c] ss:$72 sps:$4 sm:$0xff]   ;;  %v1575_v28 = vand.u32 %v3381_v22, %v3494_v7  ;;  %v3441_v22 = vld [vmem:[%s4628_s0 + $0x420] ss:$72 sps:$4 sm:$0x1f]  }
  0x39   :  { %1180 = vmatprep.subr.bf16.mxu1 %v3329_v30  ;;  %v3395_v30 = vld [vmem:[%s4628_s0 + $0x30c] ss:$72 sps:$4 sm:$0x1f]  }
  0x3a   :  { %3032 = vmatmul.mubr.msk.bf16.vlgmr.msra.gmra.mrb[24].mxu0 %vm220_vm2, %v3513_v14 }
  0x3b   :  { %3033 = vmatmul.mubr.msk.bf16.vlgmr.msra.gmra.mrb[24].mxu1 %vm220_vm2, %v3513_v14  ;;  %1138 = vmatpush1.bf16.msra.mxu0 %v3324_v32  ;;  %v3387_v32 = vld [vmem:[%s4628_s0 + $0x278] ss:$72 sps:$4 sm:$0xff]  }
  0x3c   :  { %1181 = vmatpush1.bf16.msra.mxu1 %v3327_v33  ;;  %1139 = vmatprep.subr.bf16.mxu0 %v902_v36  ;;  %v3390_v33 = vld [vmem:[%s4628_s0 + $0x300] ss:$72 sps:$4 sm:$0x1f]   ;;  %v1590_v36 = vand.u32 %v3395_v30, %v3494_v7  ;;  %v3452_v30 = vld [vmem:[%s4628_s0 + $0x42c] ss:$72 sps:$4 sm:$0x1f]  }
  0x3d   :  { %1182 = vmatprep.subr.bf16.mxu1 %v908_v37  ;;  %1169 = vmatprep.mubr.bf16.mxu0 %v3458_v3  ;;  %v3398_v37 = vld [vmem:[%s4628_s0 + $0x284] ss:$72 sps:$4 sm:$0xff]  }
  0x3e   :  { %1212 = vmatprep.mubr.bf16.mxu1 %v3458_v3 }
  0x3f   :  { %1140 = vmatpush1.bf16.msra.mxu0 %v899_v39  ;;  %v1587_v39 = vand.u32 %v3393_v34, %v3494_v7  ;;  %v3450_v34 = vld [vmem:[%s4628_s0 + $0x428] ss:$72 sps:$4 sm:$0x1f]  }
  0x40   :  { %1183 = vmatpush1.bf16.msra.mxu1 %v905_v40  ;;  %1223 = vmatprep.subr.bf16.mxu0 %v3338_v38  ;;  %v1581_v38 = vand.u32 %v3390_v33, %v3494_v7  ;;  %v3401_v40 = vld [vmem:[%s4628_s0 + $0x364] ss:$72 sps:$4 sm:$0xff]   ;;  %v3447_v33 = vld [vmem:[%s4628_s0 + $0x3a0] ss:$72 sps:$4 sm:$0xff]  }
  0x41   :  { %1266 = vmatprep.subr.bf16.mxu1 %v3341_v41  ;;  %v3404_v41 = vld [vmem:[%s4628_s0 + $0x314] ss:$72 sps:$4 sm:$0x1f]  }
  0x42   :  { %3034 = vmatmul.mubr.msk.bf16.vlgmr.msra.gmra.mrb[28].mxu0 %vm220_vm2, %v3513_v14 }
  0x43   :  { %3035 = vmatmul.mubr.msk.bf16.vlgmr.msra.gmra.mrb[28].mxu1 %vm220_vm2, %v3513_v14  ;;  %1224 = vmatpush1.bf16.msra.mxu0 %v3336_v44  ;;  %v3396_v44 = vld [vmem:[%s4628_s0 + $0x280] ss:$72 sps:$4 sm:$0xff]  }
  0x44   :  { %1267 = vmatpush1.bf16.msra.mxu1 %v3339_v46  ;;  %1225 = vmatprep.subr.bf16.mxu0 %v914_v48  ;;  %v3402_v46 = vld [vmem:[%s4628_s0 + $0x310] ss:$72 sps:$4 sm:$0x1f]   ;;  %v1596_v48 = vand.u32 %v3404_v41, %v3494_v7 }
  0x45   :  { %1268 = vmatprep.subr.bf16.mxu1 %v920_v49  ;;  %1255 = vmatprep.mubr.bf16.mxu0 %v3458_v3  ;;  %v2224_v49 = vand.u32 %v3407_v42, %v3494_v7 }
  0x46   :  { %1298 = vmatprep.mubr.bf16.mxu1 %v3458_v3 }
  0x47   :  { %1226 = vmatpush1.bf16.msra.mxu0 %v911_v52  ;;  %v3410_v52 = vld [vmem:[%s4628_s0 + $0x36c] ss:$72 sps:$4 sm:$0xff]  }
  0x48   :  { %1269 = vmatpush1.bf16.msra.mxu1 %v917_v53  ;;  %1598 = vmatprep.subr.bf16.mxu0 %v3350_v50  ;;  %v1593_v50 = vand.u32 %v3402_v46, %v3494_v7  ;;  %v3413_v53 = vld [vmem:[%s4628_s0 + $0x374] ss:$72 sps:$4 sm:$0xff]  }
  0x49   :  { %1641 = vmatprep.subr.bf16.mxu1 %v3353_v51  ;;  %v2221_v51 = vand.u32 %v3405_v47, %v3494_v7 }
  0x4a   :  { %3036 = vmatmul.mubr.msk.bf16.vlgmr.msra.gmra.mrb[32].mxu0 %vm220_vm2, %v3513_v14 }
  0x4b   :  { %3037 = vmatmul.mubr.msk.bf16.vlgmr.msra.gmra.mrb[32].mxu1 %vm220_vm2, %v3513_v14  ;;  %1599 = vmatpush1.bf16.msra.mxu0 %v3348_v56  ;;  %v3419_v56 = vld [vmem:[%s4628_s0 + $0x404] ss:$72 sps:$4 sm:$0x1f]  }
  0x4c   :  { %1642 = vmatpush1.bf16.msra.mxu1 %v3351_v57  ;;  %1600 = vmatprep.subr.bf16.mxu0 %v1548_v60  ;;  %v3408_v57 = vld [vmem:[%s4628_s0 + $0x368] ss:$72 sps:$4 sm:$0xff]  }
  0x4d   :  { %1643 = vmatprep.subr.bf16.mxu1 %v1554_v61  ;;  %1630 = vmatprep.mubr.bf16.mxu0 %v3458_v3  ;;  %v3417_v60 = vld [vmem:[%s4628_s0 + $0x400] ss:$72 sps:$4 sm:$0x1f]   ;;  %v2230_v61 = vand.u32 %v3416_v55, %v3494_v7 }
  0x4e   :  { %1673 = vmatprep.mubr.bf16.mxu1 %v3458_v3 }
  0x4f   :  { %1601 = vmatpush1.bf16.msra.mxu0 %v1545_v63  ;;  %v2227_v63 = vand.u32 %v3414_v59, %v3494_v7 }
  0x50   :  { %1644 = vmatpush1.bf16.msra.mxu1 %v1551_v0  ;;  %1684 = vmatprep.subr.bf16.mxu0 %v3362_v62  ;;  %v2236_v62 = vand.u32 %v3419_v56, %v3494_v7  ;;  %v2233_v0 = vand.u32 %v3417_v60, %v3494_v7 }
  0x51   :  { %1727 = vmatprep.subr.bf16.mxu1 %v3365_v1  ;;  %v3422_v1 = vld [vmem:[%s4628_s0 + $0x37c] ss:$72 sps:$4 sm:$0xff]  }
  0x52   :  { %3110 = vmatmul.mubr.msk.bf16.vlgmr.msra.gmra.mrb[36].mxu0 %vm220_vm2, %v3513_v14 }
  0x53   :  { %3111 = vmatmul.mubr.msk.bf16.vlgmr.msra.gmra.mrb[36].mxu1 %vm220_vm2, %v3513_v14  ;;  %1685 = vmatpush1.bf16.msra.mxu0 %v3360_v5  ;;  %v3431_v5 = vld [vmem:[%s4628_s0 + $0x414] ss:$72 sps:$4 sm:$0x1f]  }
  0x54   :  { %1728 = vmatpush1.bf16.msra.mxu1 %v3363_v8  ;;  %1686 = vmatprep.subr.bf16.mxu0 %v1560_v10  ;;  %v3423_v8 = vld [vmem:[%s4628_s0 + $0x380] ss:$72 sps:$4 sm:$0xff]   ;;  %v3429_v10 = vld [vmem:[%s4628_s0 + $0x410] ss:$72 sps:$4 sm:$0x1f]  }
  0x55   :  { %1729 = vmatprep.subr.bf16.mxu1 %v1566_v11  ;;  %1716 = vmatprep.mubr.bf16.mxu0 %v3458_v3  ;;  %v2242_v11 = vand.u32 %v3428_v4, %v3494_v7 }
  0x56   :  { %1759 = vmatprep.mubr.bf16.mxu1 %v3458_v3 }
  0x57   :  { %1687 = vmatpush1.bf16.msra.mxu0 %v1557_v13  ;;  %v2239_v13 = vand.u32 %v3426_v9, %v3494_v7 }
  0x58   :  { %1730 = vmatpush1.bf16.msra.mxu1 %v1563_v15  ;;  %1770 = vmatprep.subr.bf16.mxu0 %v3374_v12  ;;  %v2248_v12 = vand.u32 %v3431_v5, %v3494_v7  ;;  %v2245_v15 = vand.u32 %v3429_v10, %v3494_v7 }
  0x59   :  { %1813 = vmatprep.subr.bf16.mxu1 %v3377_v16  ;;  %v3434_v16 = vld [vmem:[%s4628_s0 + $0x38c] ss:$72 sps:$4 sm:$0xff]  }
  0x5a   :  { %3112 = vmatmul.mubr.msk.bf16.vlgmr.msra.gmra.mrb[40].mxu0 %vm220_vm2, %v3513_v14 }
  0x5b   :  { %3113 = vmatmul.mubr.msk.bf16.vlgmr.msra.gmra.mrb[40].mxu1 %vm220_vm2, %v3513_v14  ;;  %1771 = vmatpush1.bf16.msra.mxu0 %v3372_v19  ;;  %v3432_v19 = vld [vmem:[%s4628_s0 + $0x388] ss:$72 sps:$4 sm:$0xff]  }
  0x5c   :  { %1814 = vmatpush1.bf16.msra.mxu1 %v3375_v20  ;;  %1772 = vmatprep.subr.bf16.mxu0 %v1572_v23  ;;  %v3435_v20 = vld [vmem:[%s4628_s0 + $0x390] ss:$72 sps:$4 sm:$0xff]  }
  0x5d   :  { %1815 = vmatprep.subr.bf16.mxu1 %v1578_v24  ;;  %1802 = vmatprep.mubr.bf16.mxu0 %v3458_v3  ;;  %v2260_v24 = vand.u32 %v3443_v18, %v3494_v7 }
  0x5e   :  { %1845 = vmatprep.mubr.bf16.mxu1 %v3458_v3 }
  0x5f   :  { %1773 = vmatpush1.bf16.msra.mxu0 %v1569_v27  ;;  %v2257_v27 = vand.u32 %v3441_v22, %v3494_v7 }
  0x60   :  { %1816 = vmatpush1.bf16.msra.mxu1 %v1575_v28  ;;  %1856 = vmatprep.subr.bf16.mxu0 %v3386_v25  ;;  %v3456_v25 = vld [vmem:[%s4629_s1] sm:$0x1f]  }
  0x61   :  { %1899 = vmatprep.subr.bf16.mxu1 %v3389_v26  ;;  %v2251_v26 = vand.u32 %v3438_v21, %v3494_v7  ;;  %v3446_v28 = vld [vmem:[%s4628_s0 + $0x39c] ss:$72 sps:$4 sm:$0xff]  }
  0x62   :  { %3114 = vmatmul.mubr.msk.bf16.vlgmr.msra.gmra.mrb[44].mxu0 %vm220_vm2, %v3513_v14 }
  0x63   :  { %3115 = vmatmul.mubr.msk.bf16.vlgmr.msra.gmra.mrb[44].mxu1 %vm220_vm2, %v3513_v14  ;;  %1857 = vmatpush1.bf16.msra.mxu0 %v3384_v31  ;;  %v3455_v31 = vld [vmem:[%s4628_s0 + $0x434] ss:$72 sps:$4 sm:$0x1f]  }
  0x64   :  { %1900 = vmatpush1.bf16.msra.mxu1 %v3387_v32  ;;  %1858 = vmatprep.subr.bf16.mxu0 %v1584_v35  ;;  %v3444_v32 = vld [vmem:[%s4628_s0 + $0x398] ss:$72 sps:$4 sm:$0xff]  }
  0x65   :  { %1901 = vmatprep.subr.bf16.mxu1 %v1590_v36  ;;  %1888 = vmatprep.mubr.bf16.mxu0 %v3458_v3  ;;  %v3453_v35 = vld [vmem:[%s4628_s0 + $0x430] ss:$72 sps:$4 sm:$0x1f]   ;;  %v2266_v36 = vand.u32 %v3452_v30, %v3494_v7 }
  0x66   :  { %1931 = vmatprep.mubr.bf16.mxu1 %v3458_v3 }
  0x67   :  { %1859 = vmatpush1.bf16.msra.mxu0 %v1581_v38  ;;  %v2263_v38 = vand.u32 %v3450_v34, %v3494_v7 }
  0x68   :  { %1902 = vmatpush1.bf16.msra.mxu1 %v1587_v39  ;;  %1942 = vmatprep.subr.bf16.mxu0 %v3398_v37  ;;  %v2272_v37 = vand.u32 %v3455_v31, %v3494_v7  ;;  %v2269_v39 = vand.u32 %v3453_v35, %v3494_v7 }
  0x69   :  { %2274 = vmatprep.subr.bf16.mxu1 %v3401_v40 }
  0x6a   :  { %3116 = vmatmul.mubr.msk.bf16.vlgmr.msra.gmra.mrb[48].mxu0 %vm220_vm2, %v3513_v14 }
  0x6b   :  { %3117 = vmatmul.mubr.msk.bf16.vlgmr.msra.gmra.mrb[48].mxu1 %vm220_vm2, %v3513_v14  ;;  %1943 = vmatpush1.bf16.msra.mxu0 %v3396_v44 }
  0x6c   :  { %2275 = vmatpush1.bf16.msra.mxu1 %v3399_v45  ;;  %1944 = vmatprep.subr.bf16.mxu0 %v1596_v48 }
  0x6d   :  { %2276 = vmatprep.subr.bf16.mxu1 %v2224_v49  ;;  %1974 = vmatprep.mubr.bf16.mxu0 %v3458_v3 }
  0x6e   :  { %2306 = vmatprep.mubr.bf16.mxu1 %v3458_v3 }
  0x6f   :  { %1945 = vmatpush1.bf16.msra.mxu0 %v1593_v50 }
  0x70   :  { %2277 = vmatpush1.bf16.msra.mxu1 %v2221_v51  ;;  %2317 = vmatprep.subr.bf16.mxu0 %v3410_v52 }
  0x71   :  { %2360 = vmatprep.subr.bf16.mxu1 %v3413_v53 }
  0x72   :  { %3118 = vmatmul.mubr.msk.bf16.vlgmr.msra.gmra.mrb[52].mxu0 %vm220_vm2, %v3513_v14 }
  0x73   :  { %3191 = vmatmul.mubr.msk.bf16.vlgmr.msra.gmra.mrb[52].mxu1 %vm220_vm2, %v3513_v14  ;;  %2318 = vmatpush1.bf16.msra.mxu0 %v3408_v57 }
  0x74   :  { %2361 = vmatpush1.bf16.msra.mxu1 %v3411_v58  ;;  %2319 = vmatprep.subr.bf16.mxu0 %v2230_v61 }
  0x75   :  { %2362 = vmatprep.subr.bf16.mxu1 %v2236_v62  ;;  %2349 = vmatprep.mubr.bf16.mxu0 %v3458_v3 }
  0x76   :  { %2392 = vmatprep.mubr.bf16.mxu1 %v3458_v3 }
  0x77   :  { %2320 = vmatpush1.bf16.msra.mxu0 %v2227_v63 }
  0x78   :  { %2363 = vmatpush1.bf16.msra.mxu1 %v2233_v0  ;;  %2403 = vmatprep.subr.bf16.mxu0 %v3422_v1 }
  0x79   :  { %2446 = vmatprep.subr.bf16.mxu1 %v3425_v2 }
  0x7a   :  { %3192 = vmatmul.mubr.msk.bf16.vlgmr.msra.gmra.mrb[56].mxu0 %vm220_vm2, %v3513_v14 }
  0x7b   :  { %3193 = vmatmul.mubr.msk.bf16.vlgmr.msra.gmra.mrb[56].mxu1 %vm220_vm2, %v3513_v14  ;;  %2404 = vmatpush1.bf16.msra.mxu0 %v3420_v6  ;;  %v3440_v14 = vld [vmem:[%s4628_s0 + $0x41c] ss:$72 sps:$4 sm:$0x1f]  }
  0x7c   :  { %2447 = vmatpush1.bf16.msra.mxu1 %v3423_v8  ;;  %2405 = vmatprep.subr.bf16.mxu0 %v2242_v11  ;;  %v2254_v23 = vand.u32 %v3440_v14, %v3494_v7 }
  0x7d   :  { %2448 = vmatprep.subr.bf16.mxu1 %v2248_v12  ;;  %2435 = vmatprep.mubr.bf16.mxu0 %v3458_v3 }
  0x7e   :  { %2478 = vmatprep.mubr.bf16.mxu1 %v3458_v3 }
  0x7f   :  { %2406 = vmatpush1.bf16.msra.mxu0 %v2239_v13 }
  0x80   :  { %2449 = vmatpush1.bf16.msra.mxu1 %v2245_v15  ;;  %2489 = vmatprep.subr.bf16.mxu0 %v3434_v16 }
  0x81   :  { %2532 = vmatprep.subr.bf16.mxu1 %v3437_v17 }
  0x82   :  { %3194 = vmatmul.mubr.msk.bf16.vlgmr.msra.gmra.mrb[60].mxu0 %vm220_vm2, %v3456_v25 }
  0x83   :  { %3195 = vmatmul.mubr.msk.bf16.vlgmr.msra.gmra.mrb[60].mxu1 %vm220_vm2, %v3456_v25  ;;  %2490 = vmatpush1.bf16.msra.mxu0 %v3432_v19 }
  0x84   :  { %2533 = vmatpush1.bf16.msra.mxu1 %v3435_v20  ;;  %2491 = vmatprep.subr.bf16.mxu0 %v2254_v23 }
  0x85   :  { %2534 = vmatprep.subr.bf16.mxu1 %v2260_v24  ;;  %2521 = vmatprep.mubr.bf16.mxu0 %v3458_v3 }
  0x86   :  { %2564 = vmatprep.mubr.bf16.mxu1 %v3458_v3 }
  0x87   :  { %2492 = vmatpush1.bf16.msra.mxu0 %v2251_v26 }
  0x88   :  { %2535 = vmatpush1.bf16.msra.mxu1 %v2257_v27  ;;  %2575 = vmatprep.subr.bf16.mxu0 %v3446_v28 }
  0x89   :  { %2618 = vmatprep.subr.bf16.mxu1 %v3449_v29 }
  0x8a   :  { %3196 = vmatmul.mubr.msk.bf16.vlgmr.msra.gmra.mrb[64].mxu0 %vm220_vm2, %v3456_v25 }
  0x8b   :  { %3197 = vmatmul.mubr.msk.bf16.vlgmr.msra.gmra.mrb[64].mxu1 %vm220_vm2, %v3456_v25  ;;  %2576 = vmatpush1.bf16.msra.mxu0 %v3444_v32 }
  0x8c   :  { %2619 = vmatpush1.bf16.msra.mxu1 %v3447_v33  ;;  %2577 = vmatprep.subr.bf16.mxu0 %v2266_v36 }
  0x8d   :  { %2620 = vmatprep.subr.bf16.mxu1 %v2272_v37  ;;  %2607 = vmatprep.mubr.bf16.mxu0 %v3458_v3 }
  0x8e   :  { %2650 = vmatprep.mubr.bf16.mxu1 %v3458_v3 }
  0x8f   :  { %2578 = vmatpush1.bf16.msra.mxu0 %v2263_v38 }
  0x90   :  { %2621 = vmatpush1.bf16.msra.mxu1 %v2269_v39 }
  0x92   :  { %3198 = vmatmul.mubr.msk.bf16.vlgmr.msra.gmra.mrb[68].mxu0 %vm220_vm2, %v3456_v25 }
  0x93   :  { %3199 = vmatmul.mubr.msk.bf16.vlgmr.msra.gmra.mrb[68].mxu1 %vm220_vm2, %v3456_v25 }
  0xdd   :  { %v4102_v40 = vpop.f32.mrb[0].mxu0 }
  0xde   :  { %v4104_v41 = vpop.f32.mrb[0].mxu1  ;;  %v4106_v42 = vpop.f32.mrb[1].mxu0 }
  0xdf   :  { %v4108_v43 = vpop.f32.mrb[1].mxu1  ;;  %v4110_v7 = vpop.f32.mrb[2].mxu0 }
  0xe0   :  { %v4112_v44 = vpop.f32.mrb[2].mxu1  ;;  %v4114_v45 = vpop.f32.mrb[3].mxu0 }
  0xe1   :  { %v4116_v3 = vpop.f32.mrb[3].mxu1 }
  0xe5   :  { %v4118_v46 = vpop.f32.mrb[4].mxu0 }
  0xe6   :  { %v4120_v47 = vpop.f32.mrb[4].mxu1  ;;  %v4122_v48 = vpop.f32.mrb[5].mxu0 }
  0xe7   :  { %v4124_v49 = vpop.f32.mrb[5].mxu1  ;;  %v4126_v50 = vpop.f32.mrb[6].mxu0 }
  0xe8   :  { %v4128_v51 = vpop.f32.mrb[6].mxu1  ;;  %v4130_v52 = vpop.f32.mrb[7].mxu0 }
  0xe9   :  { %v4132_v53 = vpop.f32.mrb[7].mxu1 }
  0xed   :  { %v4134_v54 = vpop.f32.mrb[8].mxu0 }
  0xee   :  { %v4136_v55 = vpop.f32.mrb[8].mxu1  ;;  %v4138_v56 = vpop.f32.mrb[9].mxu0 }
  0xef   :  { %v4140_v57 = vpop.f32.mrb[9].mxu1  ;;  %v4142_v58 = vpop.f32.mrb[10].mxu0 }
  0xf0   :  { %v4144_v59 = vpop.f32.mrb[10].mxu1  ;;  %v4146_v60 = vpop.f32.mrb[11].mxu0 }
  0xf1   :  { %4652 = vst [vmem:[#allocation2_spill] sm:$0xff] %v4146_v60  ;;  %v4148_v61 = vpop.f32.mrb[11].mxu1 }
  0xf5   :  { %v4150_v62 = vpop.f32.mrb[12].mxu0 }
  0xf6   :  { %4653 = vst [vmem:[#allocation3_spill] sm:$0xff] %v4150_v62  ;;  %v4152_v63 = vpop.f32.mrb[12].mxu1  ;;  %v4154_v0 = vpop.f32.mrb[13].mxu0 }
  0xf7   :  { %4654 = vst [vmem:[#allocation4_spill] sm:$0xff] %v4154_v0  ;;  %v4156_v1 = vpop.f32.mrb[13].mxu1  ;;  %v4158_v2 = vpop.f32.mrb[14].mxu0 }
  0xf8   :  { %4655 = vst [vmem:[#allocation5_spill] sm:$0xff] %v4156_v1  ;;  %4656 = vst [vmem:[#allocation6_spill] sm:$0xff] %v4158_v2  ;;  %v4160_v4 = vpop.f32.mrb[14].mxu1  ;;  %v4162_v5 = vpop.f32.mrb[15].mxu0 }
  0xf9   :  { %4657 = vst [vmem:[#allocation7_spill] sm:$0xff] %v4162_v5  ;;  %v4164_v6 = vpop.f32.mrb[15].mxu1 }
  0xfd   :  { %v4166_v8 = vpop.f32.mrb[16].mxu0 }
  0xfe   :  { %4658 = vst [vmem:[#allocation8_spill] sm:$0xff] %v4166_v8  ;;  %v4168_v9 = vpop.f32.mrb[16].mxu1  ;;  %v4172_v11 = vpop.f32.mrb[17].mxu0 }
  0xff   :  { %4659 = vst [vmem:[#allocation9_spill] sm:$0xff] %v4172_v11  ;;  %v4174_v12 = vpop.f32.mrb[17].mxu1  ;;  %v4178_v15 = vpop.f32.mrb[18].mxu0 }
 0x100   :  { %4660 = vst [vmem:[#allocation10_spill] sm:$0xff] %v4178_v15  ;;  %v4180_v16 = vpop.f32.mrb[18].mxu1  ;;  %v4184_v14 = vpop.f32.mrb[19].mxu0  ;;  %v4674_v23 = vmax.f32 %v4106_v42, %v4174_v12 }
 0x101   :  { %v4186_v18 = vpop.f32.mrb[19].mxu1 }
 0x102   :  { %v4678_v12 = vmax.f32 %v4114_v45, %v4186_v18 }
 0x105   :  { %v4190_v20 = vpop.f32.mrb[20].mxu0 }
 0x106   :  { %v4192_v21 = vpop.f32.mrb[20].mxu1  ;;  %v4198_v24 = vpop.f32.mrb[21].mxu0  ;;  %v4673_v39 = vmax.f32 %v4104_v41, %v4190_v20 }
 0x107   :  { %v4200_v25 = vpop.f32.mrb[21].mxu1  ;;  %v4206_v28 = vpop.f32.mrb[22].mxu0  ;;  %v4675_v35 = vmax.f32 %v4108_v43, %v4198_v24 }
 0x108   :  { %v4208_v29 = vpop.f32.mrb[22].mxu1  ;;  %v4214_v32 = vpop.f32.mrb[23].mxu0 }
 0x109   :  { %v4216_v33 = vpop.f32.mrb[23].mxu1 }
 0x10d   :  { %v4222_v36 = vpop.f32.mrb[24].mxu0 }
 0x10e   :  { %v4224_v37 = vpop.f32.mrb[24].mxu1  ;;  %v4230_v31 = vpop.f32.mrb[25].mxu0  ;;  %v4681_v24 = vmax.f32 %v4120_v47, %v4222_v36 }
 0x10f   :  { %v4232_v27 = vpop.f32.mrb[25].mxu1  ;;  %v4238_v34 = vpop.f32.mrb[26].mxu0 }
 0x110   :  { %v4240_v19 = vpop.f32.mrb[26].mxu1  ;;  %v4246_v30 = vpop.f32.mrb[27].mxu0  ;;  %v4685_v36 = vmax.f32 %v4128_v51, %v4238_v34 }
 0x111   :  { %v4248_v17 = vpop.f32.mrb[27].mxu1 }
 0x112   :  { %4661 = vst [vmem:[#allocation11_spill] sm:$0xff] %v4248_v17 }
 0x115   :  { %v4254_v26 = vpop.f32.mrb[28].mxu0 }
 0x116   :  { %v4256_v13 = vpop.f32.mrb[28].mxu1  ;;  %v4262_v22 = vpop.f32.mrb[29].mxu0  ;;  %v4689_v34 = vmax.f32 %v4136_v55, %v4254_v26 }
 0x117   :  { %4662 = vst [vmem:[#allocation12_spill] sm:$0xff] %v4256_v13  ;;  %v4264_v10 = vpop.f32.mrb[29].mxu1  ;;  %v4270_v17 = vpop.f32.mrb[30].mxu0 }
 0x118   :  { %4663 = vst [vmem:[#allocation13_spill] sm:$0xff] %v4264_v10  ;;  %v4272_v60 = vpop.f32.mrb[30].mxu1  ;;  %v4278_v13 = vpop.f32.mrb[31].mxu0  ;;  %v4693_v26 = vmax.f32 %v4144_v59, %v4270_v17 }
 0x119   :  { %4664 = vst [vmem:[#allocation14_spill] sm:$0xff] %v4272_v60  ;;  %v4280_v62 = vpop.f32.mrb[31].mxu1 }
 0x11a   :  { %4665 = vst [vmem:[#allocation15_spill] sm:$0xff] %v4280_v62 }
 0x11d   :  { %v4286_v10 = vpop.f32.mrb[32].mxu0 }
 0x11e   :  { %v4288_v0 = vpop.f32.mrb[32].mxu1  ;;  %v4294_v60 = vpop.f32.mrb[33].mxu0  ;;  %v4699_v59 = vld [vmem:[#allocation12_spill] sm:$0xff] }
 0x11f   :  { %4666 = vst [vmem:[#allocation16_spill] sm:$0xff] %v4288_v0  ;;  %4667 = vst [vmem:[#allocation17_spill] sm:$0xff] %v4294_v60  ;;  %v4296_v2 = vpop.f32.mrb[33].mxu1  ;;  %v4302_v62 = vpop.f32.mrb[34].mxu0  ;;  %v4672_v60 = vmax.f32 %v4102_v40, %v4168_v9  ;;  %v4677_v9 = vmax.f32 %v4112_v44, %v4206_v28 }
 0x120   :  { %4668 = vst [vmem:[#allocation18_spill] sm:$0xff] %v4296_v2  ;;  %v4304_v5 = vpop.f32.mrb[34].mxu1  ;;  %v4310_v0 = vpop.f32.mrb[35].mxu0 }
 0x121   :  { %4669 = vst [vmem:[#allocation19_spill] sm:$0xff] %v4304_v5  ;;  %4670 = vst [vmem:[#allocation20_spill] sm:$0xff] %v4310_v0  ;;  %v4312_v8 = vpop.f32.mrb[35].mxu1 }
 0x122   :  { %4671 = vst [vmem:[#allocation21_spill] sm:$0xff] %v4312_v8 }
 0x125   :  { %v1632_v2 = vpop.f32.mrb[36].mxu0 }
 0x126   :  { %v1675_v11 = vpop.f32.mrb[36].mxu1  ;;  %v4321_v1 = vmax.f32 %v4672_v60, %v1632_v2  ;;  %v1634_v5 = vpop.f32.mrb[37].mxu0  ;;  %v4676_v2 = vmax.f32 %v4110_v7, %v4180_v16 }
 0x127   :  { %v4326_v38 = vmax.f32 %v4673_v39, %v1675_v11  ;;  %v1677_v15 = vpop.f32.mrb[37].mxu1  ;;  %v4331_v0 = vmax.f32 %v4674_v23, %v1634_v5  ;;  %v1636_v40 = vpop.f32.mrb[38].mxu0  ;;  %v4680_v23 = vmax.f32 %v4118_v46, %v4192_v21 }
 0x128   :  { %v4336_v8 = vmax.f32 %v4675_v35, %v1677_v15  ;;  %v1679_v60 = vpop.f32.mrb[38].mxu1  ;;  %v4341_v41 = vmax.f32 %v4676_v2, %v1636_v40  ;;  %v1638_v42 = vpop.f32.mrb[39].mxu0  ;;  %v4679_v15 = vmax.f32 %v4116_v3, %v4214_v32  ;;  %v4682_v35 = vmax.f32 %v4122_v48, %v4200_v25 }
 0x129   :  { %v4346_v11 = vmax.f32 %v4677_v9, %v1679_v60  ;;  %v1681_v5 = vpop.f32.mrb[39].mxu1  ;;  %v4351_v43 = vmax.f32 %v4678_v12, %v1638_v42  ;;  %v4683_v32 = vmax.f32 %v4124_v49, %v4230_v31  ;;  %v4684_v40 = vmax.f32 %v4126_v50, %v4208_v29 }
 0x12a   :  { %v4356_v20 = vmax.f32 %v4679_v15, %v1681_v5  ;;  %v4686_v2 = vmax.f32 %v4130_v52, %v4216_v33  ;;  %v4687_v31 = vmax.f32 %v4132_v53, %v4246_v30  ;;  %v4688_v42 = vmax.f32 %v4134_v54, %v4224_v37 }
 0x12b   :  { %v4690_v12 = vmax.f32 %v4138_v56, %v4232_v27  ;;  %v4691_v30 = vmax.f32 %v4140_v57, %v4262_v22  ;;  %v4697_v22 = vmax.f32 %v4148_v61, %v4278_v13  ;;  %v4703_v61 = vld [vmem:[#allocation13_spill] sm:$0xff] }
 0x12d   :  { %v1718_v7 = vpop.f32.mrb[40].mxu0 }
 0x12e   :  { %v1761_v16 = vpop.f32.mrb[40].mxu1  ;;  %v4361_v44 = vmax.f32 %v4680_v23, %v1718_v7  ;;  %v1720_v45 = vpop.f32.mrb[41].mxu0  ;;  %v4692_v7 = vmax.f32 %v4142_v58, %v4240_v19  ;;  %v4694_v23 = vld [vmem:[#allocation2_spill] sm:$0xff] }
 0x12f   :  { %v4366_v28 = vmax.f32 %v4681_v24, %v1761_v16  ;;  %v1763_v18 = vpop.f32.mrb[41].mxu1  ;;  %v4371_v3 = vmax.f32 %v4682_v35, %v1720_v45  ;;  %v1722_v46 = vpop.f32.mrb[42].mxu0  ;;  %v4695_v24 = vld [vmem:[#allocation11_spill] sm:$0xff] }
 0x130   :  { %v4376_v39 = vmax.f32 %v4683_v32, %v1763_v18  ;;  %v1765_v21 = vpop.f32.mrb[42].mxu1  ;;  %v4381_v47 = vmax.f32 %v4684_v40, %v1722_v46  ;;  %v1724_v48 = vpop.f32.mrb[43].mxu0  ;;  %v4696_v45 = vmax.f32 %v4694_v23, %v4695_v24  ;;  %v4698_v32 = vld [vmem:[#allocation3_spill] sm:$0xff]  ;;  %v4715_v24 = vld [vmem:[#allocation20_spill] sm:$0xff] }
 0x131   :  { %v4386_v60 = vmax.f32 %v4685_v36, %v1765_v21  ;;  %v1767_v25 = vpop.f32.mrb[43].mxu1  ;;  %v4391_v49 = vmax.f32 %v4686_v2, %v1724_v48  ;;  %v4438_v58 = vpop.permute.xlu0 %2701  ;;  %v4700_v17 = vmax.f32 %v4698_v32, %v4699_v59  ;;  %v4701_v21 = vmax.f32 %v4152_v63, %v4286_v10  ;;  %v4717_v59 = vld [vmem:[#allocation8_spill] sm:$0xff] }
 0x132   :  { %v4396_v9 = vmax.f32 %v4687_v31, %v1767_v25  ;;  %v4702_v25 = vld [vmem:[#allocation4_spill] sm:$0xff]  ;;  %v4705_v31 = vld [vmem:[#allocation5_spill] sm:$0xff]  ;;  %v4711_v10 = vmax.f32 %v4160_v4, %v4302_v62 }
 0x133   :  { %v4704_v13 = vmax.f32 %v4702_v25, %v4703_v61  ;;  %v4718_v62 = vld [vmem:[#allocation16_spill] sm:$0xff]  ;;  %v4720_v25 = vld [vmem:[#allocation9_spill] sm:$0xff]  ;;  %v4721_v61 = vld [vmem:[#allocation18_spill] sm:$0xff] }
 0x134   :  { %v4719_v4 = vmax.f32 %v4717_v59, %v4718_v62 }
 0x135   :  { %v1804_v50 = vpop.f32.mrb[44].mxu0 }
 0x136   :  { %v1847_v29 = vpop.f32.mrb[44].mxu1  ;;  %v4401_v51 = vmax.f32 %v4688_v42, %v1804_v50  ;;  %v1806_v52 = vpop.f32.mrb[45].mxu0  ;;  %v4706_v50 = vld [vmem:[#allocation17_spill] sm:$0xff] }
 0x137   :  { %v4406_v5 = vmax.f32 %v4689_v34, %v1847_v29  ;;  %v1849_v33 = vpop.f32.mrb[45].mxu1  ;;  %v4411_v53 = vmax.f32 %v4690_v12, %v1806_v52  ;;  %v1808_v54 = vpop.f32.mrb[46].mxu0  ;;  %v4707_v29 = vmax.f32 %v4705_v31, %v4706_v50  ;;  %v4709_v12 = vld [vmem:[#allocation14_spill] sm:$0xff] }
 0x138   :  { %v4416_v15 = vmax.f32 %v4691_v30, %v1849_v33  ;;  %v1851_v37 = vpop.f32.mrb[46].mxu1  ;;  %v4421_v55 = vmax.f32 %v4692_v7, %v1808_v54  ;;  %v1810_v56 = vpop.f32.mrb[47].mxu0  ;;  %v4708_v33 = vld [vmem:[#allocation6_spill] sm:$0xff] }
 0x139   :  { %v4426_v16 = vmax.f32 %v4693_v26, %v1851_v37  ;;  %v1853_v27 = vpop.f32.mrb[47].mxu1  ;;  %v4431_v57 = vmax.f32 %v4696_v45, %v1810_v56  ;;  %v4710_v30 = vmax.f32 %v4708_v33, %v4709_v12  ;;  %v4712_v26 = vld [vmem:[#allocation7_spill] sm:$0xff]  ;;  %v4716_v45 = vmax.f32 %v4164_v6, %v4715_v24 }
 0x13a   :  { %v4436_v18 = vmax.f32 %v4697_v22, %v1853_v27  ;;  %v4713_v56 = vld [vmem:[#allocation15_spill] sm:$0xff] }
 0x13b   :  { %v4714_v27 = vmax.f32 %v4712_v26, %v4713_v56  ;;  %v4724_v33 = vld [vmem:[#allocation19_spill] sm:$0xff]  ;;  %v4726_v26 = vld [vmem:[#allocation21_spill] sm:$0xff] }
 0x13c   :  { %v4727_v56 = vmax.f32 %v4184_v14, %v4726_v26 }
 0x13d   :  { %v1890_v19 = vpop.f32.mrb[48].mxu0 }
 0x13e   :  { %v1933_v35 = vpop.f32.mrb[48].mxu1  ;;  %v4443_v46 = vmax.f32 %v4700_v17, %v1890_v19  ;;  %v1892_v36 = vpop.f32.mrb[49].mxu0 }
 0x13f   :  { %v4448_v40 = vmax.f32 %v4701_v21, %v1933_v35  ;;  %v1935_v48 = vpop.f32.mrb[49].mxu1  ;;  %v4453_v2 = vmax.f32 %v4704_v13, %v1892_v36  ;;  %v1894_v34 = vpop.f32.mrb[50].mxu0  ;;  %v4722_v13 = vmax.f32 %v4720_v25, %v4721_v61 }
 0x140   :  { %v4458_v42 = vmax.f32 %v4707_v29, %v1935_v48  ;;  %v1937_v52 = vpop.f32.mrb[50].mxu1  ;;  %v4463_v63 = vmax.f32 %v4710_v30, %v1894_v34  ;;  %v1896_v37 = vpop.f32.mrb[51].mxu0 }
 0x141   :  { %v4468_v54 = vmax.f32 %v4711_v10, %v1937_v52  ;;  %v1939_v7 = vpop.f32.mrb[51].mxu1  ;;  %v4473_v23 = vmax.f32 %v4714_v27, %v1896_v37  ;;  %v4480_v19 = vpop.permute.xlu0 %2706  ;;  %v4723_v52 = vld [vmem:[#allocation10_spill] sm:$0xff] }
 0x142   :  { %v4478_v22 = vmax.f32 %v4716_v45, %v1939_v7  ;;  %v4725_v12 = vmax.f32 %v4723_v52, %v4724_v33 }
 0x145   :  { %v1976_v35 = vpop.f32.mrb[52].mxu0 }
 0x146   :  { %v2308_v32 = vpop.f32.mrb[52].mxu1  ;;  %v4485_v17 = vmax.f32 %v4719_v4, %v1976_v35  ;;  %v1978_v36 = vpop.f32.mrb[53].mxu0 }
 0x147   :  { %v2661_v21 = vmax.f32 %v4321_v1, %v2308_v32  ;;  %v2310_v48 = vpop.f32.mrb[53].mxu1  ;;  %v4491_v31 = vmax.f32 %v4722_v13, %v1978_v36  ;;  %v1980_v50 = vpop.f32.mrb[54].mxu0 }
 0x148   :  { %v2662_v6 = vmax.f32 %v4331_v0, %v2310_v48  ;;  %v2312_v29 = vpop.f32.mrb[54].mxu1  ;;  %v4498_v30 = vmax.f32 %v4725_v12, %v1980_v50  ;;  %v1982_v10 = vpop.f32.mrb[55].mxu0 }
 0x149   :  { %v2709_v34 = vadd.f32 %v4438_v58, %v2661_v21  ;;  %v2679_v1 = vmax.f32 %v4341_v41, %v2312_v29  ;;  %v2314_v37 = vpop.f32.mrb[55].mxu1  ;;  %v4505_v27 = vmax.f32 %v4727_v56, %v1982_v10 }
 0x14a   :  { %v2710_v7 = vadd.f32 %v4438_v58, %v2662_v6  ;;  %v2680_v0 = vmax.f32 %v4351_v43, %v2314_v37 }
 0x14b   :  { %v2745_v24 = vmax.f32 %v2709_v34, 0.0  ;;  %v2727_v45 = vadd.f32 %v4480_v19, %v2679_v1 }
 0x14c   :  { %v2746_v35 = vmax.f32 %v2710_v7, 0.0  ;;  %v2728_v32 = vadd.f32 %v4480_v19, %v2680_v0 }
 0x14d   :  { %v2763_v59 = vmax.f32 %v2727_v45, 0.0  ;;  %v2351_v4 = vpop.f32.mrb[56].mxu0 }
 0x14e   :  { %v3218_v62 = vpack.c.bf16 %v2746_v35, %v2745_v24  ;;  %v2764_v41 = vmax.f32 %v2728_v32, 0.0  ;;  %v2394_v21 = vpop.f32.mrb[56].mxu1  ;;  %v2663_v36 = vmax.f32 %v4326_v38, %v2351_v4  ;;  %v2353_v14 = vpop.f32.mrb[57].mxu0 }
 0x14f   :  { %v2665_v48 = vmax.f32 %v4361_v44, %v2394_v21  ;;  %v2396_v25 = vpop.f32.mrb[57].mxu1  ;;  %v2664_v61 = vmax.f32 %v4336_v8, %v2353_v14  ;;  %v2355_v6 = vpop.f32.mrb[58].mxu0 }
 0x150   :  { %2889 = vst [vmem:[%s4631_s3] sm:$0xff] %v3218_v62  ;;  %v3227_v43 = vpack.c.bf16 %v2764_v41, %v2763_v59  ;;  %v2666_v13 = vmax.f32 %v4371_v3, %v2396_v25  ;;  %v2398_v50 = vpop.f32.mrb[58].mxu1  ;;  %v2711_v29 = vadd.f32 %v4438_v58, %v2663_v36  ;;  %v2681_v38 = vmax.f32 %v4346_v11, %v2355_v6  ;;  %v2357_v52 = vpop.f32.mrb[59].mxu0 }
 0x151   :  { %v2713_v34 = vadd.f32 %v4438_v58, %v2665_v48  ;;  %v2683_v44 = vmax.f32 %v4381_v47, %v2398_v50  ;;  %v2400_v33 = vpop.f32.mrb[59].mxu1  ;;  %v2712_v8 = vadd.f32 %v4438_v58, %v2664_v61  ;;  %v2682_v12 = vmax.f32 %v4356_v20, %v2357_v52 }
 0x152   :  { %2898 = vst [vmem:[%s4631_s3 + $0x48] sm:$0x11] %v3227_v43  ;;  %v2714_v3 = vadd.f32 %v4438_v58, %v2666_v13  ;;  %v2684_v1 = vmax.f32 %v4391_v49, %v2400_v33  ;;  %v2747_v10 = vmax.f32 %v2711_v29, 0.0  ;;  %v2729_v11 = vadd.f32 %v4480_v19, %v2681_v38 }
 0x153   :  { %v2749_v37 = vmax.f32 %v2713_v34, 0.0  ;;  %v2731_v47 = vadd.f32 %v4480_v19, %v2683_v44  ;;  %v2748_v7 = vmax.f32 %v2712_v8, 0.0  ;;  %v2730_v56 = vadd.f32 %v4480_v19, %v2682_v12 }
 0x154   :  { %v2750_v26 = vmax.f32 %v2714_v3, 0.0  ;;  %v2732_v0 = vadd.f32 %v4480_v19, %v2684_v1  ;;  %v2765_v24 = vmax.f32 %v2729_v11, 0.0 }
 0x155   :  { %v2767_v45 = vmax.f32 %v2731_v47, 0.0  ;;  %v3219_v35 = vpack.c.bf16 %v2748_v7, %v2747_v10  ;;  %v2766_v59 = vmax.f32 %v2730_v56, 0.0  ;;  %v2437_v62 = vpop.f32.mrb[60].mxu0 }
 0x156   :  { %v3220_v32 = vpack.c.bf16 %v2750_v26, %v2749_v37  ;;  %v2768_v20 = vmax.f32 %v2732_v0, 0.0  ;;  %v2480_v49 = vpop.f32.mrb[60].mxu1  ;;  %v2667_v41 = vmax.f32 %v4366_v28, %v2437_v62  ;;  %v2439_v21 = vpop.f32.mrb[61].mxu0 }
 0x157   :  { %v2669_v4 = vmax.f32 %v4401_v51, %v2480_v49  ;;  %v2482_v36 = vpop.f32.mrb[61].mxu1  ;;  %2890 = vst [vmem:[%s4631_s3 + $0x8] sm:$0xff] %v3219_v35  ;;  %v3228_v48 = vpack.c.bf16 %v2766_v59, %v2765_v24  ;;  %v2668_v25 = vmax.f32 %v4376_v39, %v2439_v21  ;;  %v2441_v61 = vpop.f32.mrb[62].mxu0 }
 0x158   :  { %2891 = vst [vmem:[%s4631_s3 + $0x10] sm:$0xff] %v3220_v32  ;;  %v3229_v14 = vpack.c.bf16 %v2768_v20, %v2767_v45  ;;  %v2670_v43 = vmax.f32 %v4411_v53, %v2482_v36  ;;  %v2484_v28 = vpop.f32.mrb[62].mxu1  ;;  %v2715_v51 = vadd.f32 %v4438_v58, %v2667_v41  ;;  %v2685_v6 = vmax.f32 %v4386_v60, %v2441_v61  ;;  %v2443_v29 = vpop.f32.mrb[63].mxu0 }
 0x159   :  { %v2717_v13 = vadd.f32 %v4438_v58, %v2669_v4  ;;  %v2687_v50 = vmax.f32 %v4421_v55, %v2484_v28  ;;  %v2486_v34 = vpop.f32.mrb[63].mxu1  ;;  %2899 = vst [vmem:[%s4631_s3 + $0x50] sm:$0x11] %v3228_v48  ;;  %v2716_v39 = vadd.f32 %v4438_v58, %v2668_v25  ;;  %v2686_v38 = vmax.f32 %v4396_v9, %v2443_v29 }
 0x15a   :  { %2900 = vst [vmem:[%s4631_s3 + $0x58] sm:$0x11] %v3229_v14  ;;  %v2718_v53 = vadd.f32 %v4438_v58, %v2670_v43  ;;  %v2688_v60 = vmax.f32 %v4431_v57, %v2486_v34  ;;  %v2751_v44 = vmax.f32 %v2715_v51, 0.0  ;;  %v2733_v52 = vadd.f32 %v4480_v19, %v2685_v6 }
 0x15b   :  { %v2753_v55 = vmax.f32 %v2717_v13, 0.0  ;;  %v2735_v33 = vadd.f32 %v4480_v19, %v2687_v50  ;;  %v2752_v8 = vmax.f32 %v2716_v39, 0.0  ;;  %v2734_v12 = vadd.f32 %v4480_v19, %v2686_v38 }
 0x15c   :  { %v2754_v3 = vmax.f32 %v2718_v53, 0.0  ;;  %v2736_v1 = vadd.f32 %v4480_v19, %v2688_v60  ;;  %v2769_v10 = vmax.f32 %v2733_v52, 0.0 }
 0x15d   :  { %v2771_v37 = vmax.f32 %v2735_v33, 0.0  ;;  %v3221_v11 = vpack.c.bf16 %v2752_v8, %v2751_v44  ;;  %v2770_v7 = vmax.f32 %v2734_v12, 0.0  ;;  %v2523_v26 = vpop.f32.mrb[64].mxu0 }
 0x15e   :  { %v3222_v47 = vpack.c.bf16 %v2754_v3, %v2753_v55  ;;  %v2772_v9 = vmax.f32 %v2736_v1, 0.0  ;;  %v2566_v57 = vpop.f32.mrb[64].mxu1  ;;  %v2671_v56 = vmax.f32 %v4406_v5, %v2523_v26  ;;  %v2525_v24 = vpop.f32.mrb[65].mxu0 }
 0x15f   :  { %v2673_v0 = vmax.f32 %v4443_v46, %v2566_v57  ;;  %v2568_v45 = vpop.f32.mrb[65].mxu1  ;;  %2892 = vst [vmem:[%s4631_s3 + $0x18] sm:$0xff] %v3221_v11  ;;  %v3230_v35 = vpack.c.bf16 %v2770_v7, %v2769_v10  ;;  %v2672_v59 = vmax.f32 %v4416_v15, %v2525_v24  ;;  %v2527_v62 = vpop.f32.mrb[66].mxu0 }
 0x160   :  { %2893 = vst [vmem:[%s4631_s3 + $0x20] sm:$0xff] %v3222_v47  ;;  %v3231_v32 = vpack.c.bf16 %v2772_v9, %v2771_v37  ;;  %v2674_v20 = vmax.f32 %v4453_v2, %v2568_v45  ;;  %v2570_v5 = vpop.f32.mrb[66].mxu1  ;;  %v2719_v46 = vadd.f32 %v4438_v58, %v2671_v56  ;;  %v2689_v41 = vmax.f32 %v4426_v16, %v2527_v62  ;;  %v2529_v21 = vpop.f32.mrb[67].mxu0 }
 0x161   :  { %v2721_v49 = vadd.f32 %v4438_v58, %v2673_v0  ;;  %v2691_v4 = vmax.f32 %v4463_v63, %v2570_v5  ;;  %v2572_v36 = vpop.f32.mrb[67].mxu1  ;;  %2901 = vst [vmem:[%s4631_s3 + $0x60] sm:$0x11] %v3230_v35  ;;  %v2720_v15 = vadd.f32 %v4438_v58, %v2672_v59  ;;  %v2690_v48 = vmax.f32 %v4436_v18, %v2529_v21 }
 0x162   :  { %2902 = vst [vmem:[%s4631_s3 + $0x68] sm:$0x11] %v3231_v32  ;;  %v2722_v2 = vadd.f32 %v4438_v58, %v2674_v20  ;;  %v2692_v16 = vmax.f32 %v4473_v23, %v2572_v36  ;;  %v2755_v14 = vmax.f32 %v2719_v46, 0.0  ;;  %v2737_v25 = vadd.f32 %v4480_v19, %v2689_v41 }
 0x163   :  { %v2757_v63 = vmax.f32 %v2721_v49, 0.0  ;;  %v2739_v43 = vadd.f32 %v4480_v19, %v2691_v4  ;;  %v2756_v61 = vmax.f32 %v2720_v15, 0.0  ;;  %v2738_v51 = vadd.f32 %v4480_v19, %v2690_v48 }
 0x164   :  { %v2758_v28 = vmax.f32 %v2722_v2, 0.0  ;;  %v2740_v13 = vadd.f32 %v4480_v19, %v2692_v16  ;;  %v2773_v6 = vmax.f32 %v2737_v25, 0.0 }
 0x165   :  { %v2775_v50 = vmax.f32 %v2739_v43, 0.0  ;;  %v3223_v29 = vpack.c.bf16 %v2756_v61, %v2755_v14  ;;  %v2774_v39 = vmax.f32 %v2738_v51, 0.0  ;;  %v2609_v53 = vpop.f32.mrb[68].mxu0 }
 0x166   :  { %v3224_v34 = vpack.c.bf16 %v2758_v28, %v2757_v63  ;;  %v2776_v18 = vmax.f32 %v2740_v13, 0.0  ;;  %v2652_v23 = vpop.f32.mrb[68].mxu1  ;;  %v2675_v38 = vmax.f32 %v4448_v40, %v2609_v53  ;;  %v2611_v44 = vpop.f32.mrb[69].mxu0 }
 0x167   :  { %v2677_v60 = vmax.f32 %v4485_v17, %v2652_v23  ;;  %v2654_v55 = vpop.f32.mrb[69].mxu1  ;;  %2894 = vst [vmem:[%s4631_s3 + $0x28] sm:$0xff] %v3223_v29  ;;  %v3232_v52 = vpack.c.bf16 %v2774_v39, %v2773_v6  ;;  %v2676_v8 = vmax.f32 %v4458_v42, %v2611_v44  ;;  %v2613_v12 = vpop.f32.mrb[70].mxu0 }
 0x168   :  { %2895 = vst [vmem:[%s4631_s3 + $0x30] sm:$0xff] %v3224_v34  ;;  %v3233_v33 = vpack.c.bf16 %v2776_v18, %v2775_v50  ;;  %v2678_v3 = vmax.f32 %v4491_v31, %v2654_v55  ;;  %v2656_v40 = vpop.f32.mrb[70].mxu1  ;;  %v2723_v17 = vadd.f32 %v4438_v58, %v2675_v38  ;;  %v2693_v10 = vmax.f32 %v4468_v54, %v2613_v12  ;;  %v2615_v11 = vpop.f32.mrb[71].mxu0 }
 0x169   :  { %v2725_v1 = vadd.f32 %v4438_v58, %v2677_v60  ;;  %v2695_v37 = vmax.f32 %v4498_v30, %v2656_v40  ;;  %v2658_v47 = vpop.f32.mrb[71].mxu1  ;;  %2903 = vst [vmem:[%s4631_s3 + $0x70] sm:$0x11] %v3232_v52  ;;  %v2724_v42 = vadd.f32 %v4438_v58, %v2676_v8  ;;  %v2694_v7 = vmax.f32 %v4478_v22, %v2615_v11 }
 0x16a   :  { %2904 = vst [vmem:[%s4631_s3 + $0x78] sm:$0x11] %v3233_v33  ;;  %v2726_v31 = vadd.f32 %v4438_v58, %v2678_v3  ;;  %v2696_v54 = vmax.f32 %v4505_v27, %v2658_v47  ;;  %v2759_v9 = vmax.f32 %v2723_v17, 0.0  ;;  %v2741_v26 = vadd.f32 %v4480_v19, %v2693_v10 }
 0x16b   :  { %v2761_v30 = vmax.f32 %v2725_v1, 0.0  ;;  %v2743_v57 = vadd.f32 %v4480_v19, %v2695_v37  ;;  %v2760_v56 = vmax.f32 %v2724_v42, 0.0  ;;  %v2742_v24 = vadd.f32 %v4480_v19, %v2694_v7 }
 0x16c   :  { %v2762_v0 = vmax.f32 %v2726_v31, 0.0  ;;  %v2744_v45 = vadd.f32 %v4480_v19, %v2696_v54  ;;  %v2777_v35 = vmax.f32 %v2741_v26, 0.0 }
 0x16d   :  { %v2779_v32 = vmax.f32 %v2743_v57, 0.0  ;;  %v3225_v59 = vpack.c.bf16 %v2760_v56, %v2759_v9  ;;  %v2778_v20 = vmax.f32 %v2742_v24, 0.0 }
 0x16e   :  { %v3226_v58 = vpack.c.bf16 %v2762_v0, %v2761_v30  ;;  %v2780_v22 = vmax.f32 %v2744_v45, 0.0 }
 0x16f   :  { %2896 = vst [vmem:[%s4631_s3 + $0x38] sm:$0xff] %v3225_v59  ;;  %v3234_v27 = vpack.c.bf16 %v2778_v20, %v2777_v35 }
 0x170   :  { %2897 = vst [vmem:[%s4631_s3 + $0x40] sm:$0xff] %v3226_v58  ;;  %v3235_v62 = vpack.c.bf16 %v2780_v22, %v2779_v32 }
 0x171   :  { %2905 = vst [vmem:[%s4631_s3 + $0x80] sm:$0x11] %v3234_v27 }
 0x172   :  { %2906 = vst [vmem:[%s4631_s3 + $0x88] sm:$0x11] %v3235_v62 }

// kernel: classifier_forward.3
= control target key start
LH: loop header
LB: loop body
LE: loop exit
PB: predicated region body
PF: predicated region fallthrough
CT: control target
= control target key end

     0   :  { %vm330_vm0 = vcmask 998400   ;;  %vm379_vm1 = vcmask 1044480   ;;  %vm1905_vm2 = vcmask 1041408   ;;  %vm4306_vm3 = vmmov 0   ;;  %s5487_s1 = inlined_call_operand.vmem [shape: bf16[250,20], index: 1, kind: input, shape index: {}]   ;;  %s5488_s0 = inlined_call_operand.vmem [shape: bf16[4,16,16,250], index: 0, kind: input, shape index: {}]   ;;  %s5489_s3 = inlined_call_operand.vmem [shape: bf16[16,20,50], index: 3, kind: input, shape index: {}]   ;;  %s5490_s2 = inlined_call_operand.vmem [shape: f32[1,20], index: 2, kind: input, shape index: {}]   ;;  %s5491_s5 = inlined_call_operand.vmem [shape: bf16[50,10], index: 5, kind: input, shape index: {}]   ;;  %s5492_s4 = inlined_call_operand.vmem [shape: f32[1,50], index: 4, kind: input, shape index: {}]   ;;  %s5493_s6 = inlined_call_operand.vmem [shape: f32[1,10], index: 6, kind: input, shape index: {}]   ;;  %s5494_s7 = inlined_call_operand.vmem [shape: f32[16,10], index: 7, kind: output, shape index: {}]  }
   0x1   :  { %v4053_v0 = vld [vmem:[%s5487_s1 + $0x40] sm:$0xff]   ;;  %v4356_v2 = vld [vmem:[%s5487_s1 + $0x48] sm:$0xff]   ;;  %v4368_v4 = vld [vmem:[%s5487_s1 + $0x50] sm:$0xff]   ;;  %vm1901_vm4 = vcmask 162816   ;;  %vm2925_vm5 = vcmask 1040384   ;;  %vm2921_vm6 = vcmask 408576  }
   0x2   :  { %v4054_v1 = vld [vmem:[%s5487_s1] sm:$0xff]   ;;  %3406 = vmatprep.subr.bf16.mxu0 %v4053_v0  ;;  %3518 = vmatprep.subr.bf16.mxu1 %v4053_v0  ;;  %v4361_v3 = vld [vmem:[%s5487_s1 + $0x8] sm:$0xff]   ;;  %v4375_v5 = vld [vmem:[%s5487_s1 + $0x10] sm:$0xff]   ;;  %vm2970_vm7 = vcmask 80896  }
   0x3   :  { %3407 = vmatpush3.bf16.msra.mxu0 %v4054_v1  ;;  %3519 = vmatpush3.bf16.msra.mxu1 %v4054_v1  ;;  %v4382_v6 = vld [vmem:[%s5487_s1 + $0x58] sm:$0xff]   ;;  %v4396_v8 = vld [vmem:[%s5487_s1 + $0x60] sm:$0xff]   ;;  %v4410_v10 = vld [vmem:[%s5487_s1 + $0x68] sm:$0xff]  }
   0x4   :  { %3408 = vmatprep.subr.bf16.mxu0 %v4356_v2  ;;  %3520 = vmatprep.subr.bf16.mxu1 %v4356_v2  ;;  %v4389_v7 = vld [vmem:[%s5487_s1 + $0x18] sm:$0xff]   ;;  %v4403_v9 = vld [vmem:[%s5487_s1 + $0x20] sm:$0xff]   ;;  %v4423_v13 = vld [vmem:[%s5487_s1 + $0x28] sm:$0xff]  }
   0x5   :  { %v4071_v11 = vld [vmem:[%s5488_s0 + $0x4] ss:$8 sps:$4 sm:$0xff]   ;;  %v4430_v14 = vld [vmem:[%s5487_s1 + $0x70] sm:$0xff]   ;;  %v4446_v16 = vld [vmem:[%s5487_s1 + $0x78] sm:$0x1f]  }
   0x6   :  { %v4074_v12 = vld [vmem:[%s5488_s0 + $0x104] ss:$8 sps:$4 sm:$0xff]   ;;  %3049 = vmatprep.mubr.msk.bf16.mxu0 %vm330_vm0, %v4071_v11  ;;  %v4439_v15 = vld [vmem:[%s5487_s1 + $0x30] sm:$0xff]   ;;  %v4453_v17 = vld [vmem:[%s5487_s1 + $0x38] sm:$0xff]  }
   0x7   :  { %3409 = vmatpush3.bf16.msra.mxu0 %v4361_v3  ;;  %3521 = vmatpush3.bf16.msra.mxu1 %v4361_v3  ;;  %v4069_v18 = vld [vmem:[%s5488_s0] ss:$8 sps:$4 sm:$0xff]   ;;  %v4075_v20 = vld [vmem:[%s5488_s0 + $0x14] ss:$8 sps:$4 sm:$0xff]   ;;  %v4079_v22 = vld [vmem:[%s5488_s0 + $0x10] ss:$8 sps:$4 sm:$0xff]  }
   0x8   :  { %3410 = vmatprep.subr.bf16.mxu0 %v4368_v4  ;;  %3522 = vmatprep.subr.bf16.mxu1 %v4368_v4  ;;  %v4072_v19 = vld [vmem:[%s5488_s0 + $0x100] ss:$8 sps:$4 sm:$0xff]   ;;  %v4077_v21 = vld [vmem:[%s5488_s0 + $0x114] ss:$8 sps:$4 sm:$0xff]   ;;  %v4080_v23 = vld [vmem:[%s5488_s0 + $0x110] ss:$8 sps:$4 sm:$0xff]  }
   0x9   :  { %3129 = vmatprep.mubr.msk.bf16.mxu1 %vm330_vm0, %v4074_v12  ;;  %v4081_v24 = vld [vmem:[%s5488_s0 + $0x24] ss:$8 sps:$4 sm:$0xff]   ;;  %v4085_v26 = vld [vmem:[%s5488_s0 + $0x20] ss:$8 sps:$4 sm:$0xff]   ;;  %v4087_v28 = vld [vmem:[%s5488_s0 + $0x34] ss:$8 sps:$4 sm:$0xff]  }
   0xa   :  { %v4083_v25 = vld [vmem:[%s5488_s0 + $0x124] ss:$8 sps:$4 sm:$0xff]   ;;  %v4086_v27 = vld [vmem:[%s5488_s0 + $0x120] ss:$8 sps:$4 sm:$0xff]   ;;  %v4089_v29 = vld [vmem:[%s5488_s0 + $0x134] ss:$8 sps:$4 sm:$0xff]  }
   0xb   :  { %3411 = vmatpush3.bf16.msra.mxu0 %v4375_v5  ;;  %3523 = vmatpush3.bf16.msra.mxu1 %v4375_v5  ;;  %v4091_v30 = vld [vmem:[%s5488_s0 + $0x30] ss:$8 sps:$4 sm:$0xff]   ;;  %v4093_v32 = vld [vmem:[%s5488_s0 + $0x44] ss:$8 sps:$4 sm:$0xff]   ;;  %v4097_v34 = vld [vmem:[%s5488_s0 + $0x40] ss:$8 sps:$4 sm:$0xff]  }
   0xc   :  { %3412 = vmatprep.subr.bf16.mxu0 %v4382_v6  ;;  %3524 = vmatprep.subr.bf16.mxu1 %v4382_v6  ;;  %v4092_v31 = vld [vmem:[%s5488_s0 + $0x130] ss:$8 sps:$4 sm:$0xff]   ;;  %v4095_v33 = vld [vmem:[%s5488_s0 + $0x144] ss:$8 sps:$4 sm:$0xff]   ;;  %v4098_v35 = vld [vmem:[%s5488_s0 + $0x140] ss:$8 sps:$4 sm:$0xff]  }
   0xd   :  { %v4099_v36 = vld [vmem:[%s5488_s0 + $0x54] ss:$8 sps:$4 sm:$0xff]   ;;  %v4103_v38 = vld [vmem:[%s5488_s0 + $0x50] ss:$8 sps:$4 sm:$0xff]   ;;  %v4105_v40 = vld [vmem:[%s5488_s0 + $0x64] ss:$8 sps:$4 sm:$0xff]  }
   0xe   :  { %v4101_v37 = vld [vmem:[%s5488_s0 + $0x154] ss:$8 sps:$4 sm:$0xff]   ;;  %v4104_v39 = vld [vmem:[%s5488_s0 + $0x150] ss:$8 sps:$4 sm:$0xff]   ;;  %v4107_v41 = vld [vmem:[%s5488_s0 + $0x164] ss:$8 sps:$4 sm:$0xff]  }
   0xf   :  { %3413 = vmatpush3.bf16.msra.mxu0 %v4389_v7  ;;  %3525 = vmatpush3.bf16.msra.mxu1 %v4389_v7  ;;  %v4109_v42 = vld [vmem:[%s5488_s0 + $0x60] ss:$8 sps:$4 sm:$0xff]   ;;  %v4111_v44 = vld [vmem:[%s5488_s0 + $0x74] ss:$8 sps:$4 sm:$0xff]   ;;  %v4115_v46 = vld [vmem:[%s5488_s0 + $0x70] ss:$8 sps:$4 sm:$0xff]  }
  0x10   :  { %3414 = vmatprep.subr.bf16.mxu0 %v4396_v8  ;;  %3526 = vmatprep.subr.bf16.mxu1 %v4396_v8  ;;  %v4110_v43 = vld [vmem:[%s5488_s0 + $0x160] ss:$8 sps:$4 sm:$0xff]   ;;  %v4113_v45 = vld [vmem:[%s5488_s0 + $0x174] ss:$8 sps:$4 sm:$0xff]   ;;  %v4116_v47 = vld [vmem:[%s5488_s0 + $0x170] ss:$8 sps:$4 sm:$0xff]  }
  0x11   :  { %v4117_v48 = vld [vmem:[%s5488_s0 + $0x84] ss:$8 sps:$4 sm:$0xff]   ;;  %v4121_v50 = vld [vmem:[%s5488_s0 + $0x80] ss:$8 sps:$4 sm:$0xff]   ;;  %v4123_v52 = vld [vmem:[%s5488_s0 + $0x94] ss:$8 sps:$4 sm:$0xff]  }
  0x12   :  { %v4119_v49 = vld [vmem:[%s5488_s0 + $0x184] ss:$8 sps:$4 sm:$0xff]   ;;  %v4122_v51 = vld [vmem:[%s5488_s0 + $0x180] ss:$8 sps:$4 sm:$0xff]   ;;  %v4125_v53 = vld [vmem:[%s5488_s0 + $0x194] ss:$8 sps:$4 sm:$0xff]  }
  0x13   :  { %3415 = vmatpush3.bf16.msra.mxu0 %v4403_v9  ;;  %3527 = vmatpush3.bf16.msra.mxu1 %v4403_v9  ;;  %v4127_v54 = vld [vmem:[%s5488_s0 + $0x90] ss:$8 sps:$4 sm:$0xff]   ;;  %v4129_v56 = vld [vmem:[%s5488_s0 + $0xa4] ss:$8 sps:$4 sm:$0xff]   ;;  %v4133_v58 = vld [vmem:[%s5488_s0 + $0xa0] ss:$8 sps:$4 sm:$0xff]  }
  0x14   :  { %3416 = vmatprep.subr.bf16.mxu0 %v4410_v10  ;;  %3528 = vmatprep.subr.bf16.mxu1 %v4410_v10  ;;  %v4128_v55 = vld [vmem:[%s5488_s0 + $0x190] ss:$8 sps:$4 sm:$0xff]   ;;  %v4131_v57 = vld [vmem:[%s5488_s0 + $0x1a4] ss:$8 sps:$4 sm:$0xff]   ;;  %v4134_v59 = vld [vmem:[%s5488_s0 + $0x1a0] ss:$8 sps:$4 sm:$0xff]  }
  0x15   :  { %v4135_v60 = vld [vmem:[%s5488_s0 + $0xb4] ss:$8 sps:$4 sm:$0xff]   ;;  %v4139_v62 = vld [vmem:[%s5488_s0 + $0xb0] ss:$8 sps:$4 sm:$0xff]   ;;  %v4158_v11 = vld [vmem:[%s5488_s0 + $0x1e0] ss:$8 sps:$4 sm:$0xff]  }
  0x16   :  { %v4137_v61 = vld [vmem:[%s5488_s0 + $0x1b4] ss:$8 sps:$4 sm:$0xff]   ;;  %v4140_v63 = vld [vmem:[%s5488_s0 + $0x1b0] ss:$8 sps:$4 sm:$0xff]  }
  0x17   :  { %3417 = vmatpush3.bf16.msra.mxu0 %v4423_v13  ;;  %3529 = vmatpush3.bf16.msra.mxu1 %v4423_v13  ;;  %v4159_v12 = vld [vmem:[%s5488_s0 + $0xf4] ss:$8 sps:$4 sm:$0xff]  }
  0x18   :  { %3418 = vmatprep.subr.bf16.mxu0 %v4430_v14  ;;  %3530 = vmatprep.subr.bf16.mxu1 %v4430_v14 }
  0x1b   :  { %3419 = vmatpush3.bf16.msra.mxu0 %v4439_v15  ;;  %3531 = vmatpush3.bf16.msra.mxu1 %v4439_v15 }
  0x1c   :  { %4047 = vmatprep.subr.msk.bf16.mxu0 %vm379_vm1, %v4446_v16  ;;  %4048 = vmatprep.subr.msk.bf16.mxu1 %vm379_vm1, %v4446_v16 }
  0x1f   :  { %3421 = vmatpush3.bf16.msra.mxu0 %v4453_v17  ;;  %3533 = vmatpush3.bf16.msra.mxu1 %v4453_v17 }
  0x20   :  { %3630 = vmatprep.subr.bf16.mxu0 %v4053_v0  ;;  %3742 = vmatprep.subr.bf16.mxu1 %v4053_v0  ;;  %v4141_v0 = vld [vmem:[%s5488_s0 + $0xc4] ss:$8 sps:$4 sm:$0xff]  }
  0x22   :  { %416 = vmatmul.mubr.bf16.vlgmr.msra.gmra.mrb[0].mxu0 %v4069_v18  ;;  %802 = vmatmul.mubr.bf16.vlgmr.msra.gmra.mrb[0].mxu1 %v4072_v19  ;;  %v4165_v18 = vld [vmem:[%s5488_s0 + $0x200] ss:$8 sps:$4 sm:$0xff]  }
  0x23   :  { %3631 = vmatpush3.bf16.msra.mxu0 %v4054_v1  ;;  %3743 = vmatpush3.bf16.msra.mxu1 %v4054_v1  ;;  %v4143_v1 = vld [vmem:[%s5488_s0 + $0x1c4] ss:$8 sps:$4 sm:$0xff]   ;;  %v4168_v19 = vld [vmem:[%s5488_s0 + $0x300] ss:$8 sps:$4 sm:$0xff]  }
  0x24   :  { %3050 = vmatprep.mubr.msk.bf16.mxu0 %vm330_vm0, %v4075_v20  ;;  %3130 = vmatprep.mubr.msk.bf16.mxu1 %vm330_vm0, %v4077_v21  ;;  %v4171_v20 = vld [vmem:[%s5488_s0 + $0x214] ss:$8 sps:$4 sm:$0xff]  }
  0x25   :  { %3632 = vmatprep.subr.bf16.mxu0 %v4356_v2  ;;  %3744 = vmatprep.subr.bf16.mxu1 %v4356_v2  ;;  %v4145_v2 = vld [vmem:[%s5488_s0 + $0xc0] ss:$8 sps:$4 sm:$0xff]   ;;  %v4173_v21 = vld [vmem:[%s5488_s0 + $0x314] ss:$8 sps:$4 sm:$0xff]  }
  0x27   :  { %3633 = vmatpush3.bf16.msra.mxu0 %v4361_v3  ;;  %3745 = vmatpush3.bf16.msra.mxu1 %v4361_v3  ;;  %v4146_v3 = vld [vmem:[%s5488_s0 + $0x1c0] ss:$8 sps:$4 sm:$0xff]  }
  0x28   :  { %3634 = vmatprep.subr.bf16.mxu0 %v4368_v4  ;;  %3746 = vmatprep.subr.bf16.mxu1 %v4368_v4  ;;  %v4147_v4 = vld [vmem:[%s5488_s0 + $0xd4] ss:$8 sps:$4 sm:$0xff]  }
  0x2a   :  { %424 = vmatmul.mubr.bf16.gmra.mrb[4].mxu0 %v4079_v22  ;;  %810 = vmatmul.mubr.bf16.gmra.mrb[4].mxu1 %v4080_v23  ;;  %v4175_v22 = vld [vmem:[%s5488_s0 + $0x210] ss:$8 sps:$4 sm:$0xff]  }
  0x2b   :  { %3051 = vmatprep.mubr.msk.bf16.mxu0 %vm330_vm0, %v4081_v24  ;;  %3131 = vmatprep.mubr.msk.bf16.mxu1 %vm330_vm0, %v4083_v25  ;;  %v4176_v23 = vld [vmem:[%s5488_s0 + $0x310] ss:$8 sps:$4 sm:$0xff]   ;;  %v4177_v24 = vld [vmem:[%s5488_s0 + $0x224] ss:$8 sps:$4 sm:$0xff]  }
  0x2c   :  { %3635 = vmatpush3.bf16.msra.mxu0 %v4375_v5  ;;  %3747 = vmatpush3.bf16.msra.mxu1 %v4375_v5  ;;  %v4149_v5 = vld [vmem:[%s5488_s0 + $0x1d4] ss:$8 sps:$4 sm:$0xff]   ;;  %v4179_v25 = vld [vmem:[%s5488_s0 + $0x324] ss:$8 sps:$4 sm:$0xff]  }
  0x2d   :  { %3636 = vmatprep.subr.bf16.mxu0 %v4382_v6  ;;  %3748 = vmatprep.subr.bf16.mxu1 %v4382_v6  ;;  %v4151_v6 = vld [vmem:[%s5488_s0 + $0xd0] ss:$8 sps:$4 sm:$0xff]  }
  0x30   :  { %3637 = vmatpush3.bf16.msra.mxu0 %v4389_v7  ;;  %3749 = vmatpush3.bf16.msra.mxu1 %v4389_v7  ;;  %v4152_v7 = vld [vmem:[%s5488_s0 + $0x1d0] ss:$8 sps:$4 sm:$0xff]  }
  0x31   :  { %3638 = vmatprep.subr.bf16.mxu0 %v4396_v8  ;;  %3750 = vmatprep.subr.bf16.mxu1 %v4396_v8  ;;  %v4153_v8 = vld [vmem:[%s5488_s0 + $0xe4] ss:$8 sps:$4 sm:$0xff]  }
  0x32   :  { %432 = vmatmul.mubr.bf16.gmra.mrb[8].mxu0 %v4085_v26  ;;  %818 = vmatmul.mubr.bf16.gmra.mrb[8].mxu1 %v4086_v27  ;;  %v4181_v26 = vld [vmem:[%s5488_s0 + $0x220] ss:$8 sps:$4 sm:$0xff]  }
  0x33   :  { %3052 = vmatprep.mubr.msk.bf16.mxu0 %vm330_vm0, %v4087_v28  ;;  %3132 = vmatprep.mubr.msk.bf16.mxu1 %vm330_vm0, %v4089_v29  ;;  %v4182_v27 = vld [vmem:[%s5488_s0 + $0x320] ss:$8 sps:$4 sm:$0xff]   ;;  %v4183_v28 = vld [vmem:[%s5488_s0 + $0x234] ss:$8 sps:$4 sm:$0xff]  }
  0x34   :  { %3639 = vmatpush3.bf16.msra.mxu0 %v4403_v9  ;;  %3751 = vmatpush3.bf16.msra.mxu1 %v4403_v9  ;;  %v4155_v9 = vld [vmem:[%s5488_s0 + $0x1e4] ss:$8 sps:$4 sm:$0xff]   ;;  %v4185_v29 = vld [vmem:[%s5488_s0 + $0x334] ss:$8 sps:$4 sm:$0xff]  }
  0x35   :  { %3640 = vmatprep.subr.bf16.mxu0 %v4410_v10  ;;  %3752 = vmatprep.subr.bf16.mxu1 %v4410_v10  ;;  %v4157_v10 = vld [vmem:[%s5488_s0 + $0xe0] ss:$8 sps:$4 sm:$0xff]  }
  0x38   :  { %3641 = vmatpush3.bf16.msra.mxu0 %v4423_v13  ;;  %3753 = vmatpush3.bf16.msra.mxu1 %v4423_v13  ;;  %v4161_v13 = vld [vmem:[%s5488_s0 + $0x1f4] ss:$8 sps:$4 sm:$0xff]  }
  0x39   :  { %3642 = vmatprep.subr.bf16.mxu0 %v4430_v14  ;;  %3754 = vmatprep.subr.bf16.mxu1 %v4430_v14  ;;  %v4163_v14 = vld [vmem:[%s5488_s0 + $0xf0] ss:$8 sps:$4 sm:$0xff]  }
  0x3a   :  { %440 = vmatmul.mubr.bf16.gmra.mrb[12].mxu0 %v4091_v30  ;;  %826 = vmatmul.mubr.bf16.gmra.mrb[12].mxu1 %v4092_v31  ;;  %v4187_v30 = vld [vmem:[%s5488_s0 + $0x230] ss:$8 sps:$4 sm:$0xff]  }
  0x3b   :  { %3053 = vmatprep.mubr.msk.bf16.mxu0 %vm330_vm0, %v4093_v32  ;;  %3133 = vmatprep.mubr.msk.bf16.mxu1 %vm330_vm0, %v4095_v33  ;;  %v4188_v31 = vld [vmem:[%s5488_s0 + $0x330] ss:$8 sps:$4 sm:$0xff]   ;;  %v4189_v32 = vld [vmem:[%s5488_s0 + $0x244] ss:$8 sps:$4 sm:$0xff]  }
  0x3c   :  { %3643 = vmatpush3.bf16.msra.mxu0 %v4439_v15  ;;  %3755 = vmatpush3.bf16.msra.mxu1 %v4439_v15  ;;  %v4164_v15 = vld [vmem:[%s5488_s0 + $0x1f0] ss:$8 sps:$4 sm:$0xff]   ;;  %v4191_v33 = vld [vmem:[%s5488_s0 + $0x344] ss:$8 sps:$4 sm:$0xff]  }
  0x3d   :  { %4049 = vmatprep.subr.msk.bf16.mxu0 %vm379_vm1, %v4446_v16  ;;  %4050 = vmatprep.subr.msk.bf16.mxu1 %vm379_vm1, %v4446_v16  ;;  %v4167_v16 = vld [vmem:[%s5488_s0 + $0x204] ss:$8 sps:$4 sm:$0xff]  }
  0x40   :  { %3645 = vmatpush3.bf16.msra.mxu0 %v4453_v17  ;;  %3757 = vmatpush3.bf16.msra.mxu1 %v4453_v17  ;;  %v4170_v17 = vld [vmem:[%s5488_s0 + $0x304] ss:$8 sps:$4 sm:$0xff]  }
  0x42   :  { %448 = vmatmul.mubr.bf16.gmra.mrb[16].mxu0 %v4097_v34  ;;  %834 = vmatmul.mubr.bf16.gmra.mrb[16].mxu1 %v4098_v35  ;;  %v4193_v34 = vld [vmem:[%s5488_s0 + $0x240] ss:$8 sps:$4 sm:$0xff]  }
  0x43   :  { %3054 = vmatprep.mubr.msk.bf16.mxu0 %vm330_vm0, %v4099_v36  ;;  %3134 = vmatprep.mubr.msk.bf16.mxu1 %vm330_vm0, %v4101_v37  ;;  %v4194_v35 = vld [vmem:[%s5488_s0 + $0x340] ss:$8 sps:$4 sm:$0xff]   ;;  %v5495_v36 = vmov 0.0   ;;  %v4195_v37 = vld [vmem:[%s5488_s0 + $0x254] ss:$8 sps:$4 sm:$0xff]  }
  0x44   :  { %3907 = vmatprep.subr.bf16.mxu1 %v5495_v36  ;;  %3923 = vmatprep.subr.bf16.mxu0 %v5495_v36 }
  0x4a   :  { %456 = vmatmul.mubr.bf16.gmra.mrb[20].mxu0 %v4103_v38  ;;  %842 = vmatmul.mubr.bf16.gmra.mrb[20].mxu1 %v4104_v39  ;;  %v4197_v38 = vld [vmem:[%s5488_s0 + $0x354] ss:$8 sps:$4 sm:$0xff]   ;;  %v4261_v39 = vld [vmem:[%s5489_s3 + $0xc] sm:$0xff]  }
  0x4b   :  { %3055 = vmatprep.mubr.msk.bf16.mxu0 %vm330_vm0, %v4105_v40  ;;  %3135 = vmatprep.mubr.msk.bf16.mxu1 %vm330_vm0, %v4107_v41  ;;  %v4199_v40 = vld [vmem:[%s5488_s0 + $0x250] ss:$8 sps:$4 sm:$0xff]  }
  0x4c   :  { %v4200_v41 = vld [vmem:[%s5488_s0 + $0x350] ss:$8 sps:$4 sm:$0xff]  }
  0x52   :  { %464 = vmatmul.mubr.bf16.gmra.mrb[24].mxu0 %v4109_v42  ;;  %850 = vmatmul.mubr.bf16.gmra.mrb[24].mxu1 %v4110_v43  ;;  %v4201_v42 = vld [vmem:[%s5488_s0 + $0x264] ss:$8 sps:$4 sm:$0xff]  }
  0x53   :  { %3056 = vmatprep.mubr.msk.bf16.mxu0 %vm330_vm0, %v4111_v44  ;;  %3136 = vmatprep.mubr.msk.bf16.mxu1 %vm330_vm0, %v4113_v45  ;;  %v4203_v43 = vld [vmem:[%s5488_s0 + $0x364] ss:$8 sps:$4 sm:$0xff]   ;;  %v4262_v44 = vld [vmem:[%s5489_s3 + $0x18] sm:$0xff]   ;;  %v4205_v45 = vld [vmem:[%s5488_s0 + $0x260] ss:$8 sps:$4 sm:$0xff]  }
  0x5a   :  { %472 = vmatmul.mubr.bf16.gmra.mrb[28].mxu0 %v4115_v46  ;;  %858 = vmatmul.mubr.bf16.gmra.mrb[28].mxu1 %v4116_v47  ;;  %v4206_v46 = vld [vmem:[%s5488_s0 + $0x360] ss:$8 sps:$4 sm:$0xff]   ;;  %v4207_v47 = vld [vmem:[%s5488_s0 + $0x274] ss:$8 sps:$4 sm:$0xff]  }
  0x5b   :  { %3057 = vmatprep.mubr.msk.bf16.mxu0 %vm330_vm0, %v4117_v48  ;;  %3137 = vmatprep.mubr.msk.bf16.mxu1 %vm330_vm0, %v4119_v49  ;;  %v4209_v48 = vld [vmem:[%s5488_s0 + $0x374] ss:$8 sps:$4 sm:$0xff]   ;;  %v4211_v49 = vld [vmem:[%s5488_s0 + $0x270] ss:$8 sps:$4 sm:$0xff]  }
  0x62   :  { %480 = vmatmul.mubr.bf16.gmra.mrb[32].mxu0 %v4121_v50  ;;  %866 = vmatmul.mubr.bf16.gmra.mrb[32].mxu1 %v4122_v51  ;;  %v4212_v50 = vld [vmem:[%s5488_s0 + $0x370] ss:$8 sps:$4 sm:$0xff]   ;;  %v4213_v51 = vld [vmem:[%s5488_s0 + $0x284] ss:$8 sps:$4 sm:$0xff]  }
  0x63   :  { %3058 = vmatprep.mubr.msk.bf16.mxu0 %vm330_vm0, %v4123_v52  ;;  %3138 = vmatprep.mubr.msk.bf16.mxu1 %vm330_vm0, %v4125_v53  ;;  %v4215_v52 = vld [vmem:[%s5488_s0 + $0x384] ss:$8 sps:$4 sm:$0xff]   ;;  %v4217_v53 = vld [vmem:[%s5488_s0 + $0x280] ss:$8 sps:$4 sm:$0xff]  }
  0x6a   :  { %488 = vmatmul.mubr.bf16.gmra.mrb[36].mxu0 %v4127_v54  ;;  %874 = vmatmul.mubr.bf16.gmra.mrb[36].mxu1 %v4128_v55  ;;  %v4218_v54 = vld [vmem:[%s5488_s0 + $0x380] ss:$8 sps:$4 sm:$0xff]   ;;  %v4219_v55 = vld [vmem:[%s5488_s0 + $0x294] ss:$8 sps:$4 sm:$0xff]  }
  0x6b   :  { %3059 = vmatprep.mubr.msk.bf16.mxu0 %vm330_vm0, %v4129_v56  ;;  %3139 = vmatprep.mubr.msk.bf16.mxu1 %vm330_vm0, %v4131_v57  ;;  %v4221_v56 = vld [vmem:[%s5488_s0 + $0x394] ss:$8 sps:$4 sm:$0xff]   ;;  %v4223_v57 = vld [vmem:[%s5488_s0 + $0x290] ss:$8 sps:$4 sm:$0xff]  }
  0x72   :  { %496 = vmatmul.mubr.bf16.gmra.mrb[40].mxu0 %v4133_v58  ;;  %882 = vmatmul.mubr.bf16.gmra.mrb[40].mxu1 %v4134_v59  ;;  %v4224_v58 = vld [vmem:[%s5488_s0 + $0x390] ss:$8 sps:$4 sm:$0xff]   ;;  %v4225_v59 = vld [vmem:[%s5488_s0 + $0x2a4] ss:$8 sps:$4 sm:$0xff]  }
  0x73   :  { %3060 = vmatprep.mubr.msk.bf16.mxu0 %vm330_vm0, %v4135_v60  ;;  %3140 = vmatprep.mubr.msk.bf16.mxu1 %vm330_vm0, %v4137_v61  ;;  %v4227_v60 = vld [vmem:[%s5488_s0 + $0x3a4] ss:$8 sps:$4 sm:$0xff]   ;;  %v4229_v61 = vld [vmem:[%s5488_s0 + $0x2a0] ss:$8 sps:$4 sm:$0xff]  }
  0x7a   :  { %504 = vmatmul.mubr.bf16.gmra.mrb[44].mxu0 %v4139_v62  ;;  %890 = vmatmul.mubr.bf16.gmra.mrb[44].mxu1 %v4140_v63  ;;  %v4230_v62 = vld [vmem:[%s5488_s0 + $0x3a0] ss:$8 sps:$4 sm:$0xff]   ;;  %v4231_v63 = vld [vmem:[%s5488_s0 + $0x2b4] ss:$8 sps:$4 sm:$0xff]  }
  0x7b   :  { %3061 = vmatprep.mubr.msk.bf16.mxu0 %vm330_vm0, %v4141_v0  ;;  %3141 = vmatprep.mubr.msk.bf16.mxu1 %vm330_vm0, %v4143_v1  ;;  %v4233_v0 = vld [vmem:[%s5488_s0 + $0x3b4] ss:$8 sps:$4 sm:$0xff]  }
  0x82   :  { %512 = vmatmul.mubr.bf16.gmra.mrb[48].mxu0 %v4145_v2  ;;  %898 = vmatmul.mubr.bf16.gmra.mrb[48].mxu1 %v4146_v3 }
  0x83   :  { %3062 = vmatprep.mubr.msk.bf16.mxu0 %vm330_vm0, %v4147_v4  ;;  %3142 = vmatprep.mubr.msk.bf16.mxu1 %vm330_vm0, %v4149_v5  ;;  %v4235_v5 = vld [vmem:[%s5488_s0 + $0x2b0] ss:$8 sps:$4 sm:$0xff]  }
  0x8a   :  { %520 = vmatmul.mubr.bf16.gmra.mrb[52].mxu0 %v4151_v6  ;;  %906 = vmatmul.mubr.bf16.gmra.mrb[52].mxu1 %v4152_v7  ;;  %v4236_v6 = vld [vmem:[%s5488_s0 + $0x3b0] ss:$8 sps:$4 sm:$0xff]  }
  0x8b   :  { %3063 = vmatprep.mubr.msk.bf16.mxu0 %vm330_vm0, %v4153_v8  ;;  %3143 = vmatprep.mubr.msk.bf16.mxu1 %vm330_vm0, %v4155_v9 }
  0x92   :  { %528 = vmatmul.mubr.bf16.gmra.mrb[56].mxu0 %v4157_v10  ;;  %914 = vmatmul.mubr.bf16.gmra.mrb[56].mxu1 %v4158_v11  ;;  %v4237_v11 = vld [vmem:[%s5488_s0 + $0x2c4] ss:$8 sps:$4 sm:$0xff]  }
  0x93   :  { %3064 = vmatprep.mubr.msk.bf16.mxu0 %vm330_vm0, %v4159_v12  ;;  %3144 = vmatprep.mubr.msk.bf16.mxu1 %vm330_vm0, %v4161_v13  ;;  %v4239_v12 = vld [vmem:[%s5488_s0 + $0x3c4] ss:$8 sps:$4 sm:$0xff]  }
  0x9a   :  { %536 = vmatmul.mubr.bf16.gmra.mrb[60].mxu0 %v4163_v14  ;;  %922 = vmatmul.mubr.bf16.gmra.mrb[60].mxu1 %v4164_v15 }
  0x9b   :  { %3209 = vmatprep.mubr.msk.bf16.mxu0 %vm330_vm0, %v4167_v16  ;;  %3289 = vmatprep.mubr.msk.bf16.mxu1 %vm330_vm0, %v4170_v17 }
  0xa2   :  { %1220 = vmatmul.mubr.bf16.vlgmr.msra.gmra.mrb[64].mxu0 %v4165_v18  ;;  %1638 = vmatmul.mubr.bf16.vlgmr.msra.gmra.mrb[64].mxu1 %v4168_v19 }
  0xa3   :  { %3210 = vmatprep.mubr.msk.bf16.mxu0 %vm330_vm0, %v4171_v20  ;;  %3290 = vmatprep.mubr.msk.bf16.mxu1 %vm330_vm0, %v4173_v21 }
  0xa4   :  { %3908 = vmatpush3.bf16.msra.mxu1 %v4261_v39  ;;  %3924 = vmatpush3.bf16.msra.mxu0 %v4262_v44  ;;  %v4249_v44 = vld [vmem:[%s5488_s0 + $0x2e4] ss:$8 sps:$4 sm:$0xff]  }
  0xa5   :  { %3909 = vmatprep.subr.bf16.mxu1 %v5495_v36  ;;  %3925 = vmatprep.subr.bf16.mxu0 %v5495_v36 }
  0xaa   :  { %1228 = vmatmul.mubr.bf16.gmra.mrb[68].mxu0 %v4175_v22  ;;  %1646 = vmatmul.mubr.bf16.gmra.mrb[68].mxu1 %v4176_v23  ;;  %v4241_v23 = vld [vmem:[%s5488_s0 + $0x2c0] ss:$8 sps:$4 sm:$0xff]  }
  0xab   :  { %3211 = vmatprep.mubr.msk.bf16.mxu0 %vm330_vm0, %v4177_v24  ;;  %3291 = vmatprep.mubr.msk.bf16.mxu1 %vm330_vm0, %v4179_v25  ;;  %v4242_v24 = vld [vmem:[%s5488_s0 + $0x3c0] ss:$8 sps:$4 sm:$0xff]  }
  0xb2   :  { %1236 = vmatmul.mubr.bf16.gmra.mrb[72].mxu0 %v4181_v26  ;;  %1654 = vmatmul.mubr.bf16.gmra.mrb[72].mxu1 %v4182_v27 }
  0xb3   :  { %3212 = vmatprep.mubr.msk.bf16.mxu0 %vm330_vm0, %v4183_v28  ;;  %3292 = vmatprep.mubr.msk.bf16.mxu1 %vm330_vm0, %v4185_v29  ;;  %v4243_v29 = vld [vmem:[%s5488_s0 + $0x2d4] ss:$8 sps:$4 sm:$0xff]  }
  0xba   :  { %1244 = vmatmul.mubr.bf16.gmra.mrb[76].mxu0 %v4187_v30  ;;  %1662 = vmatmul.mubr.bf16.gmra.mrb[76].mxu1 %v4188_v31  ;;  %v4245_v30 = vld [vmem:[%s5488_s0 + $0x3d4] ss:$8 sps:$4 sm:$0xff]  }
  0xbb   :  { %3213 = vmatprep.mubr.msk.bf16.mxu0 %vm330_vm0, %v4189_v32  ;;  %3293 = vmatprep.mubr.msk.bf16.mxu1 %vm330_vm0, %v4191_v33 }
  0xc2   :  { %1252 = vmatmul.mubr.bf16.gmra.mrb[80].mxu0 %v4193_v34  ;;  %1670 = vmatmul.mubr.bf16.gmra.mrb[80].mxu1 %v4194_v35 }
  0xc3   :  { %3214 = vmatprep.mubr.msk.bf16.mxu0 %vm330_vm0, %v4195_v37  ;;  %3294 = vmatprep.mubr.msk.bf16.mxu1 %vm330_vm0, %v4197_v38 }
  0xca   :  { %1260 = vmatmul.mubr.bf16.gmra.mrb[84].mxu0 %v4199_v40  ;;  %1678 = vmatmul.mubr.bf16.gmra.mrb[84].mxu1 %v4200_v41  ;;  %v4247_v40 = vld [vmem:[%s5488_s0 + $0x2d0] ss:$8 sps:$4 sm:$0xff]  }
  0xcb   :  { %3215 = vmatprep.mubr.msk.bf16.mxu0 %vm330_vm0, %v4201_v42  ;;  %3295 = vmatprep.mubr.msk.bf16.mxu1 %vm330_vm0, %v4203_v43  ;;  %v4248_v41 = vld [vmem:[%s5488_s0 + $0x3d0] ss:$8 sps:$4 sm:$0xff]  }
  0xd2   :  { %1268 = vmatmul.mubr.bf16.gmra.mrb[88].mxu0 %v4205_v45  ;;  %1686 = vmatmul.mubr.bf16.gmra.mrb[88].mxu1 %v4206_v46  ;;  %v4251_v45 = vld [vmem:[%s5488_s0 + $0x3e4] ss:$8 sps:$4 sm:$0xff]  }
  0xd3   :  { %3216 = vmatprep.mubr.msk.bf16.mxu0 %vm330_vm0, %v4207_v47  ;;  %3296 = vmatprep.mubr.msk.bf16.mxu1 %vm330_vm0, %v4209_v48 }
  0xda   :  { %1276 = vmatmul.mubr.bf16.gmra.mrb[92].mxu0 %v4211_v49  ;;  %1694 = vmatmul.mubr.bf16.gmra.mrb[92].mxu1 %v4212_v50  ;;  %v4263_v50 = vld [vmem:[%s5489_s3 + $0x14] ss:$0 sps:$4 sm:$0x33]  }
  0xdb   :  { %3217 = vmatprep.mubr.msk.bf16.mxu0 %vm330_vm0, %v4213_v51  ;;  %3297 = vmatprep.mubr.msk.bf16.mxu1 %vm330_vm0, %v4215_v52 }
  0xe2   :  { %1284 = vmatmul.mubr.bf16.gmra.mrb[96].mxu0 %v4217_v53  ;;  %1702 = vmatmul.mubr.bf16.gmra.mrb[96].mxu1 %v4218_v54 }
  0xe3   :  { %3218 = vmatprep.mubr.msk.bf16.mxu0 %vm330_vm0, %v4219_v55  ;;  %3298 = vmatprep.mubr.msk.bf16.mxu1 %vm330_vm0, %v4221_v56  ;;  %v1907_v56 = vsel %vm1905_vm2, %v4263_v50, 0 }
  0xe4   :  { %3910 = vmatpush3.bf16.msra.mxu1 %v1907_v56 }
  0xe5   :  { %3915 = vmatprep.subr.bf16.mxu1 %v5495_v36 }
  0xea   :  { %1292 = vmatmul.mubr.bf16.gmra.mrb[100].mxu0 %v4223_v57  ;;  %1710 = vmatmul.mubr.bf16.gmra.mrb[100].mxu1 %v4224_v58 }
  0xeb   :  { %3219 = vmatprep.mubr.msk.bf16.mxu0 %vm330_vm0, %v4225_v59  ;;  %3299 = vmatprep.mubr.msk.bf16.mxu1 %vm330_vm0, %v4227_v60  ;;  %v4253_v60 = vld [vmem:[%s5488_s0 + $0x2e0] ss:$8 sps:$4 sm:$0xff]  }
  0xf2   :  { %1300 = vmatmul.mubr.bf16.gmra.mrb[104].mxu0 %v4229_v61  ;;  %1718 = vmatmul.mubr.bf16.gmra.mrb[104].mxu1 %v4230_v62  ;;  %v4254_v61 = vld [vmem:[%s5488_s0 + $0x3e0] ss:$8 sps:$4 sm:$0xff]  }
  0xf3   :  { %3220 = vmatprep.mubr.msk.bf16.mxu0 %vm330_vm0, %v4231_v63  ;;  %3300 = vmatprep.mubr.msk.bf16.mxu1 %vm330_vm0, %v4233_v0  ;;  %v4255_v0 = vld [vmem:[%s5488_s0 + $0x2f4] ss:$8 sps:$4 sm:$0xff]  }
  0xf5   :  { %v3422_v1 = vpop.f32.mrb[0].mxu0  ;;  %v3534_v2 = vpop.f32.mrb[0].mxu1 }
  0xf6   :  { %v3423_v3 = vpop.f32.mrb[1].mxu0  ;;  %v3535_v4 = vpop.f32.mrb[1].mxu1 }
  0xf7   :  { %v4885_v7 = vadd.f32 %v3423_v3, %v3422_v1  ;;  %v4887_v8 = vadd.f32 %v3535_v4, %v3534_v2  ;;  %v3425_v9 = vpop.f32.mrb[2].mxu0  ;;  %v3537_v10 = vpop.f32.mrb[2].mxu1  ;;  %v4257_v1 = vld [vmem:[%s5488_s0 + $0x3f4] ss:$8 sps:$4 sm:$0xff]  }
  0xf8   :  { %v3426_v13 = vpop.f32.mrb[3].mxu0  ;;  %v3538_v14 = vpop.f32.mrb[3].mxu1 }
  0xf9   :  { %v4897_v16 = vadd.f32 %v3426_v13, %v3425_v9  ;;  %v4899_v17 = vadd.f32 %v3538_v14, %v3537_v10 }
  0xfa   :  { %1308 = vmatmul.mubr.bf16.gmra.mrb[108].mxu0 %v4235_v5  ;;  %1726 = vmatmul.mubr.bf16.gmra.mrb[108].mxu1 %v4236_v6  ;;  %v4264_v6 = vld [vmem:[%s5489_s3 + $0x20] ss:$0 sps:$4 sm:$0x33]  }
  0xfb   :  { %3221 = vmatprep.mubr.msk.bf16.mxu0 %vm330_vm0, %v4237_v11  ;;  %3301 = vmatprep.mubr.msk.bf16.mxu1 %vm330_vm0, %v4239_v12  ;;  %v2023_v14 = vsel %vm1905_vm2, %v4264_v6, 0 }
  0xfc   :  { %3926 = vmatpush3.bf16.msra.mxu0 %v2023_v14 }
  0xfd   :  { %v3428_v19 = vpop.f32.mrb[4].mxu0  ;;  %v3540_v20 = vpop.f32.mrb[4].mxu1  ;;  %3939 = vmatprep.subr.bf16.mxu0 %v5495_v36 }
  0xfe   :  { %v3429_v21 = vpop.f32.mrb[5].mxu0  ;;  %v3541_v22 = vpop.f32.mrb[5].mxu1 }
  0xff   :  { %v4911_v25 = vadd.f32 %v3429_v21, %v3428_v19  ;;  %v4913_v26 = vadd.f32 %v3541_v22, %v3540_v20  ;;  %v3431_v27 = vpop.f32.mrb[6].mxu0  ;;  %v3543_v28 = vpop.f32.mrb[6].mxu1 }
 0x100   :  { %v3432_v31 = vpop.f32.mrb[7].mxu0  ;;  %v3544_v32 = vpop.f32.mrb[7].mxu1 }
 0x101   :  { %v4923_v34 = vadd.f32 %v3432_v31, %v3431_v27  ;;  %v4925_v35 = vadd.f32 %v3544_v32, %v3543_v28  ;;  %v4260_v27 = vld [vmem:[%s5488_s0 + $0x3f0] ss:$8 sps:$4 sm:$0xff]  }
 0x102   :  { %1316 = vmatmul.mubr.bf16.gmra.mrb[112].mxu0 %v4241_v23  ;;  %1734 = vmatmul.mubr.bf16.gmra.mrb[112].mxu1 %v4242_v24  ;;  %v4259_v24 = vld [vmem:[%s5488_s0 + $0x2f0] ss:$8 sps:$4 sm:$0xff]  }
 0x103   :  { %3222 = vmatprep.mubr.msk.bf16.mxu0 %vm330_vm0, %v4243_v29  ;;  %3302 = vmatprep.mubr.msk.bf16.mxu1 %vm330_vm0, %v4245_v30 }
 0x105   :  { %v3434_v38 = vpop.f32.mrb[8].mxu0  ;;  %v3546_v39 = vpop.f32.mrb[8].mxu1 }
 0x106   :  { %v3435_v42 = vpop.f32.mrb[9].mxu0  ;;  %v3547_v43 = vpop.f32.mrb[9].mxu1 }
 0x107   :  { %v4943_v46 = vadd.f32 %v3435_v42, %v3434_v38  ;;  %v4945_v47 = vadd.f32 %v3547_v43, %v3546_v39  ;;  %v3437_v48 = vpop.f32.mrb[10].mxu0  ;;  %v3549_v49 = vpop.f32.mrb[10].mxu1 }
 0x108   :  { %v3438_v51 = vpop.f32.mrb[11].mxu0  ;;  %v3550_v52 = vpop.f32.mrb[11].mxu1 }
 0x109   :  { %v4952_v54 = vadd.f32 %v3438_v51, %v3437_v48  ;;  %v4954_v55 = vadd.f32 %v3550_v52, %v3549_v49 }
 0x10a   :  { %1324 = vmatmul.mubr.bf16.gmra.mrb[116].mxu0 %v4247_v40  ;;  %1742 = vmatmul.mubr.bf16.gmra.mrb[116].mxu1 %v4248_v41 }
 0x10b   :  { %3223 = vmatprep.mubr.msk.bf16.mxu0 %vm330_vm0, %v4249_v44  ;;  %3303 = vmatprep.mubr.msk.bf16.mxu1 %vm330_vm0, %v4251_v45 }
 0x10d   :  { %v3440_v58 = vpop.f32.mrb[12].mxu0  ;;  %v3552_v59 = vpop.f32.mrb[12].mxu1 }
 0x10e   :  { %v3441_v62 = vpop.f32.mrb[13].mxu0  ;;  %v3553_v63 = vpop.f32.mrb[13].mxu1 }
 0x10f   :  { %v4974_v2 = vadd.f32 %v3441_v62, %v3440_v58  ;;  %v4976_v3 = vadd.f32 %v3553_v63, %v3552_v59  ;;  %v3443_v4 = vpop.f32.mrb[14].mxu0  ;;  %v3555_v5 = vpop.f32.mrb[14].mxu1 }
 0x110   :  { %v3444_v9 = vpop.f32.mrb[15].mxu0  ;;  %v3556_v10 = vpop.f32.mrb[15].mxu1 }
 0x111   :  { %v4983_v12 = vadd.f32 %v3444_v9, %v3443_v4  ;;  %v4985_v13 = vadd.f32 %v3556_v10, %v3555_v5 }
 0x112   :  { %1332 = vmatmul.mubr.bf16.gmra.mrb[120].mxu0 %v4253_v60  ;;  %1750 = vmatmul.mubr.bf16.gmra.mrb[120].mxu1 %v4254_v61 }
 0x113   :  { %3224 = vmatprep.mubr.msk.bf16.mxu0 %vm330_vm0, %v4255_v0  ;;  %3304 = vmatprep.mubr.msk.bf16.mxu1 %vm330_vm0, %v4257_v1 }
 0x115   :  { %v3446_v20 = vpop.f32.mrb[16].mxu0  ;;  %v3558_v21 = vpop.f32.mrb[16].mxu1 }
 0x116   :  { %v3447_v22 = vpop.f32.mrb[17].mxu0  ;;  %v3559_v23 = vpop.f32.mrb[17].mxu1 }
 0x117   :  { %v4999_v28 = vadd.f32 %v3447_v22, %v3446_v20  ;;  %v5001_v29 = vadd.f32 %v3559_v23, %v3558_v21  ;;  %v3449_v30 = vpop.f32.mrb[18].mxu0  ;;  %v3561_v31 = vpop.f32.mrb[18].mxu1 }
 0x118   :  { %v3450_v32 = vpop.f32.mrb[19].mxu0  ;;  %v3562_v38 = vpop.f32.mrb[19].mxu1 }
 0x119   :  { %v5005_v40 = vadd.f32 %v3450_v32, %v3449_v30  ;;  %v5007_v41 = vadd.f32 %v3562_v38, %v3561_v31 }
 0x11a   :  { %1340 = vmatmul.mubr.bf16.gmra.mrb[124].mxu0 %v4259_v24  ;;  %1758 = vmatmul.mubr.bf16.gmra.mrb[124].mxu1 %v4260_v27 }
 0x11b   :  { %3911 = vmatprep.mubr.msk.bf16.mxu1 %vm4306_vm3, %v5495_v36  ;;  %3927 = vmatprep.mubr.msk.bf16.mxu0 %vm4306_vm3, %v5495_v36 }
 0x11d   :  { %v3452_v43 = vpop.f32.mrb[20].mxu0  ;;  %v3564_v44 = vpop.f32.mrb[20].mxu1 }
 0x11e   :  { %v3453_v45 = vpop.f32.mrb[21].mxu0  ;;  %v3565_v48 = vpop.f32.mrb[21].mxu1 }
 0x11f   :  { %v5015_v49 = vadd.f32 %v3453_v45, %v3452_v43  ;;  %v5017_v50 = vadd.f32 %v3565_v48, %v3564_v44  ;;  %v3455_v51 = vpop.f32.mrb[22].mxu0  ;;  %v3567_v52 = vpop.f32.mrb[22].mxu1 }
 0x120   :  { %v3456_v56 = vpop.f32.mrb[23].mxu0  ;;  %v3568_v58 = vpop.f32.mrb[23].mxu1 }
 0x121   :  { %v5021_v60 = vadd.f32 %v3456_v56, %v3455_v51  ;;  %v5023_v61 = vadd.f32 %v3568_v58, %v3567_v52 }
 0x125   :  { %v3458_v63 = vpop.f32.mrb[24].mxu0  ;;  %v3570_v0 = vpop.f32.mrb[24].mxu1 }
 0x126   :  { %v3459_v1 = vpop.f32.mrb[25].mxu0  ;;  %v3571_v4 = vpop.f32.mrb[25].mxu1 }
 0x127   :  { %v5027_v5 = vadd.f32 %v3459_v1, %v3458_v63  ;;  %v5029_v6 = vadd.f32 %v3571_v4, %v3570_v0  ;;  %v3461_v9 = vpop.f32.mrb[26].mxu0  ;;  %v3573_v10 = vpop.f32.mrb[26].mxu1 }
 0x128   :  { %v3462_v14 = vpop.f32.mrb[27].mxu0  ;;  %v3574_v20 = vpop.f32.mrb[27].mxu1 }
 0x129   :  { %v5033_v22 = vadd.f32 %v3462_v14, %v3461_v9  ;;  %v5035_v23 = vadd.f32 %v3574_v20, %v3573_v10 }
 0x12d   :  { %v3464_v27 = vpop.f32.mrb[28].mxu0  ;;  %v3576_v30 = vpop.f32.mrb[28].mxu1 }
 0x12e   :  { %v3465_v31 = vpop.f32.mrb[29].mxu0  ;;  %v3577_v32 = vpop.f32.mrb[29].mxu1 }
 0x12f   :  { %v5039_v38 = vadd.f32 %v3465_v31, %v3464_v27  ;;  %v5041_v43 = vadd.f32 %v3577_v32, %v3576_v30  ;;  %v3467_v44 = vpop.f32.mrb[30].mxu0  ;;  %v3579_v45 = vpop.f32.mrb[30].mxu1 }
 0x130   :  { %v3468_v48 = vpop.f32.mrb[31].mxu0  ;;  %v3580_v51 = vpop.f32.mrb[31].mxu1 }
 0x131   :  { %v5045_v56 = vadd.f32 %v3468_v48, %v3467_v44  ;;  %v5047_v58 = vadd.f32 %v3580_v51, %v3579_v45 }
 0x135   :  { %v3470_v0 = vpop.f32.mrb[32].mxu0  ;;  %v3582_v1 = vpop.f32.mrb[32].mxu1 }
 0x136   :  { %v3471_v4 = vpop.f32.mrb[33].mxu0  ;;  %v3583_v9 = vpop.f32.mrb[33].mxu1 }
 0x137   :  { %v5051_v10 = vadd.f32 %v3471_v4, %v3470_v0  ;;  %v5053_v14 = vadd.f32 %v3583_v9, %v3582_v1  ;;  %v3473_v20 = vpop.f32.mrb[34].mxu0  ;;  %v3585_v27 = vpop.f32.mrb[34].mxu1 }
 0x138   :  { %v3474_v30 = vpop.f32.mrb[35].mxu0  ;;  %v3586_v31 = vpop.f32.mrb[35].mxu1 }
 0x139   :  { %v5057_v44 = vadd.f32 %v3474_v30, %v3473_v20  ;;  %v5059_v45 = vadd.f32 %v3586_v31, %v3585_v27 }
 0x13d   :  { %v3476_v51 = vpop.f32.mrb[36].mxu0  ;;  %v3588_v63 = vpop.f32.mrb[36].mxu1 }
 0x13e   :  { %v3477_v0 = vpop.f32.mrb[37].mxu0  ;;  %v3589_v4 = vpop.f32.mrb[37].mxu1 }
 0x13f   :  { %v5063_v1 = vadd.f32 %v3477_v0, %v3476_v51  ;;  %v5065_v9 = vadd.f32 %v3589_v4, %v3588_v63  ;;  %v3479_v52 = vpop.f32.mrb[38].mxu0  ;;  %v3591_v24 = vpop.f32.mrb[38].mxu1 }
 0x140   :  { %v3480_v21 = vpop.f32.mrb[39].mxu0  ;;  %v3592_v62 = vpop.f32.mrb[39].mxu1 }
 0x141   :  { %v5069_v27 = vadd.f32 %v3480_v21, %v3479_v52  ;;  %v5071_v30 = vadd.f32 %v3592_v62, %v3591_v24 }
 0x145   :  { %v3482_v48 = vpop.f32.mrb[40].mxu0  ;;  %v3594_v32 = vpop.f32.mrb[40].mxu1 }
 0x146   :  { %v3483_v51 = vpop.f32.mrb[41].mxu0  ;;  %v3595_v0 = vpop.f32.mrb[41].mxu1 }
 0x147   :  { %v5075_v63 = vadd.f32 %v3483_v51, %v3482_v48  ;;  %v5077_v4 = vadd.f32 %v3595_v0, %v3594_v32  ;;  %v3485_v59 = vpop.f32.mrb[42].mxu0  ;;  %v3597_v42 = vpop.f32.mrb[42].mxu1 }
 0x148   :  { %v3486_v39 = vpop.f32.mrb[43].mxu0  ;;  %v3598_v19 = vpop.f32.mrb[43].mxu1 }
 0x149   :  { %v5081_v62 = vadd.f32 %v3486_v39, %v3485_v59  ;;  %v5083_v24 = vadd.f32 %v3598_v19, %v3597_v42 }
 0x14d   :  { %v3488_v31 = vpop.f32.mrb[44].mxu0  ;;  %v3600_v20 = vpop.f32.mrb[44].mxu1 }
 0x14e   :  { %v3489_v48 = vpop.f32.mrb[45].mxu0  ;;  %v3601_v51 = vpop.f32.mrb[45].mxu1 }
 0x14f   :  { %v5087_v32 = vadd.f32 %v3489_v48, %v3488_v31  ;;  %v5089_v0 = vadd.f32 %v3601_v51, %v3600_v20  ;;  %v3491_v11 = vpop.f32.mrb[46].mxu0  ;;  %v3603_v36 = vpop.f32.mrb[46].mxu1 }
 0x150   :  { %v3492_v57 = vpop.f32.mrb[47].mxu0  ;;  %v3604_v53 = vpop.f32.mrb[47].mxu1 }
 0x151   :  { %5517 = vst [vmem:[#allocation2_spill] sm:$0xff] %v5087_v32  ;;  %5518 = vst [vmem:[#allocation3_spill] sm:$0xff] %v5089_v0  ;;  %v5093_v19 = vadd.f32 %v3492_v57, %v3491_v11  ;;  %v5095_v42 = vadd.f32 %v3604_v53, %v3603_v36 }
 0x153   :  { %5519 = vst [vmem:[#allocation4_spill] sm:$0xff] %v5093_v19  ;;  %5520 = vst [vmem:[#allocation5_spill] sm:$0xff] %v5095_v42 }
 0x155   :  { %v3494_v52 = vpop.f32.mrb[48].mxu0  ;;  %v3606_v21 = vpop.f32.mrb[48].mxu1 }
 0x156   :  { %v3495_v31 = vpop.f32.mrb[49].mxu0  ;;  %v3607_v48 = vpop.f32.mrb[49].mxu1 }
 0x157   :  { %v5099_v20 = vadd.f32 %v3495_v31, %v3494_v52  ;;  %v5101_v51 = vadd.f32 %v3607_v48, %v3606_v21  ;;  %v3497_v37 = vpop.f32.mrb[50].mxu0  ;;  %v3609_v33 = vpop.f32.mrb[50].mxu1 }
 0x158   :  { %v3498_v18 = vpop.f32.mrb[51].mxu0  ;;  %v3610_v15 = vpop.f32.mrb[51].mxu1 }
 0x159   :  { %5521 = vst [vmem:[#allocation6_spill] sm:$0xff] %v5099_v20  ;;  %5522 = vst [vmem:[#allocation7_spill] sm:$0xff] %v5101_v51  ;;  %v5105_v36 = vadd.f32 %v3498_v18, %v3497_v37  ;;  %v5107_v53 = vadd.f32 %v3610_v15, %v3609_v33 }
 0x15b   :  { %5523 = vst [vmem:[#allocation8_spill] sm:$0xff] %v5105_v36  ;;  %5524 = vst [vmem:[#allocation9_spill] sm:$0xff] %v5107_v53 }
 0x15d   :  { %v3500_v59 = vpop.f32.mrb[52].mxu0  ;;  %v3612_v39 = vpop.f32.mrb[52].mxu1 }
 0x15e   :  { %v3501_v52 = vpop.f32.mrb[53].mxu0  ;;  %v3613_v31 = vpop.f32.mrb[53].mxu1 }
 0x15f   :  { %v5111_v21 = vadd.f32 %v3501_v52, %v3500_v59  ;;  %v5113_v48 = vadd.f32 %v3613_v31, %v3612_v39  ;;  %v3503_v42 = vpop.f32.mrb[54].mxu0  ;;  %v3615_v19 = vpop.f32.mrb[54].mxu1 }
 0x160   :  { %v3504_v0 = vpop.f32.mrb[55].mxu0  ;;  %v3616_v32 = vpop.f32.mrb[55].mxu1 }
 0x161   :  { %5525 = vst [vmem:[#allocation10_spill] sm:$0xff] %v5111_v21  ;;  %5526 = vst [vmem:[#allocation11_spill] sm:$0xff] %v5113_v48  ;;  %v5117_v15 = vadd.f32 %v3504_v0, %v3503_v42  ;;  %v5119_v33 = vadd.f32 %v3616_v32, %v3615_v19 }
 0x163   :  { %5527 = vst [vmem:[#allocation12_spill] sm:$0xff] %v5117_v15  ;;  %5528 = vst [vmem:[#allocation13_spill] sm:$0xff] %v5119_v33 }
 0x165   :  { %v3506_v11 = vpop.f32.mrb[56].mxu0  ;;  %v3618_v57 = vpop.f32.mrb[56].mxu1 }
 0x166   :  { %v3507_v59 = vpop.f32.mrb[57].mxu0  ;;  %v3619_v52 = vpop.f32.mrb[57].mxu1 }
 0x167   :  { %v5123_v39 = vadd.f32 %v3507_v59, %v3506_v11  ;;  %v5125_v31 = vadd.f32 %v3619_v52, %v3618_v57  ;;  %v3509_v53 = vpop.f32.mrb[58].mxu0  ;;  %v3621_v36 = vpop.f32.mrb[58].mxu1 }
 0x168   :  { %v3510_v51 = vpop.f32.mrb[59].mxu0  ;;  %v3622_v20 = vpop.f32.mrb[59].mxu1 }
 0x169   :  { %5529 = vst [vmem:[#allocation14_spill] sm:$0xff] %v5123_v39  ;;  %5530 = vst [vmem:[#allocation15_spill] sm:$0xff] %v5125_v31  ;;  %v5129_v32 = vadd.f32 %v3510_v51, %v3509_v53  ;;  %v5131_v19 = vadd.f32 %v3622_v20, %v3621_v36  ;;  %v5537_v51 = vmax.f32 %v4885_v7, %v4887_v8 }
 0x16b   :  { %5531 = vst [vmem:[#allocation16_spill] sm:$0xff] %v5129_v32  ;;  %5532 = vst [vmem:[#allocation17_spill] sm:$0xff] %v5131_v19 }
 0x16d   :  { %v3512_v37 = vpop.f32.mrb[60].mxu0  ;;  %v3624_v18 = vpop.f32.mrb[60].mxu1 }
 0x16e   :  { %v3513_v11 = vpop.f32.mrb[61].mxu0  ;;  %v3625_v59 = vpop.f32.mrb[61].mxu1 }
 0x16f   :  { %v5135_v57 = vadd.f32 %v3513_v11, %v3512_v37  ;;  %v5137_v52 = vadd.f32 %v3625_v59, %v3624_v18  ;;  %v3515_v33 = vpop.f32.mrb[62].mxu0  ;;  %v3627_v15 = vpop.f32.mrb[62].mxu1 }
 0x170   :  { %v3516_v48 = vpop.f32.mrb[63].mxu0  ;;  %v3628_v21 = vpop.f32.mrb[63].mxu1 }
 0x171   :  { %5533 = vst [vmem:[#allocation18_spill] sm:$0xff] %v5135_v57  ;;  %5534 = vst [vmem:[#allocation19_spill] sm:$0xff] %v5137_v52  ;;  %v5141_v20 = vadd.f32 %v3516_v48, %v3515_v33  ;;  %v5143_v36 = vadd.f32 %v3628_v21, %v3627_v15  ;;  %v5153_v15 = vld [vmem:[%s5490_s2] ss:$0 sm:$0xff] }
 0x173   :  { %5535 = vst [vmem:[#allocation20_spill] sm:$0xff] %v5141_v20  ;;  %5536 = vst [vmem:[#allocation21_spill] sm:$0xff] %v5143_v36 }
 0x175   :  { %v3646_v42 = vpop.f32.mrb[64].mxu0  ;;  %v3758_v0 = vpop.f32.mrb[64].mxu1 }
 0x176   :  { %v3647_v37 = vpop.f32.mrb[65].mxu0  ;;  %v3759_v11 = vpop.f32.mrb[65].mxu1 }
 0x177   :  { %v3648_v18 = vadd.f32 %v3647_v37, %v3646_v42  ;;  %v3760_v59 = vadd.f32 %v3759_v11, %v3758_v0  ;;  %v3649_v19 = vpop.f32.mrb[66].mxu0  ;;  %v3761_v32 = vpop.f32.mrb[66].mxu1  ;;  %v5538_v42 = vmax.f32 %v4897_v16, %v4899_v17  ;;  %v5539_v16 = vmax.f32 %v4911_v25, %v4913_v26 }
 0x178   :  { %v3650_v31 = vpop.f32.mrb[67].mxu0  ;;  %v3762_v39 = vpop.f32.mrb[67].mxu1 }
 0x179   :  { %v1348_v48 = vmax.f32 %v5537_v51, %v3648_v18  ;;  %v3651_v33 = vadd.f32 %v3650_v31, %v3649_v19  ;;  %v3763_v21 = vadd.f32 %v3762_v39, %v3761_v32 }
 0x17b   :  { %v1766_v53 = vmax.f32 %v1348_v48, %v3760_v59  ;;  %v1349_v0 = vmax.f32 %v5538_v42, %v3651_v33 }
 0x17d   :  { %v1805_v37 = vadd.f32 %v5153_v15, %v1766_v53  ;;  %v1767_v11 = vmax.f32 %v1349_v0, %v3763_v21  ;;  %v3652_v36 = vpop.f32.mrb[68].mxu0  ;;  %v3764_v20 = vpop.f32.mrb[68].mxu1  ;;  %v5540_v0 = vmax.f32 %v4923_v34, %v4925_v35  ;;  %v5541_v34 = vmax.f32 %v4943_v46, %v4945_v47 }
 0x17e   :  { %v3653_v52 = vpop.f32.mrb[69].mxu0  ;;  %v3765_v7 = vpop.f32.mrb[69].mxu1 }
 0x17f   :  { %v1806_v8 = vadd.f32 %v5153_v15, %v1767_v11  ;;  %v3654_v39 = vadd.f32 %v3653_v52, %v3652_v36  ;;  %v3766_v31 = vadd.f32 %v3765_v7, %v3764_v20  ;;  %v3655_v32 = vpop.f32.mrb[70].mxu0  ;;  %v3767_v19 = vpop.f32.mrb[70].mxu1  ;;  %v1837_v51 = vmax.f32 %v1805_v37, 0.0 }
 0x180   :  { %v3656_v18 = vpop.f32.mrb[71].mxu0  ;;  %v3768_v59 = vpop.f32.mrb[71].mxu1 }
 0x181   :  { %v1838_v48 = vmax.f32 %v1806_v8, 0.0  ;;  %v1350_v17 = vmax.f32 %v5539_v16, %v3654_v39  ;;  %v3657_v53 = vadd.f32 %v3656_v18, %v3655_v32  ;;  %v3769_v33 = vadd.f32 %v3768_v59, %v3767_v19  ;;  %v4265_v16 = vld [vmem:[%s5489_s3] sm:$0xff]  }
 0x183   :  { %v5163_v21 = vpack.c.bf16 %v1838_v48, %v1837_v51  ;;  %v1768_v42 = vmax.f32 %v1350_v17, %v3766_v31  ;;  %v1351_v52 = vmax.f32 %v5540_v0, %v3657_v53 }
 0x185   :  { %v1807_v20 = vadd.f32 %v5153_v15, %v1768_v42  ;;  %v1769_v36 = vmax.f32 %v1351_v52, %v3769_v33  ;;  %v3658_v37 = vpop.f32.mrb[72].mxu0  ;;  %v3770_v11 = vpop.f32.mrb[72].mxu1  ;;  %v5542_v33 = vmax.f32 %v4952_v54, %v4954_v55 }
 0x186   :  { %v3659_v7 = vpop.f32.mrb[73].mxu0  ;;  %v3771_v8 = vpop.f32.mrb[73].mxu1 }
 0x187   :  { %v1808_v57 = vadd.f32 %v5153_v15, %v1769_v36  ;;  %v3660_v25 = vadd.f32 %v3659_v7, %v3658_v37  ;;  %v3772_v26 = vadd.f32 %v3771_v8, %v3770_v11  ;;  %v3661_v39 = vpop.f32.mrb[74].mxu0  ;;  %v3773_v32 = vpop.f32.mrb[74].mxu1  ;;  %v1839_v19 = vmax.f32 %v1807_v20, 0.0 }
 0x188   :  { %v3662_v51 = vpop.f32.mrb[75].mxu0  ;;  %v3774_v31 = vpop.f32.mrb[75].mxu1  ;;  %v5543_v37 = vmov 0.0  }
 0x189   :  { %v1840_v18 = vmax.f32 %v1808_v57, 0.0  ;;  %v1352_v35 = vmax.f32 %v5541_v34, %v3660_v25  ;;  %v3663_v59 = vadd.f32 %v3662_v51, %v3661_v39  ;;  %v3775_v48 = vadd.f32 %v3774_v31, %v3773_v32  ;;  %v4266_v57 = vld [vmem:[%s5489_s3 + $0x8] ss:$0 sps:$4 sm:$0x33]  }
 0x18a   :  { %v1963_v25 = vsel %vm1905_vm2, %v4266_v57, 0  ;;  %v5544_v51 = vmax.f32 %v4974_v2, %v4976_v3  ;;  %v4268_v2 = vld [vmem:[%s5489_s3 + $0x2c] ss:$0 sps:$4 sm:$0x33]   ;;  %v4269_v3 = vld [vmem:[%s5489_s3 + $0x30] sm:$0xff]  }
 0x18b   :  { %v1870_v17 = vpack.c.bf16 %v1840_v18, %v1839_v19  ;;  %v1770_v53 = vmax.f32 %v1352_v35, %v3772_v26  ;;  %v1353_v42 = vmax.f32 %v5542_v33, %v3663_v59  ;;  %v4267_v35 = vld [vmem:[%s5489_s3 + $0x24] sm:$0xff]  }
 0x18d   :  { %v1809_v46 = vadd.f32 %v5153_v15, %v1770_v53  ;;  %v1771_v47 = vmax.f32 %v1353_v42, %v3775_v48  ;;  %v3664_v0 = vpop.f32.mrb[76].mxu0  ;;  %v3776_v52 = vpop.f32.mrb[76].mxu1  ;;  %3912 = vmatmul.mubr.msk.bf16.vlgmr.msra.gmra.mrb[128].mxu1 %vm1901_vm4, %v1870_v17  ;;  %v4270_v53 = vld [vmem:[%s5489_s3 + $0x38] ss:$0 sps:$4 sm:$0x33]  }
 0x18e   :  { %v3665_v20 = vpop.f32.mrb[77].mxu0  ;;  %v3777_v36 = vpop.f32.mrb[77].mxu1  ;;  %3916 = vmatpush3.bf16.msra.mxu1 %v4265_v16  ;;  %3919 = vmatprep.mubr.msk.bf16.mxu1 %vm4306_vm3, %v5543_v37  ;;  %v5545_v16 = vmax.f32 %v4983_v12, %v4985_v13 }
 0x18f   :  { %v1810_v54 = vadd.f32 %v5153_v15, %v1771_v47  ;;  %v3666_v55 = vadd.f32 %v3665_v20, %v3664_v0  ;;  %v3778_v11 = vadd.f32 %v3777_v36, %v3776_v52  ;;  %v3667_v7 = vpop.f32.mrb[78].mxu0  ;;  %v3779_v8 = vpop.f32.mrb[78].mxu1  ;;  %3917 = vmatprep.subr.bf16.mxu1 %v5543_v37  ;;  %v1841_v26 = vmax.f32 %v1809_v46, 0.0 }
 0x190   :  { %v3668_v39 = vpop.f32.mrb[79].mxu0  ;;  %v3780_v32 = vpop.f32.mrb[79].mxu1 }
 0x191   :  { %v1842_v19 = vmax.f32 %v1810_v54, 0.0  ;;  %v1354_v31 = vmax.f32 %v5544_v51, %v3666_v55  ;;  %v3669_v18 = vadd.f32 %v3668_v39, %v3667_v7  ;;  %v3781_v34 = vadd.f32 %v3780_v32, %v3779_v8 }
 0x192   :  { %3918 = vmatpush3.bf16.msra.mxu1 %v1963_v25  ;;  %v2085_v54 = vsel %vm1905_vm2, %v4268_v2, 0  ;;  %v2147_v7 = vsel %vm1905_vm2, %v4270_v53, 0  ;;  %v5546_v25 = vmax.f32 %v4999_v28, %v5001_v29  ;;  %v4272_v28 = vld [vmem:[%s5489_s3 + $0x44] ss:$0 sps:$4 sm:$0x33]  }
 0x193   :  { %v1871_v59 = vpack.c.bf16 %v1842_v19, %v1841_v26  ;;  %v1772_v48 = vmax.f32 %v1354_v31, %v3778_v11  ;;  %v1355_v17 = vmax.f32 %v5545_v16, %v3669_v18  ;;  %3931 = vmatprep.subr.bf16.mxu1 %v5543_v37  ;;  %v4271_v19 = vld [vmem:[%s5489_s3 + $0x3c] sm:$0xff]   ;;  %v5547_v18 = vmax.f32 %v5005_v40, %v5007_v41 }
 0x195   :  { %v1811_v33 = vadd.f32 %v5153_v15, %v1772_v48  ;;  %v1773_v42 = vmax.f32 %v1355_v17, %v3781_v34  ;;  %v3670_v57 = vpop.f32.mrb[80].mxu0  ;;  %v3782_v12 = vpop.f32.mrb[80].mxu1  ;;  %3920 = vmatmul.mubr.msk.bf16.vlgmr.msra.gmra.mrb[132].mxu1 %vm1901_vm4, %v5163_v21  ;;  %3928 = vmatmul.mubr.msk.bf16.vlgmr.msra.gmra.mrb[128].mxu0 %vm1901_vm4, %v1871_v59 }
 0x196   :  { %v3671_v13 = vpop.f32.mrb[81].mxu0  ;;  %v3783_v46 = vpop.f32.mrb[81].mxu1  ;;  %3932 = vmatpush3.bf16.msra.mxu1 %v4267_v35  ;;  %3935 = vmatprep.mubr.msk.bf16.mxu1 %vm4306_vm3, %v5543_v37 }
 0x197   :  { %v1812_v47 = vadd.f32 %v5153_v15, %v1773_v42  ;;  %v3672_v0 = vadd.f32 %v3671_v13, %v3670_v57  ;;  %v3784_v52 = vadd.f32 %v3783_v46, %v3782_v12  ;;  %v3673_v20 = vpop.f32.mrb[82].mxu0  ;;  %v3785_v36 = vpop.f32.mrb[82].mxu1  ;;  %3933 = vmatprep.subr.bf16.mxu1 %v5543_v37  ;;  %3940 = vmatpush3.bf16.msra.mxu0 %v4269_v3  ;;  %v1843_v21 = vmax.f32 %v1811_v33, 0.0 }
 0x198   :  { %v3674_v55 = vpop.f32.mrb[83].mxu0  ;;  %v3786_v11 = vpop.f32.mrb[83].mxu1  ;;  %3941 = vmatprep.subr.bf16.mxu0 %v5543_v37  ;;  %3943 = vmatprep.mubr.msk.bf16.mxu0 %vm4306_vm3, %v5543_v37  ;;  %v2209_v33 = vsel %vm1905_vm2, %v4272_v28, 0  ;;  %v5548_v46 = vmax.f32 %v5015_v49, %v5017_v50 }
 0x199   :  { %v1844_v8 = vmax.f32 %v1812_v47, 0.0  ;;  %v1356_v26 = vmax.f32 %v5546_v25, %v3672_v0  ;;  %v3675_v39 = vadd.f32 %v3674_v55, %v3673_v20  ;;  %v3787_v32 = vadd.f32 %v3786_v11, %v3785_v36  ;;  %v4273_v20 = vld [vmem:[%s5489_s3 + $0x48] sm:$0xff]   ;;  %v4274_v11 = vld [vmem:[%s5489_s3 + $0x50] ss:$0 sps:$4 sm:$0x33]  }
 0x19a   :  { %3934 = vmatpush3.bf16.msra.mxu1 %v2085_v54 }
 0x19b   :  { %v1872_v51 = vpack.c.bf16 %v1844_v8, %v1843_v21  ;;  %v1774_v31 = vmax.f32 %v1356_v26, %v3784_v52  ;;  %v1357_v34 = vmax.f32 %v5547_v18, %v3675_v39  ;;  %3942 = vmatpush3.bf16.msra.mxu0 %v2147_v7  ;;  %3947 = vmatprep.subr.bf16.mxu1 %v5543_v37 }
 0x19c   :  { %3955 = vmatprep.subr.bf16.mxu0 %v5543_v37  ;;  %v5549_v21 = vmax.f32 %v5021_v60, %v5023_v61 }
 0x19d   :  { %v1813_v29 = vadd.f32 %v5153_v15, %v1774_v31  ;;  %v1775_v35 = vmax.f32 %v1357_v34, %v3787_v32  ;;  %v3676_v59 = vpop.f32.mrb[84].mxu0  ;;  %v3788_v48 = vpop.f32.mrb[84].mxu1  ;;  %3936 = vmatmul.mubr.msk.bf16.vlgmr.msra.gmra.mrb[136].mxu1 %vm1901_vm4, %v1872_v51  ;;  %v2271_v51 = vsel %vm1905_vm2, %v4274_v11, 0 }
 0x19e   :  { %v3677_v16 = vpop.f32.mrb[85].mxu0  ;;  %v3789_v17 = vpop.f32.mrb[85].mxu1  ;;  %3948 = vmatpush3.bf16.msra.mxu1 %v4271_v19  ;;  %3951 = vmatprep.mubr.msk.bf16.mxu1 %vm4306_vm3, %v5543_v37 }
 0x19f   :  { %v1814_v40 = vadd.f32 %v5153_v15, %v1775_v35  ;;  %v3678_v41 = vadd.f32 %v3677_v16, %v3676_v59  ;;  %v3790_v2 = vadd.f32 %v3789_v17, %v3788_v48  ;;  %v3679_v3 = vpop.f32.mrb[86].mxu0  ;;  %v3791_v53 = vpop.f32.mrb[86].mxu1  ;;  %3949 = vmatprep.subr.bf16.mxu1 %v5543_v37  ;;  %v1845_v42 = vmax.f32 %v1813_v29, 0.0  ;;  %v4275_v16 = vld [vmem:[%s5489_s3 + $0x54] sm:$0xff]  }
 0x1a0   :  { %v3680_v57 = vpop.f32.mrb[87].mxu0  ;;  %v3792_v12 = vpop.f32.mrb[87].mxu1  ;;  %v5550_v29 = vmax.f32 %v5027_v5, %v5029_v6 }
 0x1a1   :  { %v1846_v13 = vmax.f32 %v1814_v40, 0.0  ;;  %v1358_v47 = vmax.f32 %v5548_v46, %v3678_v41  ;;  %v3681_v0 = vadd.f32 %v3680_v57, %v3679_v3  ;;  %v3793_v52 = vadd.f32 %v3792_v12, %v3791_v53  ;;  %v4276_v3 = vld [vmem:[%s5489_s3 + $0x5c] ss:$0 sps:$4 sm:$0x33]  }
 0x1a2   :  { %3950 = vmatpush3.bf16.msra.mxu1 %v2209_v33  ;;  %v5551_v41 = vmax.f32 %v5033_v22, %v5035_v23 }
 0x1a3   :  { %v1873_v36 = vpack.c.bf16 %v1846_v13, %v1845_v42  ;;  %v1776_v54 = vmax.f32 %v1358_v47, %v3790_v2  ;;  %v1359_v55 = vmax.f32 %v5549_v21, %v3681_v0  ;;  %3963 = vmatprep.subr.bf16.mxu1 %v5543_v37  ;;  %v2333_v47 = vsel %vm1905_vm2, %v4276_v3, 0 }
 0x1a4   :  { %v5555_v3 = vmax.f32 %v5057_v44, %v5059_v45 }
 0x1a5   :  { %v1815_v49 = vadd.f32 %v5153_v15, %v1776_v54  ;;  %v1777_v50 = vmax.f32 %v1359_v55, %v3793_v52  ;;  %v3682_v7 = vpop.f32.mrb[88].mxu0  ;;  %v3794_v8 = vpop.f32.mrb[88].mxu1  ;;  %3944 = vmatmul.mubr.msk.bf16.vlgmr.msra.gmra.mrb[132].mxu0 %vm1901_vm4, %v1873_v36  ;;  %v5552_v54 = vmax.f32 %v5039_v38, %v5041_v43 }
 0x1a6   :  { %v3683_v25 = vpop.f32.mrb[89].mxu0  ;;  %v3795_v26 = vpop.f32.mrb[89].mxu1  ;;  %3956 = vmatpush3.bf16.msra.mxu0 %v4273_v20  ;;  %3959 = vmatprep.mubr.msk.bf16.mxu0 %vm4306_vm3, %v5543_v37 }
 0x1a7   :  { %v1816_v60 = vadd.f32 %v5153_v15, %v1777_v50  ;;  %v3684_v61 = vadd.f32 %v3683_v25, %v3682_v7  ;;  %v3796_v39 = vadd.f32 %v3795_v26, %v3794_v8  ;;  %v3685_v32 = vpop.f32.mrb[90].mxu0  ;;  %v3797_v19 = vpop.f32.mrb[90].mxu1  ;;  %3957 = vmatprep.subr.bf16.mxu0 %v5543_v37  ;;  %v1847_v31 = vmax.f32 %v1815_v49, 0.0  ;;  %v4277_v49 = vld [vmem:[%s5489_s3 + $0x60] sm:$0xff]  }
 0x1a8   :  { %v3686_v18 = vpop.f32.mrb[91].mxu0  ;;  %v3798_v34 = vpop.f32.mrb[91].mxu1  ;;  %v5553_v8 = vmax.f32 %v5045_v56, %v5047_v58  ;;  %v4278_v26 = vld [vmem:[%s5489_s3 + $0x68] ss:$0 sps:$4 sm:$0x33]  }
 0x1a9   :  { %v1848_v28 = vmax.f32 %v1816_v60, 0.0  ;;  %v1360_v35 = vmax.f32 %v5550_v29, %v3684_v61  ;;  %v3687_v59 = vadd.f32 %v3686_v18, %v3685_v32  ;;  %v3799_v48 = vadd.f32 %v3798_v34, %v3797_v19 }
 0x1aa   :  { %3958 = vmatpush3.bf16.msra.mxu0 %v2271_v51  ;;  %v2395_v18 = vsel %vm1905_vm2, %v4278_v26, 0 }
 0x1ab   :  { %v1874_v17 = vpack.c.bf16 %v1848_v28, %v1847_v31  ;;  %v1778_v40 = vmax.f32 %v1360_v35, %v3796_v39  ;;  %v1361_v2 = vmax.f32 %v5551_v41, %v3687_v59  ;;  %3971 = vmatprep.subr.bf16.mxu0 %v5543_v37  ;;  %v5554_v59 = vmax.f32 %v5051_v10, %v5053_v14 }
 0x1ad   :  { %v1817_v5 = vadd.f32 %v5153_v15, %v1778_v40  ;;  %v1779_v6 = vmax.f32 %v1361_v2, %v3799_v48  ;;  %v3688_v53 = vpop.f32.mrb[92].mxu0  ;;  %v3800_v33 = vpop.f32.mrb[92].mxu1  ;;  %3952 = vmatmul.mubr.msk.bf16.vlgmr.msra.gmra.mrb[140].mxu1 %vm1901_vm4, %v1874_v17  ;;  %v4279_v40 = vld [vmem:[%s5489_s3 + $0x6c] sm:$0xff]  }
 0x1ae   :  { %v3689_v42 = vpop.f32.mrb[93].mxu0  ;;  %v3801_v57 = vpop.f32.mrb[93].mxu1  ;;  %3964 = vmatpush3.bf16.msra.mxu1 %v4275_v16  ;;  %3967 = vmatprep.mubr.msk.bf16.mxu1 %vm4306_vm3, %v5543_v37 }
 0x1af   :  { %v1818_v22 = vadd.f32 %v5153_v15, %v1779_v6  ;;  %v3690_v23 = vadd.f32 %v3689_v42, %v3688_v53  ;;  %v3802_v12 = vadd.f32 %v3801_v57, %v3800_v33  ;;  %v3691_v13 = vpop.f32.mrb[94].mxu0  ;;  %v3803_v46 = vpop.f32.mrb[94].mxu1  ;;  %3965 = vmatprep.subr.bf16.mxu1 %v5543_v37  ;;  %v1849_v0 = vmax.f32 %v1817_v5, 0.0  ;;  %v4280_v6 = vld [vmem:[%s5489_s3 + $0x74] ss:$0 sps:$4 sm:$0x33]  }
 0x1b0   :  { %v3692_v52 = vpop.f32.mrb[95].mxu0  ;;  %v3804_v20 = vpop.f32.mrb[95].mxu1 }
 0x1b1   :  { %v1850_v36 = vmax.f32 %v1818_v22, 0.0  ;;  %v1362_v21 = vmax.f32 %v5552_v54, %v3690_v23  ;;  %v3693_v55 = vadd.f32 %v3692_v52, %v3691_v13  ;;  %v3805_v11 = vadd.f32 %v3804_v20, %v3803_v46 }
 0x1b2   :  { %3966 = vmatpush3.bf16.msra.mxu1 %v2333_v47  ;;  %v2457_v13 = vsel %vm1905_vm2, %v4280_v6, 0  ;;  %v5556_v20 = vmax.f32 %v5063_v1, %v5065_v9 }
 0x1b3   :  { %v1875_v50 = vpack.c.bf16 %v1850_v36, %v1849_v0  ;;  %v1780_v7 = vmax.f32 %v1362_v21, %v3802_v12  ;;  %v1363_v25 = vmax.f32 %v5553_v8, %v3693_v55  ;;  %3979 = vmatprep.subr.bf16.mxu1 %v5543_v37  ;;  %v4281_v55 = vld [vmem:[%s5489_s3 + $0x78] sm:$0xff]   ;;  %v4282_v8 = vld [vmem:[%s5489_s3 + $0x80] ss:$0 sps:$4 sm:$0x33]  }
 0x1b5   :  { %v1819_v38 = vadd.f32 %v5153_v15, %v1780_v7  ;;  %v1781_v43 = vmax.f32 %v1363_v25, %v3805_v11  ;;  %v3694_v60 = vpop.f32.mrb[96].mxu0  ;;  %v3806_v61 = vpop.f32.mrb[96].mxu1  ;;  %3960 = vmatmul.mubr.msk.bf16.vlgmr.msra.gmra.mrb[136].mxu0 %vm1901_vm4, %v1875_v50  ;;  %v5557_v50 = vmax.f32 %v5069_v27, %v5071_v30 }
 0x1b6   :  { %v3695_v39 = vpop.f32.mrb[97].mxu0  ;;  %v3807_v32 = vpop.f32.mrb[97].mxu1  ;;  %3972 = vmatpush3.bf16.msra.mxu0 %v4277_v49  ;;  %3975 = vmatprep.mubr.msk.bf16.mxu0 %vm4306_vm3, %v5543_v37 }
 0x1b7   :  { %v1820_v56 = vadd.f32 %v5153_v15, %v1781_v43  ;;  %v3696_v58 = vadd.f32 %v3695_v39, %v3694_v60  ;;  %v3808_v19 = vadd.f32 %v3807_v32, %v3806_v61  ;;  %v3697_v51 = vpop.f32.mrb[98].mxu0  ;;  %v3809_v31 = vpop.f32.mrb[98].mxu1  ;;  %3973 = vmatprep.subr.bf16.mxu0 %v5543_v37  ;;  %v1851_v34 = vmax.f32 %v1819_v38, 0.0 }
 0x1b8   :  { %v3698_v28 = vpop.f32.mrb[99].mxu0  ;;  %v3810_v29 = vpop.f32.mrb[99].mxu1  ;;  %v2519_v32 = vsel %vm1905_vm2, %v4282_v8, 0 }
 0x1b9   :  { %v1852_v35 = vmax.f32 %v1820_v56, 0.0  ;;  %v1364_v48 = vmax.f32 %v5554_v59, %v3696_v58  ;;  %v3699_v16 = vadd.f32 %v3698_v28, %v3697_v51  ;;  %v3811_v17 = vadd.f32 %v3810_v29, %v3809_v31  ;;  %v4283_v29 = vld [vmem:[%s5489_s3 + $0x84] sm:$0xff]  }
 0x1ba   :  { %3974 = vmatpush3.bf16.msra.mxu0 %v2395_v18  ;;  %v5558_v31 = vmax.f32 %v5075_v63, %v5077_v4 }
 0x1bb   :  { %v1876_v41 = vpack.c.bf16 %v1852_v35, %v1851_v34  ;;  %v1782_v2 = vmax.f32 %v1364_v48, %v3808_v19  ;;  %v1365_v5 = vmax.f32 %v5555_v3, %v3699_v16  ;;  %3987 = vmatprep.subr.bf16.mxu0 %v5543_v37  ;;  %v5559_v48 = vmax.f32 %v5081_v62, %v5083_v24 }
 0x1bd   :  { %v1821_v10 = vadd.f32 %v5153_v15, %v1782_v2  ;;  %v1783_v14 = vmax.f32 %v1365_v5, %v3811_v17  ;;  %v3700_v53 = vpop.f32.mrb[100].mxu0  ;;  %v3812_v33 = vpop.f32.mrb[100].mxu1  ;;  %3968 = vmatmul.mubr.msk.bf16.vlgmr.msra.gmra.mrb[144].mxu1 %vm1901_vm4, %v1876_v41  ;;  %v4284_v17 = vld [vmem:[%s5489_s3 + $0x8c] ss:$0 sps:$4 sm:$0x33]  }
 0x1be   :  { %v3701_v42 = vpop.f32.mrb[101].mxu0  ;;  %v3813_v57 = vpop.f32.mrb[101].mxu1  ;;  %3980 = vmatpush3.bf16.msra.mxu1 %v4279_v40  ;;  %3983 = vmatprep.mubr.msk.bf16.mxu1 %vm4306_vm3, %v5543_v37 }
 0x1bf   :  { %v1822_v44 = vadd.f32 %v5153_v15, %v1783_v14  ;;  %v3702_v45 = vadd.f32 %v3701_v42, %v3700_v53  ;;  %v3814_v22 = vadd.f32 %v3813_v57, %v3812_v33  ;;  %v3703_v23 = vpop.f32.mrb[102].mxu0  ;;  %v3815_v12 = vpop.f32.mrb[102].mxu1  ;;  %3981 = vmatprep.subr.bf16.mxu1 %v5543_v37  ;;  %v1853_v46 = vmax.f32 %v1821_v10, 0.0 }
 0x1c0   :  { %v3704_v47 = vpop.f32.mrb[103].mxu0  ;;  %v3816_v0 = vpop.f32.mrb[103].mxu1  ;;  %v2581_v14 = vsel %vm1905_vm2, %v4284_v17, 0 }
 0x1c1   :  { %v1854_v52 = vmax.f32 %v1822_v44, 0.0  ;;  %v1366_v36 = vmax.f32 %v5556_v20, %v3702_v45  ;;  %v3705_v54 = vadd.f32 %v3704_v47, %v3703_v23  ;;  %v3817_v21 = vadd.f32 %v3816_v0, %v3815_v12  ;;  %v5560_v44 = vld [vmem:[#allocation2_spill] sm:$0xff]  ;;  %v5561_v45 = vld [vmem:[#allocation3_spill] sm:$0xff]  ;;  %v5564_v20 = vld [vmem:[#allocation5_spill] sm:$0xff] }
 0x1c2   :  { %3982 = vmatpush3.bf16.msra.mxu1 %v2457_v13 }
 0x1c3   :  { %v1877_v11 = vpack.c.bf16 %v1854_v52, %v1853_v46  ;;  %v1784_v49 = vmax.f32 %v1366_v36, %v3814_v22  ;;  %v1367_v7 = vmax.f32 %v5557_v50, %v3705_v54  ;;  %3995 = vmatprep.subr.bf16.mxu1 %v5543_v37  ;;  %v5562_v22 = vmax.f32 %v5560_v44, %v5561_v45  ;;  %v4285_v46 = vld [vmem:[%s5489_s3 + $0x90] sm:$0xff]  }
 0x1c4   :  { %v5563_v52 = vld [vmem:[#allocation4_spill] sm:$0xff] }
 0x1c5   :  { %v1823_v1 = vadd.f32 %v5153_v15, %v1784_v49  ;;  %v1785_v9 = vmax.f32 %v1367_v7, %v3817_v21  ;;  %v3706_v25 = vpop.f32.mrb[104].mxu0  ;;  %v3818_v26 = vpop.f32.mrb[104].mxu1  ;;  %3976 = vmatmul.mubr.msk.bf16.vlgmr.msra.gmra.mrb[140].mxu0 %vm1901_vm4, %v1877_v11  ;;  %v5565_v36 = vmax.f32 %v5563_v52, %v5564_v20  ;;  %v4286_v21 = vld [vmem:[%s5489_s3 + $0x98] ss:$0 sps:$4 sm:$0x33]  }
 0x1c6   :  { %v3707_v38 = vpop.f32.mrb[105].mxu0  ;;  %v3819_v43 = vpop.f32.mrb[105].mxu1  ;;  %3988 = vmatpush3.bf16.msra.mxu0 %v4281_v55  ;;  %3991 = vmatprep.mubr.msk.bf16.mxu0 %vm4306_vm3, %v5543_v37 }
 0x1c7   :  { %v1824_v27 = vadd.f32 %v5153_v15, %v1785_v9  ;;  %v3708_v30 = vadd.f32 %v3707_v38, %v3706_v25  ;;  %v3820_v60 = vadd.f32 %v3819_v43, %v3818_v26  ;;  %v3709_v61 = vpop.f32.mrb[106].mxu0  ;;  %v3821_v39 = vpop.f32.mrb[106].mxu1  ;;  %3989 = vmatprep.subr.bf16.mxu0 %v5543_v37  ;;  %v1855_v56 = vmax.f32 %v1823_v1, 0.0 }
 0x1c8   :  { %v3710_v58 = vpop.f32.mrb[107].mxu0  ;;  %v3822_v19 = vpop.f32.mrb[107].mxu1  ;;  %v2643_v43 = vsel %vm1905_vm2, %v4286_v21, 0 }
 0x1c9   :  { %v1856_v51 = vmax.f32 %v1824_v27, 0.0  ;;  %v1368_v18 = vmax.f32 %v5558_v31, %v3708_v30  ;;  %v3711_v34 = vadd.f32 %v3710_v58, %v3709_v61  ;;  %v3823_v28 = vadd.f32 %v3822_v19, %v3821_v39  ;;  %v5566_v39 = vld [vmem:[#allocation6_spill] sm:$0xff] }
 0x1ca   :  { %3990 = vmatpush3.bf16.msra.mxu0 %v2519_v32  ;;  %v5567_v32 = vld [vmem:[#allocation7_spill] sm:$0xff]  ;;  %v4287_v31 = vld [vmem:[%s5489_s3 + $0x9c] sm:$0xff]  }
 0x1cb   :  { %v1878_v35 = vpack.c.bf16 %v1856_v51, %v1855_v56  ;;  %v1786_v59 = vmax.f32 %v1368_v18, %v3820_v60  ;;  %v1369_v16 = vmax.f32 %v5559_v48, %v3711_v34  ;;  %4003 = vmatprep.subr.bf16.mxu0 %v5543_v37  ;;  %v5568_v56 = vmax.f32 %v5566_v39, %v5567_v32  ;;  %v4288_v48 = vld [vmem:[%s5489_s3 + $0xa4] ss:$0 sps:$4 sm:$0x33]  }
 0x1cd   :  { %v1825_v63 = vadd.f32 %v5153_v15, %v1786_v59  ;;  %v1787_v4 = vmax.f32 %v1369_v16, %v3823_v28  ;;  %v3712_v40 = vpop.f32.mrb[108].mxu0  ;;  %v3824_v41 = vpop.f32.mrb[108].mxu1  ;;  %3984 = vmatmul.mubr.msk.bf16.vlgmr.msra.gmra.mrb[148].mxu1 %vm1901_vm4, %v1878_v35  ;;  %v5569_v28 = vld [vmem:[#allocation8_spill] sm:$0xff] }
 0x1ce   :  { %v3713_v2 = vpop.f32.mrb[109].mxu0  ;;  %v3825_v3 = vpop.f32.mrb[109].mxu1  ;;  %3996 = vmatpush3.bf16.msra.mxu1 %v4283_v29  ;;  %3999 = vmatprep.mubr.msk.bf16.mxu1 %vm4306_vm3, %v5543_v37  ;;  %v5570_v29 = vld [vmem:[#allocation9_spill] sm:$0xff] }
 0x1cf   :  { %v1826_v62 = vadd.f32 %v5153_v15, %v1787_v4  ;;  %v3714_v24 = vadd.f32 %v3713_v2, %v3712_v40  ;;  %v3826_v5 = vadd.f32 %v3825_v3, %v3824_v41  ;;  %v3715_v6 = vpop.f32.mrb[110].mxu0  ;;  %v3827_v10 = vpop.f32.mrb[110].mxu1  ;;  %3997 = vmatprep.subr.bf16.mxu1 %v5543_v37  ;;  %v1857_v53 = vmax.f32 %v1825_v63, 0.0 }
 0x1d0   :  { %v3716_v33 = vpop.f32.mrb[111].mxu0  ;;  %v3828_v42 = vpop.f32.mrb[111].mxu1  ;;  %v5571_v35 = vmax.f32 %v5569_v28, %v5570_v29 }
 0x1d1   :  { %v1858_v57 = vmax.f32 %v1826_v62, 0.0  ;;  %v1370_v23 = vmax.f32 %v5562_v22, %v3714_v24  ;;  %v3717_v12 = vadd.f32 %v3716_v33, %v3715_v6  ;;  %v3829_v13 = vadd.f32 %v3828_v42, %v3827_v10  ;;  %v5572_v42 = vld [vmem:[#allocation10_spill] sm:$0xff] }
 0x1d2   :  { %3998 = vmatpush3.bf16.msra.mxu1 %v2581_v14  ;;  %v2705_v6 = vsel %vm1905_vm2, %v4288_v48, 0 }
 0x1d3   :  { %v1879_v47 = vpack.c.bf16 %v1858_v57, %v1857_v53  ;;  %v1788_v0 = vmax.f32 %v1370_v23, %v3826_v5  ;;  %v1371_v54 = vmax.f32 %v5565_v36, %v3717_v12  ;;  %4011 = vmatprep.subr.bf16.mxu1 %v5543_v37  ;;  %v5573_v57 = vld [vmem:[#allocation11_spill] sm:$0xff]  ;;  %v4290_v36 = vld [vmem:[%s5489_s3 + $0xb0] ss:$0 sps:$4 sm:$0x33]  }
 0x1d4   :  { %v5574_v44 = vmax.f32 %v5572_v42, %v5573_v57  ;;  %v4289_v12 = vld [vmem:[%s5489_s3 + $0xa8] sm:$0xff]  }
 0x1d5   :  { %v1827_v55 = vadd.f32 %v5153_v15, %v1788_v0  ;;  %v1789_v11 = vmax.f32 %v1371_v54, %v3829_v13  ;;  %v3718_v49 = vpop.f32.mrb[112].mxu0  ;;  %v3830_v50 = vpop.f32.mrb[112].mxu1  ;;  %3992 = vmatmul.mubr.msk.bf16.vlgmr.msra.gmra.mrb[144].mxu0 %vm1901_vm4, %v1879_v47  ;;  %v5575_v47 = vld [vmem:[#allocation12_spill] sm:$0xff]  ;;  %v5576_v0 = vld [vmem:[#allocation13_spill] sm:$0xff] }
 0x1d6   :  { %v3719_v7 = vpop.f32.mrb[113].mxu0  ;;  %v3831_v8 = vpop.f32.mrb[113].mxu1  ;;  %4004 = vmatpush3.bf16.msra.mxu0 %v4285_v46  ;;  %4007 = vmatprep.mubr.msk.bf16.mxu0 %vm4306_vm3, %v5543_v37  ;;  %v5577_v52 = vmax.f32 %v5575_v47, %v5576_v0 }
 0x1d7   :  { %v1828_v1 = vadd.f32 %v5153_v15, %v1789_v11  ;;  %v3720_v9 = vadd.f32 %v3719_v7, %v3718_v49  ;;  %v3832_v25 = vadd.f32 %v3831_v8, %v3830_v50  ;;  %v3721_v26 = vpop.f32.mrb[114].mxu0  ;;  %v3833_v38 = vpop.f32.mrb[114].mxu1  ;;  %4005 = vmatprep.subr.bf16.mxu0 %v5543_v37  ;;  %v1859_v27 = vmax.f32 %v1827_v55, 0.0 }
 0x1d8   :  { %v3722_v30 = vpop.f32.mrb[115].mxu0  ;;  %v3834_v60 = vpop.f32.mrb[115].mxu1 }
 0x1d9   :  { %v1860_v61 = vmax.f32 %v1828_v1, 0.0  ;;  %v1372_v58 = vmax.f32 %v5568_v56, %v3720_v9  ;;  %v3723_v19 = vadd.f32 %v3722_v30, %v3721_v26  ;;  %v3835_v51 = vadd.f32 %v3834_v60, %v3833_v38  ;;  %v5578_v60 = vld [vmem:[#allocation14_spill] sm:$0xff] }
 0x1da   :  { %4006 = vmatpush3.bf16.msra.mxu0 %v2643_v43  ;;  %v2767_v26 = vsel %vm1905_vm2, %v4290_v36, 0 }
 0x1db   :  { %v1880_v18 = vpack.c.bf16 %v1860_v61, %v1859_v27  ;;  %v1790_v34 = vmax.f32 %v1372_v58, %v3832_v25  ;;  %v1373_v59 = vmax.f32 %v5571_v35, %v3723_v19  ;;  %4019 = vmatprep.subr.bf16.mxu0 %v5543_v37  ;;  %v5579_v61 = vld [vmem:[#allocation15_spill] sm:$0xff]  ;;  %v4291_v19 = vld [vmem:[%s5489_s3 + $0xb4] sm:$0xff]   ;;  %v4292_v35 = vld [vmem:[%s5489_s3 + $0xbc] ss:$0 sps:$4 sm:$0x33]  }
 0x1dc   :  { %v5580_v39 = vmax.f32 %v5578_v60, %v5579_v61 }
 0x1dd   :  { %v1829_v16 = vadd.f32 %v5153_v15, %v1790_v34  ;;  %v1791_v17 = vmax.f32 %v1373_v59, %v3835_v51  ;;  %v3724_v63 = vpop.f32.mrb[116].mxu0  ;;  %v3836_v4 = vpop.f32.mrb[116].mxu1  ;;  %4000 = vmatmul.mubr.msk.bf16.vlgmr.msra.gmra.mrb[152].mxu1 %vm1901_vm4, %v1880_v18  ;;  %v5581_v18 = vld [vmem:[#allocation16_spill] sm:$0xff]  ;;  %v5582_v34 = vld [vmem:[#allocation17_spill] sm:$0xff] }
 0x1de   :  { %v3725_v40 = vpop.f32.mrb[117].mxu0  ;;  %v3837_v41 = vpop.f32.mrb[117].mxu1  ;;  %4012 = vmatpush3.bf16.msra.mxu1 %v4287_v31  ;;  %4015 = vmatprep.mubr.msk.bf16.mxu1 %vm4306_vm3, %v5543_v37  ;;  %v5583_v28 = vmax.f32 %v5581_v18, %v5582_v34 }
 0x1df   :  { %v1830_v2 = vadd.f32 %v5153_v15, %v1791_v17  ;;  %v3726_v3 = vadd.f32 %v3725_v40, %v3724_v63  ;;  %v3838_v62 = vadd.f32 %v3837_v41, %v3836_v4  ;;  %v3727_v24 = vpop.f32.mrb[118].mxu0  ;;  %v3839_v5 = vpop.f32.mrb[118].mxu1  ;;  %4013 = vmatprep.subr.bf16.mxu1 %v5543_v37  ;;  %v1861_v10 = vmax.f32 %v1829_v16, 0.0 }
 0x1e0   :  { %v3728_v14 = vpop.f32.mrb[119].mxu0  ;;  %v3840_v53 = vpop.f32.mrb[119].mxu1 }
 0x1e1   :  { %v1862_v33 = vmax.f32 %v1830_v2, 0.0  ;;  %v1374_v45 = vmax.f32 %v5574_v44, %v3726_v3  ;;  %v3729_v22 = vadd.f32 %v3728_v14, %v3727_v24  ;;  %v3841_v23 = vadd.f32 %v3840_v53, %v3839_v5  ;;  %v5584_v53 = vld [vmem:[#allocation18_spill] sm:$0xff] }
 0x1e2   :  { %4014 = vmatpush3.bf16.msra.mxu1 %v2705_v6  ;;  %v2829_v24 = vsel %vm1905_vm2, %v4292_v35, 0 }
 0x1e3   :  { %v1881_v13 = vpack.c.bf16 %v1862_v33, %v1861_v10  ;;  %v1792_v46 = vmax.f32 %v1374_v45, %v3838_v62  ;;  %v1375_v20 = vmax.f32 %v5577_v52, %v3729_v22  ;;  %4027 = vmatprep.subr.bf16.mxu1 %v5543_v37  ;;  %v5585_v33 = vld [vmem:[#allocation19_spill] sm:$0xff] }
 0x1e4   :  { %v5586_v42 = vmax.f32 %v5584_v53, %v5585_v33 }
 0x1e5   :  { %v1831_v54 = vadd.f32 %v5153_v15, %v1792_v46  ;;  %v1793_v21 = vmax.f32 %v1375_v20, %v3841_v23  ;;  %v3730_v55 = vpop.f32.mrb[120].mxu0  ;;  %v3842_v11 = vpop.f32.mrb[120].mxu1  ;;  %4008 = vmatmul.mubr.msk.bf16.vlgmr.msra.gmra.mrb[148].mxu0 %vm1901_vm4, %v1881_v13  ;;  %v5588_v13 = vld [vmem:[#allocation21_spill] sm:$0xff] }
 0x1e6   :  { %v3731_v49 = vpop.f32.mrb[121].mxu0  ;;  %v3843_v50 = vpop.f32.mrb[121].mxu1  ;;  %4020 = vmatpush3.bf16.msra.mxu0 %v4289_v12  ;;  %4023 = vmatprep.mubr.msk.bf16.mxu0 %vm4306_vm3, %v5543_v37  ;;  %v5587_v12 = vld [vmem:[#allocation20_spill] sm:$0xff] }
 0x1e7   :  { %v1832_v7 = vadd.f32 %v5153_v15, %v1793_v21  ;;  %v3732_v8 = vadd.f32 %v3731_v49, %v3730_v55  ;;  %v3844_v1 = vadd.f32 %v3843_v50, %v3842_v11  ;;  %v3733_v9 = vpop.f32.mrb[122].mxu0  ;;  %v3845_v25 = vpop.f32.mrb[122].mxu1  ;;  %4021 = vmatprep.subr.bf16.mxu0 %v5543_v37  ;;  %v1863_v38 = vmax.f32 %v1831_v54, 0.0  ;;  %v4293_v55 = vld [vmem:[%s5491_s5] sm:$0xff]   ;;  %v4294_v11 = vld [vmem:[%s5491_s5 + $0x8] sm:$0xff]  }
 0x1e8   :  { %v3734_v43 = vpop.f32.mrb[123].mxu0  ;;  %v3846_v27 = vpop.f32.mrb[123].mxu1  ;;  %v5589_v46 = vmax.f32 %v5587_v12, %v5588_v13  ;;  %v4296_v49 = vld [vmem:[%s5491_s5 + $0x18] ss:$0 sps:$4 sm:$0x11]  }
 0x1e9   :  { %v1864_v30 = vmax.f32 %v1832_v7, 0.0  ;;  %v1376_v32 = vmax.f32 %v5580_v39, %v3732_v8  ;;  %v3735_v56 = vadd.f32 %v3734_v43, %v3733_v9  ;;  %v3847_v58 = vadd.f32 %v3846_v27, %v3845_v25 }
 0x1ea   :  { %4022 = vmatpush3.bf16.msra.mxu0 %v2767_v26  ;;  %v2927_v50 = vsel %vm2925_vm5, %v4296_v49, 0 }
 0x1eb   :  { %v1882_v51 = vpack.c.bf16 %v1864_v30, %v1863_v38  ;;  %v1794_v31 = vmax.f32 %v1376_v32, %v3844_v1  ;;  %v1377_v29 = vmax.f32 %v5583_v28, %v3735_v56  ;;  %4035 = vmatprep.subr.bf16.mxu0 %v5543_v37 }
 0x1ed   :  { %v1833_v59 = vadd.f32 %v5153_v15, %v1794_v31  ;;  %v1795_v48 = vmax.f32 %v1377_v29, %v3847_v58  ;;  %v3736_v16 = vpop.f32.mrb[124].mxu0  ;;  %v3848_v17 = vpop.f32.mrb[124].mxu1  ;;  %4016 = vmatmul.mubr.msk.bf16.vlgmr.msra.gmra.mrb[156].mxu1 %vm1901_vm4, %v1882_v51 }
 0x1ee   :  { %v3737_v63 = vpop.f32.mrb[125].mxu0  ;;  %v3849_v4 = vpop.f32.mrb[125].mxu1  ;;  %4028 = vmatpush3.bf16.msra.mxu1 %v4291_v19  ;;  %4031 = vmatprep.mubr.msk.bf16.mxu1 %vm4306_vm3, %v5543_v37 }
 0x1ef   :  { %v1834_v40 = vadd.f32 %v5153_v15, %v1795_v48  ;;  %v3738_v41 = vadd.f32 %v3737_v63, %v3736_v16  ;;  %v3850_v2 = vadd.f32 %v3849_v4, %v3848_v17  ;;  %v3739_v3 = vpop.f32.mrb[126].mxu0  ;;  %v3851_v62 = vpop.f32.mrb[126].mxu1  ;;  %4029 = vmatprep.subr.bf16.mxu1 %v5543_v37  ;;  %v1865_v5 = vmax.f32 %v1833_v59, 0.0 }
 0x1f0   :  { %v3740_v6 = vpop.f32.mrb[127].mxu0  ;;  %v3852_v10 = vpop.f32.mrb[127].mxu1 }
 0x1f1   :  { %v1866_v14 = vmax.f32 %v1834_v40, 0.0  ;;  %v1378_v57 = vmax.f32 %v5586_v42, %v3738_v41  ;;  %v3741_v44 = vadd.f32 %v3740_v6, %v3739_v3  ;;  %v3853_v45 = vadd.f32 %v3852_v10, %v3851_v62 }
 0x1f2   :  { %4030 = vmatpush3.bf16.msra.mxu1 %v2829_v24 }
 0x1f3   :  { %v1883_v22 = vpack.c.bf16 %v1866_v14, %v1865_v5  ;;  %v1796_v23 = vmax.f32 %v1378_v57, %v3850_v2  ;;  %v1379_v47 = vmax.f32 %v5589_v46, %v3741_v44 }
 0x1f5   :  { %v1835_v0 = vadd.f32 %v5153_v15, %v1796_v23  ;;  %v1797_v52 = vmax.f32 %v1379_v47, %v3853_v45  ;;  %4024 = vmatmul.mubr.msk.bf16.vlgmr.msra.gmra.mrb[152].mxu0 %vm1901_vm4, %v1883_v22 }
 0x1f6   :  { %4043 = vmatprep.mubr.msk.bf16.mxu0 %vm4306_vm3, %v5543_v37  ;;  %4036 = vmatpush3.bf16.msra.mxu0 %v4293_v55 }
 0x1f7   :  { %v1836_v20 = vadd.f32 %v5153_v15, %v1797_v52  ;;  %v1867_v36 = vmax.f32 %v1835_v0, 0.0  ;;  %4037 = vmatprep.subr.bf16.mxu0 %v5543_v37  ;;  %v4295_v15 = vld [vmem:[%s5491_s5 + $0x10] sm:$0xff]  }
 0x1f9   :  { %v1868_v54 = vmax.f32 %v1836_v20, 0.0 }
 0x1fa   :  { %4038 = vmatpush3.bf16.msra.mxu0 %v4294_v11 }
 0x1fb   :  { %v1884_v21 = vpack.c.bf16 %v1868_v54, %v1867_v36  ;;  %4039 = vmatprep.subr.bf16.mxu0 %v5543_v37 }
 0x1fd   :  { %4032 = vmatmul.mubr.msk.bf16.vlgmr.msra.gmra.mrb[160].mxu1 %vm1901_vm4, %v1884_v21 }
 0x1fe   :  { %4040 = vmatpush3.bf16.msra.mxu0 %v4295_v15 }
 0x1ff   :  { %4041 = vmatprep.subr.bf16.mxu0 %v5543_v37 }
 0x202   :  { %4042 = vmatpush3.bf16.msra.mxu0 %v2927_v50 }
 0x260   :  { %v1943_v7 = vpop.f32.mrb[128].mxu1 }
 0x261   :  { %v3913_v8 = vpop.f32.mrb[129].mxu1 }
 0x262   :  { %v1946_v1 = vpop.f32.mrb[130].mxu1 }
 0x263   :  { %v3914_v9 = vpop.f32.mrb[131].mxu1 }
 0x268   :  { %v1999_v25 = vpop.f32.mrb[132].mxu1  ;;  %v2059_v26 = vpop.f32.mrb[128].mxu0 }
 0x269   :  { %v2000_v38 = vadd.f32 %v1999_v25, %v1943_v7  ;;  %v3921_v43 = vpop.f32.mrb[133].mxu1  ;;  %v3929_v27 = vpop.f32.mrb[129].mxu0 }
 0x26a   :  { %v2002_v30 = vpop.f32.mrb[134].mxu1  ;;  %v2062_v60 = vpop.f32.mrb[130].mxu0 }
 0x26b   :  { %v2066_v61 = vadd.f32 %v2059_v26, %v2000_v38  ;;  %v2003_v37 = vadd.f32 %v2002_v30, %v1946_v1  ;;  %v3922_v39 = vpop.f32.mrb[135].mxu1  ;;  %v3930_v32 = vpop.f32.mrb[131].mxu0 }
 0x26d   :  { %v2067_v56 = vadd.f32 %v2062_v60, %v2003_v37 }
 0x270   :  { %v2121_v58 = vpop.f32.mrb[136].mxu1 }
 0x271   :  { %v2128_v19 = vadd.f32 %v2121_v58, %v2066_v61  ;;  %v3937_v51 = vpop.f32.mrb[137].mxu1 }
 0x272   :  { %v2124_v31 = vpop.f32.mrb[138].mxu1 }
 0x273   :  { %v2129_v18 = vadd.f32 %v2124_v31, %v2067_v56  ;;  %v3938_v34 = vpop.f32.mrb[139].mxu1 }
 0x278   :  { %v2183_v28 = vpop.f32.mrb[132].mxu0 }
 0x279   :  { %v2190_v29 = vadd.f32 %v2183_v28, %v2128_v19  ;;  %v3945_v35 = vpop.f32.mrb[133].mxu0 }
 0x27a   :  { %v2186_v59 = vpop.f32.mrb[134].mxu0 }
 0x27b   :  { %v2191_v48 = vadd.f32 %v2186_v59, %v2129_v18  ;;  %v3946_v16 = vpop.f32.mrb[135].mxu0  ;;  %v3399_v59 = vld [vmem:[%s5492_s4] ss:$0 sm:$0xff] }
 0x280   :  { %v2245_v17 = vpop.f32.mrb[140].mxu1 }
 0x281   :  { %v2252_v63 = vadd.f32 %v2245_v17, %v2190_v29  ;;  %v3953_v4 = vpop.f32.mrb[141].mxu1 }
 0x282   :  { %v2248_v40 = vpop.f32.mrb[142].mxu1 }
 0x283   :  { %v2253_v41 = vadd.f32 %v2248_v40, %v2191_v48  ;;  %v3954_v2 = vpop.f32.mrb[143].mxu1 }
 0x288   :  { %v2307_v3 = vpop.f32.mrb[136].mxu0 }
 0x289   :  { %v2314_v62 = vadd.f32 %v2307_v3, %v2252_v63  ;;  %v3961_v24 = vpop.f32.mrb[137].mxu0 }
 0x28a   :  { %v2310_v5 = vpop.f32.mrb[138].mxu0  ;;  %v3400_v24 = vld [vmem:[%s5493_s6] ss:$0 sm:$0xff] }
 0x28b   :  { %v2315_v6 = vadd.f32 %v2310_v5, %v2253_v41  ;;  %v3962_v10 = vpop.f32.mrb[139].mxu0 }
 0x290   :  { %v2369_v14 = vpop.f32.mrb[144].mxu1 }
 0x291   :  { %v2376_v53 = vadd.f32 %v2369_v14, %v2314_v62  ;;  %v3969_v33 = vpop.f32.mrb[145].mxu1 }
 0x292   :  { %v2372_v42 = vpop.f32.mrb[146].mxu1 }
 0x293   :  { %v2377_v57 = vadd.f32 %v2372_v42, %v2315_v6  ;;  %v3970_v44 = vpop.f32.mrb[147].mxu1 }
 0x298   :  { %v2431_v45 = vpop.f32.mrb[140].mxu0 }
 0x299   :  { %v2438_v22 = vadd.f32 %v2431_v45, %v2376_v53  ;;  %v3977_v23 = vpop.f32.mrb[141].mxu0 }
 0x29a   :  { %v2434_v12 = vpop.f32.mrb[142].mxu0 }
 0x29b   :  { %v2439_v13 = vadd.f32 %v2434_v12, %v2377_v57  ;;  %v3978_v46 = vpop.f32.mrb[143].mxu0 }
 0x2a0   :  { %v2493_v47 = vpop.f32.mrb[148].mxu1 }
 0x2a1   :  { %v2500_v0 = vadd.f32 %v2493_v47, %v2438_v22  ;;  %v3985_v52 = vpop.f32.mrb[149].mxu1 }
 0x2a2   :  { %v2496_v20 = vpop.f32.mrb[150].mxu1 }
 0x2a3   :  { %v2501_v36 = vadd.f32 %v2496_v20, %v2439_v13  ;;  %v3986_v54 = vpop.f32.mrb[151].mxu1 }
 0x2a8   :  { %v2555_v21 = vpop.f32.mrb[144].mxu0 }
 0x2a9   :  { %v2562_v55 = vadd.f32 %v2555_v21, %v2500_v0  ;;  %v3993_v11 = vpop.f32.mrb[145].mxu0 }
 0x2aa   :  { %v2558_v15 = vpop.f32.mrb[146].mxu0 }
 0x2ab   :  { %v2563_v49 = vadd.f32 %v2558_v15, %v2501_v36  ;;  %v3994_v50 = vpop.f32.mrb[147].mxu0 }
 0x2b0   :  { %v2617_v7 = vpop.f32.mrb[152].mxu1 }
 0x2b1   :  { %v2624_v8 = vadd.f32 %v2617_v7, %v2562_v55  ;;  %v4001_v1 = vpop.f32.mrb[153].mxu1 }
 0x2b2   :  { %v2620_v9 = vpop.f32.mrb[154].mxu1 }
 0x2b3   :  { %v2625_v25 = vadd.f32 %v2620_v9, %v2563_v49  ;;  %v4002_v26 = vpop.f32.mrb[155].mxu1 }
 0x2b8   :  { %v2679_v38 = vpop.f32.mrb[148].mxu0 }
 0x2b9   :  { %v2686_v43 = vadd.f32 %v2679_v38, %v2624_v8  ;;  %v4009_v27 = vpop.f32.mrb[149].mxu0 }
 0x2ba   :  { %v2682_v30 = vpop.f32.mrb[150].mxu0 }
 0x2bb   :  { %v2687_v60 = vadd.f32 %v2682_v30, %v2625_v25  ;;  %v4010_v61 = vpop.f32.mrb[151].mxu0 }
 0x2c0   :  { %v2741_v37 = vpop.f32.mrb[156].mxu1 }
 0x2c1   :  { %v2748_v39 = vadd.f32 %v2741_v37, %v2686_v43  ;;  %v4017_v32 = vpop.f32.mrb[157].mxu1 }
 0x2c2   :  { %v2744_v56 = vpop.f32.mrb[158].mxu1 }
 0x2c3   :  { %v2749_v58 = vadd.f32 %v2744_v56, %v2687_v60  ;;  %v4018_v19 = vpop.f32.mrb[159].mxu1 }
 0x2c8   :  { %v2803_v51 = vpop.f32.mrb[152].mxu0 }
 0x2c9   :  { %v2810_v31 = vadd.f32 %v2803_v51, %v2748_v39  ;;  %v4025_v18 = vpop.f32.mrb[153].mxu0 }
 0x2ca   :  { %v2806_v34 = vpop.f32.mrb[154].mxu0 }
 0x2cb   :  { %v2811_v28 = vadd.f32 %v2806_v34, %v2749_v58  ;;  %v4026_v29 = vpop.f32.mrb[155].mxu0 }
 0x2d0   :  { %v2865_v35 = vpop.f32.mrb[160].mxu1 }
 0x2d1   :  { %v2872_v48 = vadd.f32 %v2865_v35, %v2810_v31  ;;  %v4033_v16 = vpop.f32.mrb[161].mxu1 }
 0x2d2   :  { %v2868_v17 = vpop.f32.mrb[162].mxu1 }
 0x2d3   :  { %v2881_v63 = vadd.f32 %v3399_v59, %v2872_v48  ;;  %v2873_v4 = vadd.f32 %v2868_v17, %v2811_v28  ;;  %v4034_v40 = vpop.f32.mrb[163].mxu1 }
 0x2d5   :  { %v2882_v41 = vadd.f32 %v3399_v59, %v2873_v4  ;;  %v2883_v2 = vmax.f32 %v2881_v63, 0.0 }
 0x2d7   :  { %v2884_v3 = vmax.f32 %v2882_v41, 0.0 }
 0x2d9   :  { %v2885_v62 = vpack.c.bf16 %v2884_v3, %v2883_v2 }
 0x2db   :  { %4044 = vmatmul.mubr.msk.bf16.vlgmr.msra.gmra.mrb[156].mxu0 %vm2921_vm6, %v2885_v62 }
 0x3ae   :  { %v2963_v5 = vpop.f32.mrb[156].mxu0 }
 0x3af   :  { %v2964_v6 = vadd.f32 %v3400_v24, %v2963_v5  ;;  %v4045_v10 = vpop.f32.mrb[157].mxu0 }
 0x3b0   :  { %v2966_v14 = vpop.f32.mrb[158].mxu0 }
 0x3b1   :  { %v2967_v53 = vadd.f32 %v3400_v24, %v2966_v14  ;;  %v4046_v33 = vpop.f32.mrb[159].mxu0  ;;  %v2971_v42 = vsel %vm2970_vm7, %v2964_v6, -inf }
 0x3b2   :  { %2972 = vmax.xlane.f32.xlu0 %v2971_v42 }
 0x3b3   :  { %v2974_v57 = vsel %vm2970_vm7, %v2967_v53, -inf }
 0x3b6   :  { %2975 = vmax.xlane.f32.xlu0 %v2974_v57 }
 0x43f   :  { %v2973_v44 = vpop.xlane.xlu0 %2972 }
 0x440   :  { %v2977_v45 = vsub.f32 %v2964_v6, %v2973_v44 }
 0x442   :  { %v2979_v22 = vmul.f32 1.442695, %v2977_v45 }
 0x443   :  { %v2976_v23 = vpop.xlane.xlu0 %2975 }
 0x444   :  { %4297 = vpow2.f32 %v2979_v22  ;;  %v2978_v12 = vsub.f32 %v2967_v53, %v2976_v23 }
 0x446   :  { %v2981_v13 = vmul.f32 1.442695, %v2978_v12 }
 0x448   :  { %4299 = vpow2.f32 %v2981_v13 }
 0x44e   :  { %v4298_v46 = vpop.eup %4297 }
 0x44f   :  { %v2983_v47 = vsel %vm2970_vm7, %v4298_v46, 0.0 }
 0x450   :  { %2984 = vadd.xlane.f32.xlu1 %v2983_v47 }
 0x452   :  { %v4300_v0 = vpop.eup %4299 }
 0x453   :  { %v2986_v52 = vsel %vm2970_vm7, %v4300_v0, 0.0 }
 0x454   :  { %2987 = vadd.xlane.f32.xlu1 %v2986_v52 }
 0x4dd   :  { %v2985_v20 = vpop.xlane.xlu1 %2984 }
 0x4de   :  { %4301 = vlog2.f32 %v2985_v20 }
 0x4e1   :  { %v2988_v36 = vpop.xlane.xlu1 %2987 }
 0x4e2   :  { %4303 = vlog2.f32 %v2988_v36 }
 0x4e8   :  { %v4302_v54 = vpop.eup %4301 }
 0x4e9   :  { %v2990_v21 = vmul.f32 0.6931472, %v4302_v54 }
 0x4eb   :  { %v2993_v55 = vsub.f32 %v2977_v45, %v2990_v21 }
 0x4ec   :  { %v4304_v11 = vpop.eup %4303 }
 0x4ed   :  { %2995 = vst.msk [vmem:[%s5494_s7] sm:$0xff] %vm2970_vm7, %v2993_v55  ;;  %v2992_v15 = vmul.f32 0.6931472, %v4304_v11 }
 0x4ef   :  { %v2994_v49 = vsub.f32 %v2978_v12, %v2992_v15 }
 0x4f1   :  { %2996 = vst.msk [vmem:[%s5494_s7 + $0x8] sm:$0xff] %vm2970_vm7, %v2994_v49 }

</bundles_post_ra>
